<compile_context>
chip_gen: v6e
topology: v6e:2x2x1
jax: 0.10.0
libtpu: 0.0.40
codegen_flags: <defaults>
</compile_context>

<pallas_src>
import jax
import jax.numpy as jnp
import numpy as np
from jax import lax
from jax.experimental import pallas as pl
from jax.experimental.pallas import tpu as pltpu


# ----------------------------------------------------------------------------
# Fused Pallas kernel (all LSTM layers + FC head)
# ----------------------------------------------------------------------------
def _make_fused_lstm_kernel(num_layers, T, B, H):
    """Builds the fused kernel for static (num_layers, T, B, H)."""

    def kernel(*refs):
        # ---- unpack refs (inputs, outputs, scratch) ----
        x_ref = refs[0]                        # (T*B, D0)  time-major input
        len_ref = refs[1]                      # (B, 1)     int32 lengths
        w_refs = refs[2:2 + 3 * num_layers]    # per layer: W_ih^T, W_hh^T, b
        fcw_ref = refs[2 + 3 * num_layers]     # (H, O)
        fcb_ref = refs[3 + 3 * num_layers]     # (1, O)
        out_ref = refs[4 + 3 * num_layers]     # (T*B, O)
        pre_sc, hseq_sc, h_sc, c_sc = refs[5 + 3 * num_layers:]

        len_col = len_ref[...]                 # (B, 1) int32

        layer_in = x_ref[...]                  # (T*B, D_in)
        for l in range(num_layers):
            wih = w_refs[3 * l][...]           # (D_in, 4H)
            whh = w_refs[3 * l + 1][...]       # (H, 4H)
            bias = w_refs[3 * l + 2][...]      # (1, 4H)

            # Hoisted input projection: one big GEMM over all timesteps.
            pre = jnp.dot(layer_in, wih,
                          preferred_element_type=jnp.float32) + bias
            pre_sc[...] = pre.reshape(T, B, 4 * H)

            h_sc[...] = jnp.zeros_like(h_sc)
            c_sc[...] = jnp.zeros_like(c_sc)

            def step(t, carry):
                h = h_sc[...]                  # (B, H)
                c = c_sc[...]                  # (B, H)
                gates = pre_sc[t] + jnp.dot(
                    h, whh, preferred_element_type=jnp.float32)   # (B, 4H)

                # Full-lane-width nonlinearities (one EUP pass each),
                # then static per-gate lane slices.  Gate order [i, f, g, o].
                sig = 0.5 * (jnp.tanh(0.5 * gates) + 1.0)   # sigmoid via tanh
                th = jnp.tanh(gates)
                i_g = sig[:, 0 * H:1 * H]
                f_g = sig[:, 1 * H:2 * H]
                g_g = th[:, 2 * H:3 * H]
                o_g = sig[:, 3 * H:4 * H]

                c_new = f_g * c + i_g * g_g
                h_new = o_g * jnp.tanh(c_new)

                # packed-sequence mask: freeze state / zero output for t >= len
                m = (len_col > t).astype(jnp.float32)        # (B, 1)
                h_sc[...] = m * h_new + (1.0 - m) * h
                c_sc[...] = m * c_new + (1.0 - m) * c
                hseq_sc[t] = m * h_new                       # pad_packed zeros
                return carry

            lax.fori_loop(0, T, step, 0, unroll=True)
            layer_in = hseq_sc[...].reshape(T * B, H)

        # Fused FC head (padded positions -> fc bias, same as torch).
        out_ref[...] = jnp.dot(layer_in, fcw_ref[...],
                               preferred_element_type=jnp.float32) + fcb_ref[...]

    return kernel


# ----------------------------------------------------------------------------
# Wrapper
# ----------------------------------------------------------------------------
def lstm_forward(x, lengths, params):
    """Equivalent of LSTM.forward(x, lengths).

    x: (B, T, input_size) float32, batch_first (same as PyTorch).
    lengths: 1-D int array/list, length B (host-concrete, like torch's
             pack_padded_sequence requires).
    Returns: squeezed fc output, shape (B, max(lengths)) for output_size == 1.
    """
    B, T, D = x.shape
    lengths_i = jnp.asarray(lengths, dtype=jnp.int32)
    t_out = int(np.max(np.asarray(lengths)))       # pad_packed_sequence length

    H = params["layers"][0][1].shape[0]
    O = params["fc_w_t"].shape[1]
    num_layers = len(params["layers"])

    # Time-major (T*B, D) view so each timestep is a contiguous row block.
    # (2 KiB copy at these shapes; avoids strided per-step gathers in-kernel.)
    x_tm = jnp.transpose(x.astype(jnp.float32), (1, 0, 2)).reshape(T * B, D)
    len2d = lengths_i.reshape(B, 1)

    operands = [x_tm, len2d]
    in_specs = [pl.BlockSpec((T * B, D), lambda: (0, 0)),
                pl.BlockSpec((B, 1), lambda: (0, 0))]
    for (wih_t, whh_t, b_row) in params["layers"]:
        operands += [wih_t, whh_t, b_row]
        in_specs += [pl.BlockSpec(wih_t.shape, lambda: (0, 0)),
                     pl.BlockSpec(whh_t.shape, lambda: (0, 0)),
                     pl.BlockSpec(b_row.shape, lambda: (0, 0))]
    operands += [params["fc_w_t"], params["fc_b"]]
    in_specs += [pl.BlockSpec(params["fc_w_t"].shape, lambda: (0, 0)),
                 pl.BlockSpec(params["fc_b"].shape, lambda: (0, 0))]

    kernel = _make_fused_lstm_kernel(num_layers, T, B, H)
    y = pl.pallas_call(
        kernel,
        out_shape=jax.ShapeDtypeStruct((T * B, O), jnp.float32),
        in_specs=in_specs,
        out_specs=pl.BlockSpec((T * B, O), lambda: (0, 0)),
        scratch_shapes=[
            pltpu.VMEM((T, B, 4 * H), jnp.float32),   # pre-gates, all t
            pltpu.VMEM((T, B, H), jnp.float32),       # layer output sequence
            pltpu.VMEM((B, H), jnp.float32),          # h state
            pltpu.VMEM((B, H), jnp.float32),          # c state
        ],
    )(*operands)

    out = jnp.transpose(y.reshape(T, B, O), (1, 0, 2))[:, :t_out, :]
    return jnp.squeeze(out)                            # same as torch .squeeze()


# ----------------------------------------------------------------------------
# Pure-JAX reference (for a correctness assert)
# ----------------------------------------------------------------------------
def lstm_reference(x, lengths, params):
    B, T, _ = x.shape
    lengths = jnp.asarray(lengths, dtype=jnp.int32)
    t_out = int(np.max(np.asarray(lengths)))
    mask = (jnp.arange(T)[None, :] < lengths[:, None]).astype(jnp.float32)  # (B,T)

    inp = x.astype(jnp.float32)
    for (wih_t, whh_t, b_row) in params["layers"]:
        H = whh_t.shape[0]
        h = jnp.zeros((B, H), jnp.float32)
        c = jnp.zeros((B, H), jnp.float32)
        outs = []
        for t in range(T):
            gates = inp[:, t, :] @ wih_t + h @ whh_t + b_row
            i = jax.nn.sigmoid(gates[:, :H])
            f = jax.nn.sigmoid(gates[:, H:2 * H])
            g = jnp.tanh(gates[:, 2 * H:3 * H])
            o = jax.nn.sigmoid(gates[:, 3 * H:])
            cn = f * c + i * g
            hn = o * jnp.tanh(cn)
            m = mask[:, t][:, None]
            h = m * hn + (1 - m) * h
            c = m * cn + (1 - m) * c
            outs.append(m * hn)
        inp = jnp.stack(outs, axis=1)
    out = inp[:, :t_out, :]
    fc = out @ params["fc_w_t"] + params["fc_b"]
    return jnp.squeeze(fc)


# ----------------------------------------------------------------------------
# Deterministic parameter init (PyTorch-style uniform(-1/sqrt(H), 1/sqrt(H)))
# ----------------------------------------------------------------------------
def init_params(key, input_size, hidden_size, num_layers, output_size):
    std = 1.0 / np.sqrt(hidden_size)
    layers = []
    for layer in range(num_layers):
        d_in = input_size if layer == 0 else hidden_size
        key, k1, k2, k3, k4 = jax.random.split(key, 5)
        w_ih = jax.random.uniform(k1, (4 * hidden_size, d_in),
                                  minval=-std, maxval=std, dtype=jnp.float32)
        w_hh = jax.random.uniform(k2, (4 * hidden_size, hidden_size),
                                  minval=-std, maxval=std, dtype=jnp.float32)
        b_ih = jax.random.uniform(k3, (4 * hidden_size,),
                                  minval=-std, maxval=std, dtype=jnp.float32)
        b_hh = jax.random.uniform(k4, (4 * hidden_size,),
                                  minval=-std, maxval=std, dtype=jnp.float32)
        layers.append((w_ih.T, w_hh.T, (b_ih + b_hh)[None, :]))
    key, k5, k6 = jax.random.split(key, 3)
    fc_std = 1.0 / np.sqrt(hidden_size)
    fc_w = jax.random.uniform(k5, (output_size, hidden_size),
                              minval=-fc_std, maxval=fc_std, dtype=jnp.float32)
    fc_b = jax.random.uniform(k6, (output_size,),
                              minval=-fc_std, maxval=fc_std, dtype=jnp.float32)
    return {"layers": layers, "fc_w_t": fc_w.T, "fc_b": fc_b[None, :]}


# ----------------------------------------------------------------------------
if __name__ == "__main__":
    input_size, hidden_size, num_layers, output_size = 16, 32, 2, 1
    B, T = 4, 8

    key = jax.random.PRNGKey(0)
    key, kx = jax.random.split(key)
    x = jax.random.normal(kx, (B, T, input_size), dtype=jnp.float32)
    lengths = np.array([8, 5, 6, 3], dtype=np.int32)

    params = init_params(key, input_size, hidden_size, num_layers, output_size)

    out = lstm_forward(x, lengths, params)
    out = jax.block_until_ready(out)

    ref = lstm_reference(x, lengths, params)
    np.testing.assert_allclose(np.asarray(out), np.asarray(ref),
                               rtol=1e-3, atol=1e-4)

    assert out.shape == (B, int(lengths.max())), out.shape
    print("KERNEL_OK")
</pallas_src>

<mosaic_0001>
module attributes {stable_mosaic.version = 11 : i64} {
  func.func @kernel(%arg0: memref<32x16xf32, #tpu.memory_space<vmem>>, %arg1: memref<4x1xi32, #tpu.memory_space<vmem>>, %arg2: memref<16x128xf32, #tpu.memory_space<vmem>>, %arg3: memref<32x128xf32, #tpu.memory_space<vmem>>, %arg4: memref<1x128xf32, #tpu.memory_space<vmem>>, %arg5: memref<32x128xf32, #tpu.memory_space<vmem>>, %arg6: memref<32x128xf32, #tpu.memory_space<vmem>>, %arg7: memref<1x128xf32, #tpu.memory_space<vmem>>, %arg8: memref<32x1xf32, #tpu.memory_space<vmem>>, %arg9: memref<1x1xf32, #tpu.memory_space<vmem>>, %arg10: memref<32x1xf32, #tpu.memory_space<vmem>>, %arg11: memref<8x4x128xf32, #tpu.memory_space<vmem>>, %arg12: memref<8x4x32xf32, #tpu.memory_space<vmem>>, %arg13: memref<4x32xf32, #tpu.memory_space<vmem>>, %arg14: memref<4x32xf32, #tpu.memory_space<vmem>>) attributes {dimension_semantics = [], scalar_prefetch = 0 : i64, scratch_operands = 4 : i64, tpu.core_type = #tpu.core_type<tc>} {
    %c0 = arith.constant 0 : index
    %c0_0 = arith.constant 0 : index
    %0 = vector.load %arg1[%c0, %c0_0] : memref<4x1xi32, #tpu.memory_space<vmem>>, vector<4x1xi32>
    %c0_1 = arith.constant 0 : index
    %c0_2 = arith.constant 0 : index
    %1 = vector.load %arg0[%c0_1, %c0_2] : memref<32x16xf32, #tpu.memory_space<vmem>>, vector<32x16xf32>
    %c0_3 = arith.constant 0 : index
    %c0_4 = arith.constant 0 : index
    %2 = vector.load %arg2[%c0_3, %c0_4] : memref<16x128xf32, #tpu.memory_space<vmem>>, vector<16x128xf32>
    %c0_5 = arith.constant 0 : index
    %c0_6 = arith.constant 0 : index
    %3 = vector.load %arg3[%c0_5, %c0_6] : memref<32x128xf32, #tpu.memory_space<vmem>>, vector<32x128xf32>
    %c0_7 = arith.constant 0 : index
    %c0_8 = arith.constant 0 : index
    %4 = vector.load %arg4[%c0_7, %c0_8] : memref<1x128xf32, #tpu.memory_space<vmem>>, vector<1x128xf32>
    %cst = arith.constant dense<0.000000e+00> : vector<32x128xf32>
    %5 = tpu.matmul %1, %2, %cst {dimension_numbers = #tpu.dot_dimension_numbers<[1], [0], [0], [1], [0, 0, 1, 1], [], []>} : vector<32x16xf32>, vector<16x128xf32>, vector<32x128xf32> -> vector<32x128xf32>
    %6 = vector.broadcast %4 : vector<1x128xf32> to vector<32x128xf32>
    %7 = arith.addf %5, %6 : vector<32x128xf32>
    %8 = vector.shape_cast %7 : vector<32x128xf32> to vector<8x4x128xf32>
    %c0_9 = arith.constant 0 : index
    %c0_10 = arith.constant 0 : index
    %c0_11 = arith.constant 0 : index
    %9 = vector.load %arg11[%c0_9, %c0_10, %c0_11] : memref<8x4x128xf32, #tpu.memory_space<vmem>>, vector<8x4x128xf32>
    tpu.vector_store %arg11[%c0_9, %c0_10, %c0_11], %8 {strides = array<i32>} : memref<8x4x128xf32, #tpu.memory_space<vmem>>, vector<8x4x128xf32>,
    %cst_12 = arith.constant 0.000000e+00 : f32
    %10 = vector.broadcast %cst_12 : f32 to vector<4x32xf32>
    %c0_13 = arith.constant 0 : index
    %c0_14 = arith.constant 0 : index
    %11 = vector.load %arg13[%c0_13, %c0_14] : memref<4x32xf32, #tpu.memory_space<vmem>>, vector<4x32xf32>
    tpu.vector_store %arg13[%c0_13, %c0_14], %10 {strides = array<i32>} : memref<4x32xf32, #tpu.memory_space<vmem>>, vector<4x32xf32>,
    %cst_15 = arith.constant 0.000000e+00 : f32
    %12 = vector.broadcast %cst_15 : f32 to vector<4x32xf32>
    %c0_16 = arith.constant 0 : index
    %c0_17 = arith.constant 0 : index
    %13 = vector.load %arg14[%c0_16, %c0_17] : memref<4x32xf32, #tpu.memory_space<vmem>>, vector<4x32xf32>
    tpu.vector_store %arg14[%c0_16, %c0_17], %12 {strides = array<i32>} : memref<4x32xf32, #tpu.memory_space<vmem>>, vector<4x32xf32>,
    %c0_i32 = arith.constant 0 : i32
    %c0_18 = arith.constant 0 : index
    %c0_19 = arith.constant 0 : index
    %14 = vector.load %arg13[%c0_18, %c0_19] : memref<4x32xf32, #tpu.memory_space<vmem>>, vector<4x32xf32>
    %c0_20 = arith.constant 0 : index
    %c0_21 = arith.constant 0 : index
    %15 = vector.load %arg14[%c0_20, %c0_21] : memref<4x32xf32, #tpu.memory_space<vmem>>, vector<4x32xf32>
    %16 = arith.index_cast %c0_i32 : i32 to index
    %c0_22 = arith.constant 0 : index
    %c0_23 = arith.constant 0 : index
    %17 = vector.load %arg11[%16, %c0_22, %c0_23] : memref<8x4x128xf32, #tpu.memory_space<vmem>>, vector<1x4x128xf32>
    %18 = vector.shape_cast %17 : vector<1x4x128xf32> to vector<4x128xf32>
    %cst_24 = arith.constant dense<0.000000e+00> : vector<4x128xf32>
    %19 = tpu.matmul %14, %3, %cst_24 {dimension_numbers = #tpu.dot_dimension_numbers<[1], [0], [0], [1], [0, 0, 1, 1], [], []>} : vector<4x32xf32>, vector<32x128xf32>, vector<4x128xf32> -> vector<4x128xf32>
    %20 = arith.addf %18, %19 : vector<4x128xf32>
    %cst_25 = arith.constant 5.000000e-01 : f32
    %21 = vector.broadcast %cst_25 : f32 to vector<4x128xf32>
    %22 = arith.mulf %21, %20 : vector<4x128xf32>
    %23 = math.tanh %22 : vector<4x128xf32>
    %cst_26 = arith.constant 1.000000e+00 : f32
    %24 = vector.broadcast %cst_26 : f32 to vector<4x128xf32>
    %25 = arith.addf %23, %24 : vector<4x128xf32>
    %cst_27 = arith.constant 5.000000e-01 : f32
    %26 = vector.broadcast %cst_27 : f32 to vector<4x128xf32>
    %27 = arith.mulf %26, %25 : vector<4x128xf32>
    %28 = math.tanh %20 : vector<4x128xf32>
    %29 = vector.extract_strided_slice %27 {offsets = [0, 0], sizes = [4, 32], strides = [1, 1]} : vector<4x128xf32> to vector<4x32xf32>
    %30 = vector.extract_strided_slice %27 {offsets = [0, 32], sizes = [4, 32], strides = [1, 1]} : vector<4x128xf32> to vector<4x32xf32>
    %31 = vector.extract_strided_slice %28 {offsets = [0, 64], sizes = [4, 32], strides = [1, 1]} : vector<4x128xf32> to vector<4x32xf32>
    %32 = vector.extract_strided_slice %27 {offsets = [0, 96], sizes = [4, 32], strides = [1, 1]} : vector<4x128xf32> to vector<4x32xf32>
    %33 = arith.mulf %30, %15 : vector<4x32xf32>
    %34 = arith.mulf %29, %31 : vector<4x32xf32>
    %35 = arith.addf %33, %34 : vector<4x32xf32>
    %36 = math.tanh %35 : vector<4x32xf32>
    %37 = arith.mulf %32, %36 : vector<4x32xf32>
    %38 = vector.broadcast %c0_i32 : i32 to vector<4x1xi32>
    %39 = arith.cmpi sgt, %0, %38 : vector<4x1xi32>
    %40 = arith.extui %39 : vector<4x1xi1> to vector<4x1xi32>
    %41 = arith.sitofp %40 : vector<4x1xi32> to vector<4x1xf32>
    %42 = vector.broadcast %41 : vector<4x1xf32> to vector<4x32xf32>
    %43 = arith.mulf %42, %37 : vector<4x32xf32>
    %cst_28 = arith.constant 1.000000e+00 : f32
    %44 = vector.broadcast %cst_28 : f32 to vector<4x1xf32>
    %45 = arith.subf %44, %41 : vector<4x1xf32>
    %46 = vector.broadcast %45 : vector<4x1xf32> to vector<4x32xf32>
    %47 = arith.mulf %46, %14 : vector<4x32xf32>
    %48 = arith.addf %43, %47 : vector<4x32xf32>
    %c0_29 = arith.constant 0 : index
    %c0_30 = arith.constant 0 : index
    %49 = vector.load %arg13[%c0_29, %c0_30] : memref<4x32xf32, #tpu.memory_space<vmem>>, vector<4x32xf32>
    tpu.vector_store %arg13[%c0_29, %c0_30], %48 {strides = array<i32>} : memref<4x32xf32, #tpu.memory_space<vmem>>, vector<4x32xf32>,
    %50 = vector.broadcast %41 : vector<4x1xf32> to vector<4x32xf32>
    %51 = arith.mulf %50, %35 : vector<4x32xf32>
    %cst_31 = arith.constant 1.000000e+00 : f32
    %52 = vector.broadcast %cst_31 : f32 to vector<4x1xf32>
    %53 = arith.subf %52, %41 : vector<4x1xf32>
    %54 = vector.broadcast %53 : vector<4x1xf32> to vector<4x32xf32>
    %55 = arith.mulf %54, %15 : vector<4x32xf32>
    %56 = arith.addf %51, %55 : vector<4x32xf32>
    %c0_32 = arith.constant 0 : index
    %c0_33 = arith.constant 0 : index
    %57 = vector.load %arg14[%c0_32, %c0_33] : memref<4x32xf32, #tpu.memory_space<vmem>>, vector<4x32xf32>
    tpu.vector_store %arg14[%c0_32, %c0_33], %56 {strides = array<i32>} : memref<4x32xf32, #tpu.memory_space<vmem>>, vector<4x32xf32>,
    %58 = vector.broadcast %41 : vector<4x1xf32> to vector<4x32xf32>
    %59 = arith.mulf %58, %37 : vector<4x32xf32>
    %60 = arith.index_cast %c0_i32 : i32 to index
    %c0_34 = arith.constant 0 : index
    %c0_35 = arith.constant 0 : index
    %61 = vector.load %arg12[%60, %c0_34, %c0_35] : memref<8x4x32xf32, #tpu.memory_space<vmem>>, vector<1x4x32xf32>
    %62 = vector.shape_cast %61 : vector<1x4x32xf32> to vector<4x32xf32>
    %63 = vector.shape_cast %59 : vector<4x32xf32> to vector<1x4x32xf32>
    tpu.vector_store %arg12[%60, %c0_34, %c0_35], %63 {strides = array<i32>} : memref<8x4x32xf32, #tpu.memory_space<vmem>>, vector<1x4x32xf32>,
    %c1_i32 = arith.constant 1 : i32
    %c0_36 = arith.constant 0 : index
    %c0_37 = arith.constant 0 : index
    %64 = vector.load %arg13[%c0_36, %c0_37] : memref<4x32xf32, #tpu.memory_space<vmem>>, vector<4x32xf32>
    %c0_38 = arith.constant 0 : index
    %c0_39 = arith.constant 0 : index
    %65 = vector.load %arg14[%c0_38, %c0_39] : memref<4x32xf32, #tpu.memory_space<vmem>>, vector<4x32xf32>
    %66 = arith.index_cast %c1_i32 : i32 to index
    %c0_40 = arith.constant 0 : index
    %c0_41 = arith.constant 0 : index
    %67 = vector.load %arg11[%66, %c0_40, %c0_41] : memref<8x4x128xf32, #tpu.memory_space<vmem>>, vector<1x4x128xf32>
    %68 = vector.shape_cast %67 : vector<1x4x128xf32> to vector<4x128xf32>
    %cst_42 = arith.constant dense<0.000000e+00> : vector<4x128xf32>
    %69 = tpu.matmul %64, %3, %cst_42 {dimension_numbers = #tpu.dot_dimension_numbers<[1], [0], [0], [1], [0, 0, 1, 1], [], []>} : vector<4x32xf32>, vector<32x128xf32>, vector<4x128xf32> -> vector<4x128xf32>
    %70 = arith.addf %68, %69 : vector<4x128xf32>
    %cst_43 = arith.constant 5.000000e-01 : f32
    %71 = vector.broadcast %cst_43 : f32 to vector<4x128xf32>
    %72 = arith.mulf %71, %70 : vector<4x128xf32>
    %73 = math.tanh %72 : vector<4x128xf32>
    %cst_44 = arith.constant 1.000000e+00 : f32
    %74 = vector.broadcast %cst_44 : f32 to vector<4x128xf32>
    %75 = arith.addf %73, %74 : vector<4x128xf32>
    %cst_45 = arith.constant 5.000000e-01 : f32
    %76 = vector.broadcast %cst_45 : f32 to vector<4x128xf32>
    %77 = arith.mulf %76, %75 : vector<4x128xf32>
    %78 = math.tanh %70 : vector<4x128xf32>
    %79 = vector.extract_strided_slice %77 {offsets = [0, 0], sizes = [4, 32], strides = [1, 1]} : vector<4x128xf32> to vector<4x32xf32>
    %80 = vector.extract_strided_slice %77 {offsets = [0, 32], sizes = [4, 32], strides = [1, 1]} : vector<4x128xf32> to vector<4x32xf32>
    %81 = vector.extract_strided_slice %78 {offsets = [0, 64], sizes = [4, 32], strides = [1, 1]} : vector<4x128xf32> to vector<4x32xf32>
    %82 = vector.extract_strided_slice %77 {offsets = [0, 96], sizes = [4, 32], strides = [1, 1]} : vector<4x128xf32> to vector<4x32xf32>
    %83 = arith.mulf %80, %65 : vector<4x32xf32>
    %84 = arith.mulf %79, %81 : vector<4x32xf32>
    %85 = arith.addf %83, %84 : vector<4x32xf32>
    %86 = math.tanh %85 : vector<4x32xf32>
    %87 = arith.mulf %82, %86 : vector<4x32xf32>
    %88 = vector.broadcast %c1_i32 : i32 to vector<4x1xi32>
    %89 = arith.cmpi sgt, %0, %88 : vector<4x1xi32>
    %90 = arith.extui %89 : vector<4x1xi1> to vector<4x1xi32>
    %91 = arith.sitofp %90 : vector<4x1xi32> to vector<4x1xf32>
    %92 = vector.broadcast %91 : vector<4x1xf32> to vector<4x32xf32>
    %93 = arith.mulf %92, %87 : vector<4x32xf32>
    %cst_46 = arith.constant 1.000000e+00 : f32
    %94 = vector.broadcast %cst_46 : f32 to vector<4x1xf32>
    %95 = arith.subf %94, %91 : vector<4x1xf32>
    %96 = vector.broadcast %95 : vector<4x1xf32> to vector<4x32xf32>
    %97 = arith.mulf %96, %64 : vector<4x32xf32>
    %98 = arith.addf %93, %97 : vector<4x32xf32>
    %c0_47 = arith.constant 0 : index
    %c0_48 = arith.constant 0 : index
    %99 = vector.load %arg13[%c0_47, %c0_48] : memref<4x32xf32, #tpu.memory_space<vmem>>, vector<4x32xf32>
    tpu.vector_store %arg13[%c0_47, %c0_48], %98 {strides = array<i32>} : memref<4x32xf32, #tpu.memory_space<vmem>>, vector<4x32xf32>,
    %100 = vector.broadcast %91 : vector<4x1xf32> to vector<4x32xf32>
    %101 = arith.mulf %100, %85 : vector<4x32xf32>
    %cst_49 = arith.constant 1.000000e+00 : f32
    %102 = vector.broadcast %cst_49 : f32 to vector<4x1xf32>
    %103 = arith.subf %102, %91 : vector<4x1xf32>
    %104 = vector.broadcast %103 : vector<4x1xf32> to vector<4x32xf32>
    %105 = arith.mulf %104, %65 : vector<4x32xf32>
    %106 = arith.addf %101, %105 : vector<4x32xf32>
    %c0_50 = arith.constant 0 : index
    %c0_51 = arith.constant 0 : index
    %107 = vector.load %arg14[%c0_50, %c0_51] : memref<4x32xf32, #tpu.memory_space<vmem>>, vector<4x32xf32>
    tpu.vector_store %arg14[%c0_50, %c0_51], %106 {strides = array<i32>} : memref<4x32xf32, #tpu.memory_space<vmem>>, vector<4x32xf32>,
    %108 = vector.broadcast %91 : vector<4x1xf32> to vector<4x32xf32>
    %109 = arith.mulf %108, %87 : vector<4x32xf32>
    %110 = arith.index_cast %c1_i32 : i32 to index
    %c0_52 = arith.constant 0 : index
    %c0_53 = arith.constant 0 : index
    %111 = vector.load %arg12[%110, %c0_52, %c0_53] : memref<8x4x32xf32, #tpu.memory_space<vmem>>, vector<1x4x32xf32>
    %112 = vector.shape_cast %111 : vector<1x4x32xf32> to vector<4x32xf32>
    %113 = vector.shape_cast %109 : vector<4x32xf32> to vector<1x4x32xf32>
    tpu.vector_store %arg12[%110, %c0_52, %c0_53], %113 {strides = array<i32>} : memref<8x4x32xf32, #tpu.memory_space<vmem>>, vector<1x4x32xf32>,
    %c2_i32 = arith.constant 2 : i32
    %c0_54 = arith.constant 0 : index
    %c0_55 = arith.constant 0 : index
    %114 = vector.load %arg13[%c0_54, %c0_55] : memref<4x32xf32, #tpu.memory_space<vmem>>, vector<4x32xf32>
    %c0_56 = arith.constant 0 : index
    %c0_57 = arith.constant 0 : index
    %115 = vector.load %arg14[%c0_56, %c0_57] : memref<4x32xf32, #tpu.memory_space<vmem>>, vector<4x32xf32>
    %116 = arith.index_cast %c2_i32 : i32 to index
    %c0_58 = arith.constant 0 : index
    %c0_59 = arith.constant 0 : index
    %117 = vector.load %arg11[%116, %c0_58, %c0_59] : memref<8x4x128xf32, #tpu.memory_space<vmem>>, vector<1x4x128xf32>
    %118 = vector.shape_cast %117 : vector<1x4x128xf32> to vector<4x128xf32>
    %cst_60 = arith.constant dense<0.000000e+00> : vector<4x128xf32>
    %119 = tpu.matmul %114, %3, %cst_60 {dimension_numbers = #tpu.dot_dimension_numbers<[1], [0], [0], [1], [0, 0, 1, 1], [], []>} : vector<4x32xf32>, vector<32x128xf32>, vector<4x128xf32> -> vector<4x128xf32>
    %120 = arith.addf %118, %119 : vector<4x128xf32>
    %cst_61 = arith.constant 5.000000e-01 : f32
    %121 = vector.broadcast %cst_61 : f32 to vector<4x128xf32>
    %122 = arith.mulf %121, %120 : vector<4x128xf32>
    %123 = math.tanh %122 : vector<4x128xf32>
    %cst_62 = arith.constant 1.000000e+00 : f32
    %124 = vector.broadcast %cst_62 : f32 to vector<4x128xf32>
    %125 = arith.addf %123, %124 : vector<4x128xf32>
    %cst_63 = arith.constant 5.000000e-01 : f32
    %126 = vector.broadcast %cst_63 : f32 to vector<4x128xf32>
    %127 = arith.mulf %126, %125 : vector<4x128xf32>
    %128 = math.tanh %120 : vector<4x128xf32>
    %129 = vector.extract_strided_slice %127 {offsets = [0, 0], sizes = [4, 32], strides = [1, 1]} : vector<4x128xf32> to vector<4x32xf32>
    %130 = vector.extract_strided_slice %127 {offsets = [0, 32], sizes = [4, 32], strides = [1, 1]} : vector<4x128xf32> to vector<4x32xf32>
    %131 = vector.extract_strided_slice %128 {offsets = [0, 64], sizes = [4, 32], strides = [1, 1]} : vector<4x128xf32> to vector<4x32xf32>
    %132 = vector.extract_strided_slice %127 {offsets = [0, 96], sizes = [4, 32], strides = [1, 1]} : vector<4x128xf32> to vector<4x32xf32>
    %133 = arith.mulf %130, %115 : vector<4x32xf32>
    %134 = arith.mulf %129, %131 : vector<4x32xf32>
    %135 = arith.addf %133, %134 : vector<4x32xf32>
    %136 = math.tanh %135 : vector<4x32xf32>
    %137 = arith.mulf %132, %136 : vector<4x32xf32>
    %138 = vector.broadcast %c2_i32 : i32 to vector<4x1xi32>
    %139 = arith.cmpi sgt, %0, %138 : vector<4x1xi32>
    %140 = arith.extui %139 : vector<4x1xi1> to vector<4x1xi32>
    %141 = arith.sitofp %140 : vector<4x1xi32> to vector<4x1xf32>
    %142 = vector.broadcast %141 : vector<4x1xf32> to vector<4x32xf32>
    %143 = arith.mulf %142, %137 : vector<4x32xf32>
    %cst_64 = arith.constant 1.000000e+00 : f32
    %144 = vector.broadcast %cst_64 : f32 to vector<4x1xf32>
    %145 = arith.subf %144, %141 : vector<4x1xf32>
    %146 = vector.broadcast %145 : vector<4x1xf32> to vector<4x32xf32>
    %147 = arith.mulf %146, %114 : vector<4x32xf32>
    %148 = arith.addf %143, %147 : vector<4x32xf32>
    %c0_65 = arith.constant 0 : index
    %c0_66 = arith.constant 0 : index
    %149 = vector.load %arg13[%c0_65, %c0_66] : memref<4x32xf32, #tpu.memory_space<vmem>>, vector<4x32xf32>
    tpu.vector_store %arg13[%c0_65, %c0_66], %148 {strides = array<i32>} : memref<4x32xf32, #tpu.memory_space<vmem>>, vector<4x32xf32>,
    %150 = vector.broadcast %141 : vector<4x1xf32> to vector<4x32xf32>
    %151 = arith.mulf %150, %135 : vector<4x32xf32>
    %cst_67 = arith.constant 1.000000e+00 : f32
    %152 = vector.broadcast %cst_67 : f32 to vector<4x1xf32>
    %153 = arith.subf %152, %141 : vector<4x1xf32>
    %154 = vector.broadcast %153 : vector<4x1xf32> to vector<4x32xf32>
    %155 = arith.mulf %154, %115 : vector<4x32xf32>
    %156 = arith.addf %151, %155 : vector<4x32xf32>
    %c0_68 = arith.constant 0 : index
    %c0_69 = arith.constant 0 : index
    %157 = vector.load %arg14[%c0_68, %c0_69] : memref<4x32xf32, #tpu.memory_space<vmem>>, vector<4x32xf32>
    tpu.vector_store %arg14[%c0_68, %c0_69], %156 {strides = array<i32>} : memref<4x32xf32, #tpu.memory_space<vmem>>, vector<4x32xf32>,
    %158 = vector.broadcast %141 : vector<4x1xf32> to vector<4x32xf32>
    %159 = arith.mulf %158, %137 : vector<4x32xf32>
    %160 = arith.index_cast %c2_i32 : i32 to index
    %c0_70 = arith.constant 0 : index
    %c0_71 = arith.constant 0 : index
    %161 = vector.load %arg12[%160, %c0_70, %c0_71] : memref<8x4x32xf32, #tpu.memory_space<vmem>>, vector<1x4x32xf32>
    %162 = vector.shape_cast %161 : vector<1x4x32xf32> to vector<4x32xf32>
    %163 = vector.shape_cast %159 : vector<4x32xf32> to vector<1x4x32xf32>
    tpu.vector_store %arg12[%160, %c0_70, %c0_71], %163 {strides = array<i32>} : memref<8x4x32xf32, #tpu.memory_space<vmem>>, vector<1x4x32xf32>,
    %c3_i32 = arith.constant 3 : i32
    %c0_72 = arith.constant 0 : index
    %c0_73 = arith.constant 0 : index
    %164 = vector.load %arg13[%c0_72, %c0_73] : memref<4x32xf32, #tpu.memory_space<vmem>>, vector<4x32xf32>
    %c0_74 = arith.constant 0 : index
    %c0_75 = arith.constant 0 : index
    %165 = vector.load %arg14[%c0_74, %c0_75] : memref<4x32xf32, #tpu.memory_space<vmem>>, vector<4x32xf32>
    %166 = arith.index_cast %c3_i32 : i32 to index
    %c0_76 = arith.constant 0 : index
    %c0_77 = arith.constant 0 : index
    %167 = vector.load %arg11[%166, %c0_76, %c0_77] : memref<8x4x128xf32, #tpu.memory_space<vmem>>, vector<1x4x128xf32>
    %168 = vector.shape_cast %167 : vector<1x4x128xf32> to vector<4x128xf32>
    %cst_78 = arith.constant dense<0.000000e+00> : vector<4x128xf32>
    %169 = tpu.matmul %164, %3, %cst_78 {dimension_numbers = #tpu.dot_dimension_numbers<[1], [0], [0], [1], [0, 0, 1, 1], [], []>} : vector<4x32xf32>, vector<32x128xf32>, vector<4x128xf32> -> vector<4x128xf32>
    %170 = arith.addf %168, %169 : vector<4x128xf32>
    %cst_79 = arith.constant 5.000000e-01 : f32
    %171 = vector.broadcast %cst_79 : f32 to vector<4x128xf32>
    %172 = arith.mulf %171, %170 : vector<4x128xf32>
    %173 = math.tanh %172 : vector<4x128xf32>
    %cst_80 = arith.constant 1.000000e+00 : f32
    %174 = vector.broadcast %cst_80 : f32 to vector<4x128xf32>
    %175 = arith.addf %173, %174 : vector<4x128xf32>
    %cst_81 = arith.constant 5.000000e-01 : f32
    %176 = vector.broadcast %cst_81 : f32 to vector<4x128xf32>
    %177 = arith.mulf %176, %175 : vector<4x128xf32>
    %178 = math.tanh %170 : vector<4x128xf32>
    %179 = vector.extract_strided_slice %177 {offsets = [0, 0], sizes = [4, 32], strides = [1, 1]} : vector<4x128xf32> to vector<4x32xf32>
    %180 = vector.extract_strided_slice %177 {offsets = [0, 32], sizes = [4, 32], strides = [1, 1]} : vector<4x128xf32> to vector<4x32xf32>
    %181 = vector.extract_strided_slice %178 {offsets = [0, 64], sizes = [4, 32], strides = [1, 1]} : vector<4x128xf32> to vector<4x32xf32>
    %182 = vector.extract_strided_slice %177 {offsets = [0, 96], sizes = [4, 32], strides = [1, 1]} : vector<4x128xf32> to vector<4x32xf32>
    %183 = arith.mulf %180, %165 : vector<4x32xf32>
    %184 = arith.mulf %179, %181 : vector<4x32xf32>
    %185 = arith.addf %183, %184 : vector<4x32xf32>
    %186 = math.tanh %185 : vector<4x32xf32>
    %187 = arith.mulf %182, %186 : vector<4x32xf32>
    %188 = vector.broadcast %c3_i32 : i32 to vector<4x1xi32>
    %189 = arith.cmpi sgt, %0, %188 : vector<4x1xi32>
    %190 = arith.extui %189 : vector<4x1xi1> to vector<4x1xi32>
    %191 = arith.sitofp %190 : vector<4x1xi32> to vector<4x1xf32>
    %192 = vector.broadcast %191 : vector<4x1xf32> to vector<4x32xf32>
    %193 = arith.mulf %192, %187 : vector<4x32xf32>
    %cst_82 = arith.constant 1.000000e+00 : f32
    %194 = vector.broadcast %cst_82 : f32 to vector<4x1xf32>
    %195 = arith.subf %194, %191 : vector<4x1xf32>
    %196 = vector.broadcast %195 : vector<4x1xf32> to vector<4x32xf32>
    %197 = arith.mulf %196, %164 : vector<4x32xf32>
    %198 = arith.addf %193, %197 : vector<4x32xf32>
    %c0_83 = arith.constant 0 : index
    %c0_84 = arith.constant 0 : index
    %199 = vector.load %arg13[%c0_83, %c0_84] : memref<4x32xf32, #tpu.memory_space<vmem>>, vector<4x32xf32>
    tpu.vector_store %arg13[%c0_83, %c0_84], %198 {strides = array<i32>} : memref<4x32xf32, #tpu.memory_space<vmem>>, vector<4x32xf32>,
    %200 = vector.broadcast %191 : vector<4x1xf32> to vector<4x32xf32>
    %201 = arith.mulf %200, %185 : vector<4x32xf32>
    %cst_85 = arith.constant 1.000000e+00 : f32
    %202 = vector.broadcast %cst_85 : f32 to vector<4x1xf32>
    %203 = arith.subf %202, %191 : vector<4x1xf32>
    %204 = vector.broadcast %203 : vector<4x1xf32> to vector<4x32xf32>
    %205 = arith.mulf %204, %165 : vector<4x32xf32>
    %206 = arith.addf %201, %205 : vector<4x32xf32>
    %c0_86 = arith.constant 0 : index
    %c0_87 = arith.constant 0 : index
    %207 = vector.load %arg14[%c0_86, %c0_87] : memref<4x32xf32, #tpu.memory_space<vmem>>, vector<4x32xf32>
    tpu.vector_store %arg14[%c0_86, %c0_87], %206 {strides = array<i32>} : memref<4x32xf32, #tpu.memory_space<vmem>>, vector<4x32xf32>,
    %208 = vector.broadcast %191 : vector<4x1xf32> to vector<4x32xf32>
    %209 = arith.mulf %208, %187 : vector<4x32xf32>
    %210 = arith.index_cast %c3_i32 : i32 to index
    %c0_88 = arith.constant 0 : index
    %c0_89 = arith.constant 0 : index
    %211 = vector.load %arg12[%210, %c0_88, %c0_89] : memref<8x4x32xf32, #tpu.memory_space<vmem>>, vector<1x4x32xf32>
    %212 = vector.shape_cast %211 : vector<1x4x32xf32> to vector<4x32xf32>
    %213 = vector.shape_cast %209 : vector<4x32xf32> to vector<1x4x32xf32>
    tpu.vector_store %arg12[%210, %c0_88, %c0_89], %213 {strides = array<i32>} : memref<8x4x32xf32, #tpu.memory_space<vmem>>, vector<1x4x32xf32>,
    %c4_i32 = arith.constant 4 : i32
    %c0_90 = arith.constant 0 : index
    %c0_91 = arith.constant 0 : index
    %214 = vector.load %arg13[%c0_90, %c0_91] : memref<4x32xf32, #tpu.memory_space<vmem>>, vector<4x32xf32>
    %c0_92 = arith.constant 0 : index
    %c0_93 = arith.constant 0 : index
    %215 = vector.load %arg14[%c0_92, %c0_93] : memref<4x32xf32, #tpu.memory_space<vmem>>, vector<4x32xf32>
    %216 = arith.index_cast %c4_i32 : i32 to index
    %c0_94 = arith.constant 0 : index
    %c0_95 = arith.constant 0 : index
    %217 = vector.load %arg11[%216, %c0_94, %c0_95] : memref<8x4x128xf32, #tpu.memory_space<vmem>>, vector<1x4x128xf32>
    %218 = vector.shape_cast %217 : vector<1x4x128xf32> to vector<4x128xf32>
    %cst_96 = arith.constant dense<0.000000e+00> : vector<4x128xf32>
    %219 = tpu.matmul %214, %3, %cst_96 {dimension_numbers = #tpu.dot_dimension_numbers<[1], [0], [0], [1], [0, 0, 1, 1], [], []>} : vector<4x32xf32>, vector<32x128xf32>, vector<4x128xf32> -> vector<4x128xf32>
    %220 = arith.addf %218, %219 : vector<4x128xf32>
    %cst_97 = arith.constant 5.000000e-01 : f32
    %221 = vector.broadcast %cst_97 : f32 to vector<4x128xf32>
    %222 = arith.mulf %221, %220 : vector<4x128xf32>
    %223 = math.tanh %222 : vector<4x128xf32>
    %cst_98 = arith.constant 1.000000e+00 : f32
    %224 = vector.broadcast %cst_98 : f32 to vector<4x128xf32>
    %225 = arith.addf %223, %224 : vector<4x128xf32>
    %cst_99 = arith.constant 5.000000e-01 : f32
    %226 = vector.broadcast %cst_99 : f32 to vector<4x128xf32>
    %227 = arith.mulf %226, %225 : vector<4x128xf32>
    %228 = math.tanh %220 : vector<4x128xf32>
    %229 = vector.extract_strided_slice %227 {offsets = [0, 0], sizes = [4, 32], strides = [1, 1]} : vector<4x128xf32> to vector<4x32xf32>
    %230 = vector.extract_strided_slice %227 {offsets = [0, 32], sizes = [4, 32], strides = [1, 1]} : vector<4x128xf32> to vector<4x32xf32>
    %231 = vector.extract_strided_slice %228 {offsets = [0, 64], sizes = [4, 32], strides = [1, 1]} : vector<4x128xf32> to vector<4x32xf32>
    %232 = vector.extract_strided_slice %227 {offsets = [0, 96], sizes = [4, 32], strides = [1, 1]} : vector<4x128xf32> to vector<4x32xf32>
    %233 = arith.mulf %230, %215 : vector<4x32xf32>
    %234 = arith.mulf %229, %231 : vector<4x32xf32>
    %235 = arith.addf %233, %234 : vector<4x32xf32>
    %236 = math.tanh %235 : vector<4x32xf32>
    %237 = arith.mulf %232, %236 : vector<4x32xf32>
    %238 = vector.broadcast %c4_i32 : i32 to vector<4x1xi32>
    %239 = arith.cmpi sgt, %0, %238 : vector<4x1xi32>
    %240 = arith.extui %239 : vector<4x1xi1> to vector<4x1xi32>
    %241 = arith.sitofp %240 : vector<4x1xi32> to vector<4x1xf32>
    %242 = vector.broadcast %241 : vector<4x1xf32> to vector<4x32xf32>
    %243 = arith.mulf %242, %237 : vector<4x32xf32>
    %cst_100 = arith.constant 1.000000e+00 : f32
    %244 = vector.broadcast %cst_100 : f32 to vector<4x1xf32>
    %245 = arith.subf %244, %241 : vector<4x1xf32>
    %246 = vector.broadcast %245 : vector<4x1xf32> to vector<4x32xf32>
    %247 = arith.mulf %246, %214 : vector<4x32xf32>
    %248 = arith.addf %243, %247 : vector<4x32xf32>
    %c0_101 = arith.constant 0 : index
    %c0_102 = arith.constant 0 : index
    %249 = vector.load %arg13[%c0_101, %c0_102] : memref<4x32xf32, #tpu.memory_space<vmem>>, vector<4x32xf32>
    tpu.vector_store %arg13[%c0_101, %c0_102], %248 {strides = array<i32>} : memref<4x32xf32, #tpu.memory_space<vmem>>, vector<4x32xf32>,
    %250 = vector.broadcast %241 : vector<4x1xf32> to vector<4x32xf32>
    %251 = arith.mulf %250, %235 : vector<4x32xf32>
    %cst_103 = arith.constant 1.000000e+00 : f32
    %252 = vector.broadcast %cst_103 : f32 to vector<4x1xf32>
    %253 = arith.subf %252, %241 : vector<4x1xf32>
    %254 = vector.broadcast %253 : vector<4x1xf32> to vector<4x32xf32>
    %255 = arith.mulf %254, %215 : vector<4x32xf32>
    %256 = arith.addf %251, %255 : vector<4x32xf32>
    %c0_104 = arith.constant 0 : index
    %c0_105 = arith.constant 0 : index
    %257 = vector.load %arg14[%c0_104, %c0_105] : memref<4x32xf32, #tpu.memory_space<vmem>>, vector<4x32xf32>
    tpu.vector_store %arg14[%c0_104, %c0_105], %256 {strides = array<i32>} : memref<4x32xf32, #tpu.memory_space<vmem>>, vector<4x32xf32>,
    %258 = vector.broadcast %241 : vector<4x1xf32> to vector<4x32xf32>
    %259 = arith.mulf %258, %237 : vector<4x32xf32>
    %260 = arith.index_cast %c4_i32 : i32 to index
    %c0_106 = arith.constant 0 : index
    %c0_107 = arith.constant 0 : index
    %261 = vector.load %arg12[%260, %c0_106, %c0_107] : memref<8x4x32xf32, #tpu.memory_space<vmem>>, vector<1x4x32xf32>
    %262 = vector.shape_cast %261 : vector<1x4x32xf32> to vector<4x32xf32>
    %263 = vector.shape_cast %259 : vector<4x32xf32> to vector<1x4x32xf32>
    tpu.vector_store %arg12[%260, %c0_106, %c0_107], %263 {strides = array<i32>} : memref<8x4x32xf32, #tpu.memory_space<vmem>>, vector<1x4x32xf32>,
    %c5_i32 = arith.constant 5 : i32
    %c0_108 = arith.constant 0 : index
    %c0_109 = arith.constant 0 : index
    %264 = vector.load %arg13[%c0_108, %c0_109] : memref<4x32xf32, #tpu.memory_space<vmem>>, vector<4x32xf32>
    %c0_110 = arith.constant 0 : index
    %c0_111 = arith.constant 0 : index
    %265 = vector.load %arg14[%c0_110, %c0_111] : memref<4x32xf32, #tpu.memory_space<vmem>>, vector<4x32xf32>
    %266 = arith.index_cast %c5_i32 : i32 to index
    %c0_112 = arith.constant 0 : index
    %c0_113 = arith.constant 0 : index
    %267 = vector.load %arg11[%266, %c0_112, %c0_113] : memref<8x4x128xf32, #tpu.memory_space<vmem>>, vector<1x4x128xf32>
    %268 = vector.shape_cast %267 : vector<1x4x128xf32> to vector<4x128xf32>
    %cst_114 = arith.constant dense<0.000000e+00> : vector<4x128xf32>
    %269 = tpu.matmul %264, %3, %cst_114 {dimension_numbers = #tpu.dot_dimension_numbers<[1], [0], [0], [1], [0, 0, 1, 1], [], []>} : vector<4x32xf32>, vector<32x128xf32>, vector<4x128xf32> -> vector<4x128xf32>
    %270 = arith.addf %268, %269 : vector<4x128xf32>
    %cst_115 = arith.constant 5.000000e-01 : f32
    %271 = vector.broadcast %cst_115 : f32 to vector<4x128xf32>
    %272 = arith.mulf %271, %270 : vector<4x128xf32>
    %273 = math.tanh %272 : vector<4x128xf32>
    %cst_116 = arith.constant 1.000000e+00 : f32
    %274 = vector.broadcast %cst_116 : f32 to vector<4x128xf32>
    %275 = arith.addf %273, %274 : vector<4x128xf32>
    %cst_117 = arith.constant 5.000000e-01 : f32
    %276 = vector.broadcast %cst_117 : f32 to vector<4x128xf32>
    %277 = arith.mulf %276, %275 : vector<4x128xf32>
    %278 = math.tanh %270 : vector<4x128xf32>
    %279 = vector.extract_strided_slice %277 {offsets = [0, 0], sizes = [4, 32], strides = [1, 1]} : vector<4x128xf32> to vector<4x32xf32>
    %280 = vector.extract_strided_slice %277 {offsets = [0, 32], sizes = [4, 32], strides = [1, 1]} : vector<4x128xf32> to vector<4x32xf32>
    %281 = vector.extract_strided_slice %278 {offsets = [0, 64], sizes = [4, 32], strides = [1, 1]} : vector<4x128xf32> to vector<4x32xf32>
    %282 = vector.extract_strided_slice %277 {offsets = [0, 96], sizes = [4, 32], strides = [1, 1]} : vector<4x128xf32> to vector<4x32xf32>
    %283 = arith.mulf %280, %265 : vector<4x32xf32>
    %284 = arith.mulf %279, %281 : vector<4x32xf32>
    %285 = arith.addf %283, %284 : vector<4x32xf32>
    %286 = math.tanh %285 : vector<4x32xf32>
    %287 = arith.mulf %282, %286 : vector<4x32xf32>
    %288 = vector.broadcast %c5_i32 : i32 to vector<4x1xi32>
    %289 = arith.cmpi sgt, %0, %288 : vector<4x1xi32>
    %290 = arith.extui %289 : vector<4x1xi1> to vector<4x1xi32>
    %291 = arith.sitofp %290 : vector<4x1xi32> to vector<4x1xf32>
    %292 = vector.broadcast %291 : vector<4x1xf32> to vector<4x32xf32>
    %293 = arith.mulf %292, %287 : vector<4x32xf32>
    %cst_118 = arith.constant 1.000000e+00 : f32
    %294 = vector.broadcast %cst_118 : f32 to vector<4x1xf32>
    %295 = arith.subf %294, %291 : vector<4x1xf32>
    %296 = vector.broadcast %295 : vector<4x1xf32> to vector<4x32xf32>
    %297 = arith.mulf %296, %264 : vector<4x32xf32>
    %298 = arith.addf %293, %297 : vector<4x32xf32>
    %c0_119 = arith.constant 0 : index
    %c0_120 = arith.constant 0 : index
    %299 = vector.load %arg13[%c0_119, %c0_120] : memref<4x32xf32, #tpu.memory_space<vmem>>, vector<4x32xf32>
    tpu.vector_store %arg13[%c0_119, %c0_120], %298 {strides = array<i32>} : memref<4x32xf32, #tpu.memory_space<vmem>>, vector<4x32xf32>,
    %300 = vector.broadcast %291 : vector<4x1xf32> to vector<4x32xf32>
    %301 = arith.mulf %300, %285 : vector<4x32xf32>
    %cst_121 = arith.constant 1.000000e+00 : f32
    %302 = vector.broadcast %cst_121 : f32 to vector<4x1xf32>
    %303 = arith.subf %302, %291 : vector<4x1xf32>
    %304 = vector.broadcast %303 : vector<4x1xf32> to vector<4x32xf32>
    %305 = arith.mulf %304, %265 : vector<4x32xf32>
    %306 = arith.addf %301, %305 : vector<4x32xf32>
    %c0_122 = arith.constant 0 : index
    %c0_123 = arith.constant 0 : index
    %307 = vector.load %arg14[%c0_122, %c0_123] : memref<4x32xf32, #tpu.memory_space<vmem>>, vector<4x32xf32>
    tpu.vector_store %arg14[%c0_122, %c0_123], %306 {strides = array<i32>} : memref<4x32xf32, #tpu.memory_space<vmem>>, vector<4x32xf32>,
    %308 = vector.broadcast %291 : vector<4x1xf32> to vector<4x32xf32>
    %309 = arith.mulf %308, %287 : vector<4x32xf32>
    %310 = arith.index_cast %c5_i32 : i32 to index
    %c0_124 = arith.constant 0 : index
    %c0_125 = arith.constant 0 : index
    %311 = vector.load %arg12[%310, %c0_124, %c0_125] : memref<8x4x32xf32, #tpu.memory_space<vmem>>, vector<1x4x32xf32>
    %312 = vector.shape_cast %311 : vector<1x4x32xf32> to vector<4x32xf32>
    %313 = vector.shape_cast %309 : vector<4x32xf32> to vector<1x4x32xf32>
    tpu.vector_store %arg12[%310, %c0_124, %c0_125], %313 {strides = array<i32>} : memref<8x4x32xf32, #tpu.memory_space<vmem>>, vector<1x4x32xf32>,
    %c6_i32 = arith.constant 6 : i32
    %c0_126 = arith.constant 0 : index
    %c0_127 = arith.constant 0 : index
    %314 = vector.load %arg13[%c0_126, %c0_127] : memref<4x32xf32, #tpu.memory_space<vmem>>, vector<4x32xf32>
    %c0_128 = arith.constant 0 : index
    %c0_129 = arith.constant 0 : index
    %315 = vector.load %arg14[%c0_128, %c0_129] : memref<4x32xf32, #tpu.memory_space<vmem>>, vector<4x32xf32>
    %316 = arith.index_cast %c6_i32 : i32 to index
    %c0_130 = arith.constant 0 : index
    %c0_131 = arith.constant 0 : index
    %317 = vector.load %arg11[%316, %c0_130, %c0_131] : memref<8x4x128xf32, #tpu.memory_space<vmem>>, vector<1x4x128xf32>
    %318 = vector.shape_cast %317 : vector<1x4x128xf32> to vector<4x128xf32>
    %cst_132 = arith.constant dense<0.000000e+00> : vector<4x128xf32>
    %319 = tpu.matmul %314, %3, %cst_132 {dimension_numbers = #tpu.dot_dimension_numbers<[1], [0], [0], [1], [0, 0, 1, 1], [], []>} : vector<4x32xf32>, vector<32x128xf32>, vector<4x128xf32> -> vector<4x128xf32>
    %320 = arith.addf %318, %319 : vector<4x128xf32>
    %cst_133 = arith.constant 5.000000e-01 : f32
    %321 = vector.broadcast %cst_133 : f32 to vector<4x128xf32>
    %322 = arith.mulf %321, %320 : vector<4x128xf32>
    %323 = math.tanh %322 : vector<4x128xf32>
    %cst_134 = arith.constant 1.000000e+00 : f32
    %324 = vector.broadcast %cst_134 : f32 to vector<4x128xf32>
    %325 = arith.addf %323, %324 : vector<4x128xf32>
    %cst_135 = arith.constant 5.000000e-01 : f32
    %326 = vector.broadcast %cst_135 : f32 to vector<4x128xf32>
    %327 = arith.mulf %326, %325 : vector<4x128xf32>
    %328 = math.tanh %320 : vector<4x128xf32>
    %329 = vector.extract_strided_slice %327 {offsets = [0, 0], sizes = [4, 32], strides = [1, 1]} : vector<4x128xf32> to vector<4x32xf32>
    %330 = vector.extract_strided_slice %327 {offsets = [0, 32], sizes = [4, 32], strides = [1, 1]} : vector<4x128xf32> to vector<4x32xf32>
    %331 = vector.extract_strided_slice %328 {offsets = [0, 64], sizes = [4, 32], strides = [1, 1]} : vector<4x128xf32> to vector<4x32xf32>
    %332 = vector.extract_strided_slice %327 {offsets = [0, 96], sizes = [4, 32], strides = [1, 1]} : vector<4x128xf32> to vector<4x32xf32>
    %333 = arith.mulf %330, %315 : vector<4x32xf32>
    %334 = arith.mulf %329, %331 : vector<4x32xf32>
    %335 = arith.addf %333, %334 : vector<4x32xf32>
    %336 = math.tanh %335 : vector<4x32xf32>
    %337 = arith.mulf %332, %336 : vector<4x32xf32>
    %338 = vector.broadcast %c6_i32 : i32 to vector<4x1xi32>
    %339 = arith.cmpi sgt, %0, %338 : vector<4x1xi32>
    %340 = arith.extui %339 : vector<4x1xi1> to vector<4x1xi32>
    %341 = arith.sitofp %340 : vector<4x1xi32> to vector<4x1xf32>
    %342 = vector.broadcast %341 : vector<4x1xf32> to vector<4x32xf32>
    %343 = arith.mulf %342, %337 : vector<4x32xf32>
    %cst_136 = arith.constant 1.000000e+00 : f32
    %344 = vector.broadcast %cst_136 : f32 to vector<4x1xf32>
    %345 = arith.subf %344, %341 : vector<4x1xf32>
    %346 = vector.broadcast %345 : vector<4x1xf32> to vector<4x32xf32>
    %347 = arith.mulf %346, %314 : vector<4x32xf32>
    %348 = arith.addf %343, %347 : vector<4x32xf32>
    %c0_137 = arith.constant 0 : index
    %c0_138 = arith.constant 0 : index
    %349 = vector.load %arg13[%c0_137, %c0_138] : memref<4x32xf32, #tpu.memory_space<vmem>>, vector<4x32xf32>
    tpu.vector_store %arg13[%c0_137, %c0_138], %348 {strides = array<i32>} : memref<4x32xf32, #tpu.memory_space<vmem>>, vector<4x32xf32>,
    %350 = vector.broadcast %341 : vector<4x1xf32> to vector<4x32xf32>
    %351 = arith.mulf %350, %335 : vector<4x32xf32>
    %cst_139 = arith.constant 1.000000e+00 : f32
    %352 = vector.broadcast %cst_139 : f32 to vector<4x1xf32>
    %353 = arith.subf %352, %341 : vector<4x1xf32>
    %354 = vector.broadcast %353 : vector<4x1xf32> to vector<4x32xf32>
    %355 = arith.mulf %354, %315 : vector<4x32xf32>
    %356 = arith.addf %351, %355 : vector<4x32xf32>
    %c0_140 = arith.constant 0 : index
    %c0_141 = arith.constant 0 : index
    %357 = vector.load %arg14[%c0_140, %c0_141] : memref<4x32xf32, #tpu.memory_space<vmem>>, vector<4x32xf32>
    tpu.vector_store %arg14[%c0_140, %c0_141], %356 {strides = array<i32>} : memref<4x32xf32, #tpu.memory_space<vmem>>, vector<4x32xf32>,
    %358 = vector.broadcast %341 : vector<4x1xf32> to vector<4x32xf32>
    %359 = arith.mulf %358, %337 : vector<4x32xf32>
    %360 = arith.index_cast %c6_i32 : i32 to index
    %c0_142 = arith.constant 0 : index
    %c0_143 = arith.constant 0 : index
    %361 = vector.load %arg12[%360, %c0_142, %c0_143] : memref<8x4x32xf32, #tpu.memory_space<vmem>>, vector<1x4x32xf32>
    %362 = vector.shape_cast %361 : vector<1x4x32xf32> to vector<4x32xf32>
    %363 = vector.shape_cast %359 : vector<4x32xf32> to vector<1x4x32xf32>
    tpu.vector_store %arg12[%360, %c0_142, %c0_143], %363 {strides = array<i32>} : memref<8x4x32xf32, #tpu.memory_space<vmem>>, vector<1x4x32xf32>,
    %c7_i32 = arith.constant 7 : i32
    %c0_144 = arith.constant 0 : index
    %c0_145 = arith.constant 0 : index
    %364 = vector.load %arg13[%c0_144, %c0_145] : memref<4x32xf32, #tpu.memory_space<vmem>>, vector<4x32xf32>
    %c0_146 = arith.constant 0 : index
    %c0_147 = arith.constant 0 : index
    %365 = vector.load %arg14[%c0_146, %c0_147] : memref<4x32xf32, #tpu.memory_space<vmem>>, vector<4x32xf32>
    %366 = arith.index_cast %c7_i32 : i32 to index
    %c0_148 = arith.constant 0 : index
    %c0_149 = arith.constant 0 : index
    %367 = vector.load %arg11[%366, %c0_148, %c0_149] : memref<8x4x128xf32, #tpu.memory_space<vmem>>, vector<1x4x128xf32>
    %368 = vector.shape_cast %367 : vector<1x4x128xf32> to vector<4x128xf32>
    %cst_150 = arith.constant dense<0.000000e+00> : vector<4x128xf32>
    %369 = tpu.matmul %364, %3, %cst_150 {dimension_numbers = #tpu.dot_dimension_numbers<[1], [0], [0], [1], [0, 0, 1, 1], [], []>} : vector<4x32xf32>, vector<32x128xf32>, vector<4x128xf32> -> vector<4x128xf32>
    %370 = arith.addf %368, %369 : vector<4x128xf32>
    %cst_151 = arith.constant 5.000000e-01 : f32
    %371 = vector.broadcast %cst_151 : f32 to vector<4x128xf32>
    %372 = arith.mulf %371, %370 : vector<4x128xf32>
    %373 = math.tanh %372 : vector<4x128xf32>
    %cst_152 = arith.constant 1.000000e+00 : f32
    %374 = vector.broadcast %cst_152 : f32 to vector<4x128xf32>
    %375 = arith.addf %373, %374 : vector<4x128xf32>
    %cst_153 = arith.constant 5.000000e-01 : f32
    %376 = vector.broadcast %cst_153 : f32 to vector<4x128xf32>
    %377 = arith.mulf %376, %375 : vector<4x128xf32>
    %378 = math.tanh %370 : vector<4x128xf32>
    %379 = vector.extract_strided_slice %377 {offsets = [0, 0], sizes = [4, 32], strides = [1, 1]} : vector<4x128xf32> to vector<4x32xf32>
    %380 = vector.extract_strided_slice %377 {offsets = [0, 32], sizes = [4, 32], strides = [1, 1]} : vector<4x128xf32> to vector<4x32xf32>
    %381 = vector.extract_strided_slice %378 {offsets = [0, 64], sizes = [4, 32], strides = [1, 1]} : vector<4x128xf32> to vector<4x32xf32>
    %382 = vector.extract_strided_slice %377 {offsets = [0, 96], sizes = [4, 32], strides = [1, 1]} : vector<4x128xf32> to vector<4x32xf32>
    %383 = arith.mulf %380, %365 : vector<4x32xf32>
    %384 = arith.mulf %379, %381 : vector<4x32xf32>
    %385 = arith.addf %383, %384 : vector<4x32xf32>
    %386 = math.tanh %385 : vector<4x32xf32>
    %387 = arith.mulf %382, %386 : vector<4x32xf32>
    %388 = vector.broadcast %c7_i32 : i32 to vector<4x1xi32>
    %389 = arith.cmpi sgt, %0, %388 : vector<4x1xi32>
    %390 = arith.extui %389 : vector<4x1xi1> to vector<4x1xi32>
    %391 = arith.sitofp %390 : vector<4x1xi32> to vector<4x1xf32>
    %392 = vector.broadcast %391 : vector<4x1xf32> to vector<4x32xf32>
    %393 = arith.mulf %392, %387 : vector<4x32xf32>
    %cst_154 = arith.constant 1.000000e+00 : f32
    %394 = vector.broadcast %cst_154 : f32 to vector<4x1xf32>
    %395 = arith.subf %394, %391 : vector<4x1xf32>
    %396 = vector.broadcast %395 : vector<4x1xf32> to vector<4x32xf32>
    %397 = arith.mulf %396, %364 : vector<4x32xf32>
    %398 = arith.addf %393, %397 : vector<4x32xf32>
    %c0_155 = arith.constant 0 : index
    %c0_156 = arith.constant 0 : index
    %399 = vector.load %arg13[%c0_155, %c0_156] : memref<4x32xf32, #tpu.memory_space<vmem>>, vector<4x32xf32>
    tpu.vector_store %arg13[%c0_155, %c0_156], %398 {strides = array<i32>} : memref<4x32xf32, #tpu.memory_space<vmem>>, vector<4x32xf32>,
    %400 = vector.broadcast %391 : vector<4x1xf32> to vector<4x32xf32>
    %401 = arith.mulf %400, %385 : vector<4x32xf32>
    %cst_157 = arith.constant 1.000000e+00 : f32
    %402 = vector.broadcast %cst_157 : f32 to vector<4x1xf32>
    %403 = arith.subf %402, %391 : vector<4x1xf32>
    %404 = vector.broadcast %403 : vector<4x1xf32> to vector<4x32xf32>
    %405 = arith.mulf %404, %365 : vector<4x32xf32>
    %406 = arith.addf %401, %405 : vector<4x32xf32>
    %c0_158 = arith.constant 0 : index
    %c0_159 = arith.constant 0 : index
    %407 = vector.load %arg14[%c0_158, %c0_159] : memref<4x32xf32, #tpu.memory_space<vmem>>, vector<4x32xf32>
    tpu.vector_store %arg14[%c0_158, %c0_159], %406 {strides = array<i32>} : memref<4x32xf32, #tpu.memory_space<vmem>>, vector<4x32xf32>,
    %408 = vector.broadcast %391 : vector<4x1xf32> to vector<4x32xf32>
    %409 = arith.mulf %408, %387 : vector<4x32xf32>
    %410 = arith.index_cast %c7_i32 : i32 to index
    %c0_160 = arith.constant 0 : index
    %c0_161 = arith.constant 0 : index
    %411 = vector.load %arg12[%410, %c0_160, %c0_161] : memref<8x4x32xf32, #tpu.memory_space<vmem>>, vector<1x4x32xf32>
    %412 = vector.shape_cast %411 : vector<1x4x32xf32> to vector<4x32xf32>
    %413 = vector.shape_cast %409 : vector<4x32xf32> to vector<1x4x32xf32>
    tpu.vector_store %arg12[%410, %c0_160, %c0_161], %413 {strides = array<i32>} : memref<8x4x32xf32, #tpu.memory_space<vmem>>, vector<1x4x32xf32>,
    %c8_i32 = arith.constant 8 : i32
    %c0_162 = arith.constant 0 : index
    %c0_163 = arith.constant 0 : index
    %c0_164 = arith.constant 0 : index
    %414 = vector.load %arg12[%c0_162, %c0_163, %c0_164] : memref<8x4x32xf32, #tpu.memory_space<vmem>>, vector<8x4x32xf32>
    %415 = vector.shape_cast %414 : vector<8x4x32xf32> to vector<32x32xf32>
    %c0_165 = arith.constant 0 : index
    %c0_166 = arith.constant 0 : index
    %416 = vector.load %arg5[%c0_165, %c0_166] : memref<32x128xf32, #tpu.memory_space<vmem>>, vector<32x128xf32>
    %c0_167 = arith.constant 0 : index
    %c0_168 = arith.constant 0 : index
    %417 = vector.load %arg6[%c0_167, %c0_168] : memref<32x128xf32, #tpu.memory_space<vmem>>, vector<32x128xf32>
    %c0_169 = arith.constant 0 : index
    %c0_170 = arith.constant 0 : index
    %418 = vector.load %arg7[%c0_169, %c0_170] : memref<1x128xf32, #tpu.memory_space<vmem>>, vector<1x128xf32>
    %cst_171 = arith.constant dense<0.000000e+00> : vector<32x128xf32>
    %419 = tpu.matmul %415, %416, %cst_171 {dimension_numbers = #tpu.dot_dimension_numbers<[1], [0], [0], [1], [0, 0, 1, 1], [], []>} : vector<32x32xf32>, vector<32x128xf32>, vector<32x128xf32> -> vector<32x128xf32>
    %420 = vector.broadcast %418 : vector<1x128xf32> to vector<32x128xf32>
    %421 = arith.addf %419, %420 : vector<32x128xf32>
    %422 = vector.shape_cast %421 : vector<32x128xf32> to vector<8x4x128xf32>
    %c0_172 = arith.constant 0 : index
    %c0_173 = arith.constant 0 : index
    %c0_174 = arith.constant 0 : index
    %423 = vector.load %arg11[%c0_172, %c0_173, %c0_174] : memref<8x4x128xf32, #tpu.memory_space<vmem>>, vector<8x4x128xf32>
    tpu.vector_store %arg11[%c0_172, %c0_173, %c0_174], %422 {strides = array<i32>} : memref<8x4x128xf32, #tpu.memory_space<vmem>>, vector<8x4x128xf32>,
    %cst_175 = arith.constant 0.000000e+00 : f32
    %424 = vector.broadcast %cst_175 : f32 to vector<4x32xf32>
    %c0_176 = arith.constant 0 : index
    %c0_177 = arith.constant 0 : index
    %425 = vector.load %arg13[%c0_176, %c0_177] : memref<4x32xf32, #tpu.memory_space<vmem>>, vector<4x32xf32>
    tpu.vector_store %arg13[%c0_176, %c0_177], %424 {strides = array<i32>} : memref<4x32xf32, #tpu.memory_space<vmem>>, vector<4x32xf32>,
    %cst_178 = arith.constant 0.000000e+00 : f32
    %426 = vector.broadcast %cst_178 : f32 to vector<4x32xf32>
    %c0_179 = arith.constant 0 : index
    %c0_180 = arith.constant 0 : index
    %427 = vector.load %arg14[%c0_179, %c0_180] : memref<4x32xf32, #tpu.memory_space<vmem>>, vector<4x32xf32>
    tpu.vector_store %arg14[%c0_179, %c0_180], %426 {strides = array<i32>} : memref<4x32xf32, #tpu.memory_space<vmem>>, vector<4x32xf32>,
    %c0_i32_181 = arith.constant 0 : i32
    %c0_182 = arith.constant 0 : index
    %c0_183 = arith.constant 0 : index
    %428 = vector.load %arg13[%c0_182, %c0_183] : memref<4x32xf32, #tpu.memory_space<vmem>>, vector<4x32xf32>
    %c0_184 = arith.constant 0 : index
    %c0_185 = arith.constant 0 : index
    %429 = vector.load %arg14[%c0_184, %c0_185] : memref<4x32xf32, #tpu.memory_space<vmem>>, vector<4x32xf32>
    %430 = arith.index_cast %c0_i32_181 : i32 to index
    %c0_186 = arith.constant 0 : index
    %c0_187 = arith.constant 0 : index
    %431 = vector.load %arg11[%430, %c0_186, %c0_187] : memref<8x4x128xf32, #tpu.memory_space<vmem>>, vector<1x4x128xf32>
    %432 = vector.shape_cast %431 : vector<1x4x128xf32> to vector<4x128xf32>
    %cst_188 = arith.constant dense<0.000000e+00> : vector<4x128xf32>
    %433 = tpu.matmul %428, %417, %cst_188 {dimension_numbers = #tpu.dot_dimension_numbers<[1], [0], [0], [1], [0, 0, 1, 1], [], []>} : vector<4x32xf32>, vector<32x128xf32>, vector<4x128xf32> -> vector<4x128xf32>
    %434 = arith.addf %432, %433 : vector<4x128xf32>
    %cst_189 = arith.constant 5.000000e-01 : f32
    %435 = vector.broadcast %cst_189 : f32 to vector<4x128xf32>
    %436 = arith.mulf %435, %434 : vector<4x128xf32>
    %437 = math.tanh %436 : vector<4x128xf32>
    %cst_190 = arith.constant 1.000000e+00 : f32
    %438 = vector.broadcast %cst_190 : f32 to vector<4x128xf32>
    %439 = arith.addf %437, %438 : vector<4x128xf32>
    %cst_191 = arith.constant 5.000000e-01 : f32
    %440 = vector.broadcast %cst_191 : f32 to vector<4x128xf32>
    %441 = arith.mulf %440, %439 : vector<4x128xf32>
    %442 = math.tanh %434 : vector<4x128xf32>
    %443 = vector.extract_strided_slice %441 {offsets = [0, 0], sizes = [4, 32], strides = [1, 1]} : vector<4x128xf32> to vector<4x32xf32>
    %444 = vector.extract_strided_slice %441 {offsets = [0, 32], sizes = [4, 32], strides = [1, 1]} : vector<4x128xf32> to vector<4x32xf32>
    %445 = vector.extract_strided_slice %442 {offsets = [0, 64], sizes = [4, 32], strides = [1, 1]} : vector<4x128xf32> to vector<4x32xf32>
    %446 = vector.extract_strided_slice %441 {offsets = [0, 96], sizes = [4, 32], strides = [1, 1]} : vector<4x128xf32> to vector<4x32xf32>
    %447 = arith.mulf %444, %429 : vector<4x32xf32>
    %448 = arith.mulf %443, %445 : vector<4x32xf32>
    %449 = arith.addf %447, %448 : vector<4x32xf32>
    %450 = math.tanh %449 : vector<4x32xf32>
    %451 = arith.mulf %446, %450 : vector<4x32xf32>
    %452 = vector.broadcast %c0_i32_181 : i32 to vector<4x1xi32>
    %453 = arith.cmpi sgt, %0, %452 : vector<4x1xi32>
    %454 = arith.extui %453 : vector<4x1xi1> to vector<4x1xi32>
    %455 = arith.sitofp %454 : vector<4x1xi32> to vector<4x1xf32>
    %456 = vector.broadcast %455 : vector<4x1xf32> to vector<4x32xf32>
    %457 = arith.mulf %456, %451 : vector<4x32xf32>
    %cst_192 = arith.constant 1.000000e+00 : f32
    %458 = vector.broadcast %cst_192 : f32 to vector<4x1xf32>
    %459 = arith.subf %458, %455 : vector<4x1xf32>
    %460 = vector.broadcast %459 : vector<4x1xf32> to vector<4x32xf32>
    %461 = arith.mulf %460, %428 : vector<4x32xf32>
    %462 = arith.addf %457, %461 : vector<4x32xf32>
    %c0_193 = arith.constant 0 : index
    %c0_194 = arith.constant 0 : index
    %463 = vector.load %arg13[%c0_193, %c0_194] : memref<4x32xf32, #tpu.memory_space<vmem>>, vector<4x32xf32>
    tpu.vector_store %arg13[%c0_193, %c0_194], %462 {strides = array<i32>} : memref<4x32xf32, #tpu.memory_space<vmem>>, vector<4x32xf32>,
    %464 = vector.broadcast %455 : vector<4x1xf32> to vector<4x32xf32>
    %465 = arith.mulf %464, %449 : vector<4x32xf32>
    %cst_195 = arith.constant 1.000000e+00 : f32
    %466 = vector.broadcast %cst_195 : f32 to vector<4x1xf32>
    %467 = arith.subf %466, %455 : vector<4x1xf32>
    %468 = vector.broadcast %467 : vector<4x1xf32> to vector<4x32xf32>
    %469 = arith.mulf %468, %429 : vector<4x32xf32>
    %470 = arith.addf %465, %469 : vector<4x32xf32>
    %c0_196 = arith.constant 0 : index
    %c0_197 = arith.constant 0 : index
    %471 = vector.load %arg14[%c0_196, %c0_197] : memref<4x32xf32, #tpu.memory_space<vmem>>, vector<4x32xf32>
    tpu.vector_store %arg14[%c0_196, %c0_197], %470 {strides = array<i32>} : memref<4x32xf32, #tpu.memory_space<vmem>>, vector<4x32xf32>,
    %472 = vector.broadcast %455 : vector<4x1xf32> to vector<4x32xf32>
    %473 = arith.mulf %472, %451 : vector<4x32xf32>
    %474 = arith.index_cast %c0_i32_181 : i32 to index
    %c0_198 = arith.constant 0 : index
    %c0_199 = arith.constant 0 : index
    %475 = vector.load %arg12[%474, %c0_198, %c0_199] : memref<8x4x32xf32, #tpu.memory_space<vmem>>, vector<1x4x32xf32>
    %476 = vector.shape_cast %475 : vector<1x4x32xf32> to vector<4x32xf32>
    %477 = vector.shape_cast %473 : vector<4x32xf32> to vector<1x4x32xf32>
    tpu.vector_store %arg12[%474, %c0_198, %c0_199], %477 {strides = array<i32>} : memref<8x4x32xf32, #tpu.memory_space<vmem>>, vector<1x4x32xf32>,
    %c1_i32_200 = arith.constant 1 : i32
    %c0_201 = arith.constant 0 : index
    %c0_202 = arith.constant 0 : index
    %478 = vector.load %arg13[%c0_201, %c0_202] : memref<4x32xf32, #tpu.memory_space<vmem>>, vector<4x32xf32>
    %c0_203 = arith.constant 0 : index
    %c0_204 = arith.constant 0 : index
    %479 = vector.load %arg14[%c0_203, %c0_204] : memref<4x32xf32, #tpu.memory_space<vmem>>, vector<4x32xf32>
    %480 = arith.index_cast %c1_i32_200 : i32 to index
    %c0_205 = arith.constant 0 : index
    %c0_206 = arith.constant 0 : index
    %481 = vector.load %arg11[%480, %c0_205, %c0_206] : memref<8x4x128xf32, #tpu.memory_space<vmem>>, vector<1x4x128xf32>
    %482 = vector.shape_cast %481 : vector<1x4x128xf32> to vector<4x128xf32>
    %cst_207 = arith.constant dense<0.000000e+00> : vector<4x128xf32>
    %483 = tpu.matmul %478, %417, %cst_207 {dimension_numbers = #tpu.dot_dimension_numbers<[1], [0], [0], [1], [0, 0, 1, 1], [], []>} : vector<4x32xf32>, vector<32x128xf32>, vector<4x128xf32> -> vector<4x128xf32>
    %484 = arith.addf %482, %483 : vector<4x128xf32>
    %cst_208 = arith.constant 5.000000e-01 : f32
    %485 = vector.broadcast %cst_208 : f32 to vector<4x128xf32>
    %486 = arith.mulf %485, %484 : vector<4x128xf32>
    %487 = math.tanh %486 : vector<4x128xf32>
    %cst_209 = arith.constant 1.000000e+00 : f32
    %488 = vector.broadcast %cst_209 : f32 to vector<4x128xf32>
    %489 = arith.addf %487, %488 : vector<4x128xf32>
    %cst_210 = arith.constant 5.000000e-01 : f32
    %490 = vector.broadcast %cst_210 : f32 to vector<4x128xf32>
    %491 = arith.mulf %490, %489 : vector<4x128xf32>
    %492 = math.tanh %484 : vector<4x128xf32>
    %493 = vector.extract_strided_slice %491 {offsets = [0, 0], sizes = [4, 32], strides = [1, 1]} : vector<4x128xf32> to vector<4x32xf32>
    %494 = vector.extract_strided_slice %491 {offsets = [0, 32], sizes = [4, 32], strides = [1, 1]} : vector<4x128xf32> to vector<4x32xf32>
    %495 = vector.extract_strided_slice %492 {offsets = [0, 64], sizes = [4, 32], strides = [1, 1]} : vector<4x128xf32> to vector<4x32xf32>
    %496 = vector.extract_strided_slice %491 {offsets = [0, 96], sizes = [4, 32], strides = [1, 1]} : vector<4x128xf32> to vector<4x32xf32>
    %497 = arith.mulf %494, %479 : vector<4x32xf32>
    %498 = arith.mulf %493, %495 : vector<4x32xf32>
    %499 = arith.addf %497, %498 : vector<4x32xf32>
    %500 = math.tanh %499 : vector<4x32xf32>
    %501 = arith.mulf %496, %500 : vector<4x32xf32>
    %502 = vector.broadcast %c1_i32_200 : i32 to vector<4x1xi32>
    %503 = arith.cmpi sgt, %0, %502 : vector<4x1xi32>
    %504 = arith.extui %503 : vector<4x1xi1> to vector<4x1xi32>
    %505 = arith.sitofp %504 : vector<4x1xi32> to vector<4x1xf32>
    %506 = vector.broadcast %505 : vector<4x1xf32> to vector<4x32xf32>
    %507 = arith.mulf %506, %501 : vector<4x32xf32>
    %cst_211 = arith.constant 1.000000e+00 : f32
    %508 = vector.broadcast %cst_211 : f32 to vector<4x1xf32>
    %509 = arith.subf %508, %505 : vector<4x1xf32>
    %510 = vector.broadcast %509 : vector<4x1xf32> to vector<4x32xf32>
    %511 = arith.mulf %510, %478 : vector<4x32xf32>
    %512 = arith.addf %507, %511 : vector<4x32xf32>
    %c0_212 = arith.constant 0 : index
    %c0_213 = arith.constant 0 : index
    %513 = vector.load %arg13[%c0_212, %c0_213] : memref<4x32xf32, #tpu.memory_space<vmem>>, vector<4x32xf32>
    tpu.vector_store %arg13[%c0_212, %c0_213], %512 {strides = array<i32>} : memref<4x32xf32, #tpu.memory_space<vmem>>, vector<4x32xf32>,
    %514 = vector.broadcast %505 : vector<4x1xf32> to vector<4x32xf32>
    %515 = arith.mulf %514, %499 : vector<4x32xf32>
    %cst_214 = arith.constant 1.000000e+00 : f32
    %516 = vector.broadcast %cst_214 : f32 to vector<4x1xf32>
    %517 = arith.subf %516, %505 : vector<4x1xf32>
    %518 = vector.broadcast %517 : vector<4x1xf32> to vector<4x32xf32>
    %519 = arith.mulf %518, %479 : vector<4x32xf32>
    %520 = arith.addf %515, %519 : vector<4x32xf32>
    %c0_215 = arith.constant 0 : index
    %c0_216 = arith.constant 0 : index
    %521 = vector.load %arg14[%c0_215, %c0_216] : memref<4x32xf32, #tpu.memory_space<vmem>>, vector<4x32xf32>
    tpu.vector_store %arg14[%c0_215, %c0_216], %520 {strides = array<i32>} : memref<4x32xf32, #tpu.memory_space<vmem>>, vector<4x32xf32>,
    %522 = vector.broadcast %505 : vector<4x1xf32> to vector<4x32xf32>
    %523 = arith.mulf %522, %501 : vector<4x32xf32>
    %524 = arith.index_cast %c1_i32_200 : i32 to index
    %c0_217 = arith.constant 0 : index
    %c0_218 = arith.constant 0 : index
    %525 = vector.load %arg12[%524, %c0_217, %c0_218] : memref<8x4x32xf32, #tpu.memory_space<vmem>>, vector<1x4x32xf32>
    %526 = vector.shape_cast %525 : vector<1x4x32xf32> to vector<4x32xf32>
    %527 = vector.shape_cast %523 : vector<4x32xf32> to vector<1x4x32xf32>
    tpu.vector_store %arg12[%524, %c0_217, %c0_218], %527 {strides = array<i32>} : memref<8x4x32xf32, #tpu.memory_space<vmem>>, vector<1x4x32xf32>,
    %c2_i32_219 = arith.constant 2 : i32
    %c0_220 = arith.constant 0 : index
    %c0_221 = arith.constant 0 : index
    %528 = vector.load %arg13[%c0_220, %c0_221] : memref<4x32xf32, #tpu.memory_space<vmem>>, vector<4x32xf32>
    %c0_222 = arith.constant 0 : index
    %c0_223 = arith.constant 0 : index
    %529 = vector.load %arg14[%c0_222, %c0_223] : memref<4x32xf32, #tpu.memory_space<vmem>>, vector<4x32xf32>
    %530 = arith.index_cast %c2_i32_219 : i32 to index
    %c0_224 = arith.constant 0 : index
    %c0_225 = arith.constant 0 : index
    %531 = vector.load %arg11[%530, %c0_224, %c0_225] : memref<8x4x128xf32, #tpu.memory_space<vmem>>, vector<1x4x128xf32>
    %532 = vector.shape_cast %531 : vector<1x4x128xf32> to vector<4x128xf32>
    %cst_226 = arith.constant dense<0.000000e+00> : vector<4x128xf32>
    %533 = tpu.matmul %528, %417, %cst_226 {dimension_numbers = #tpu.dot_dimension_numbers<[1], [0], [0], [1], [0, 0, 1, 1], [], []>} : vector<4x32xf32>, vector<32x128xf32>, vector<4x128xf32> -> vector<4x128xf32>
    %534 = arith.addf %532, %533 : vector<4x128xf32>
    %cst_227 = arith.constant 5.000000e-01 : f32
    %535 = vector.broadcast %cst_227 : f32 to vector<4x128xf32>
    %536 = arith.mulf %535, %534 : vector<4x128xf32>
    %537 = math.tanh %536 : vector<4x128xf32>
    %cst_228 = arith.constant 1.000000e+00 : f32
    %538 = vector.broadcast %cst_228 : f32 to vector<4x128xf32>
    %539 = arith.addf %537, %538 : vector<4x128xf32>
    %cst_229 = arith.constant 5.000000e-01 : f32
    %540 = vector.broadcast %cst_229 : f32 to vector<4x128xf32>
    %541 = arith.mulf %540, %539 : vector<4x128xf32>
    %542 = math.tanh %534 : vector<4x128xf32>
    %543 = vector.extract_strided_slice %541 {offsets = [0, 0], sizes = [4, 32], strides = [1, 1]} : vector<4x128xf32> to vector<4x32xf32>
    %544 = vector.extract_strided_slice %541 {offsets = [0, 32], sizes = [4, 32], strides = [1, 1]} : vector<4x128xf32> to vector<4x32xf32>
    %545 = vector.extract_strided_slice %542 {offsets = [0, 64], sizes = [4, 32], strides = [1, 1]} : vector<4x128xf32> to vector<4x32xf32>
    %546 = vector.extract_strided_slice %541 {offsets = [0, 96], sizes = [4, 32], strides = [1, 1]} : vector<4x128xf32> to vector<4x32xf32>
    %547 = arith.mulf %544, %529 : vector<4x32xf32>
    %548 = arith.mulf %543, %545 : vector<4x32xf32>
    %549 = arith.addf %547, %548 : vector<4x32xf32>
    %550 = math.tanh %549 : vector<4x32xf32>
    %551 = arith.mulf %546, %550 : vector<4x32xf32>
    %552 = vector.broadcast %c2_i32_219 : i32 to vector<4x1xi32>
    %553 = arith.cmpi sgt, %0, %552 : vector<4x1xi32>
    %554 = arith.extui %553 : vector<4x1xi1> to vector<4x1xi32>
    %555 = arith.sitofp %554 : vector<4x1xi32> to vector<4x1xf32>
    %556 = vector.broadcast %555 : vector<4x1xf32> to vector<4x32xf32>
    %557 = arith.mulf %556, %551 : vector<4x32xf32>
    %cst_230 = arith.constant 1.000000e+00 : f32
    %558 = vector.broadcast %cst_230 : f32 to vector<4x1xf32>
    %559 = arith.subf %558, %555 : vector<4x1xf32>
    %560 = vector.broadcast %559 : vector<4x1xf32> to vector<4x32xf32>
    %561 = arith.mulf %560, %528 : vector<4x32xf32>
    %562 = arith.addf %557, %561 : vector<4x32xf32>
    %c0_231 = arith.constant 0 : index
    %c0_232 = arith.constant 0 : index
    %563 = vector.load %arg13[%c0_231, %c0_232] : memref<4x32xf32, #tpu.memory_space<vmem>>, vector<4x32xf32>
    tpu.vector_store %arg13[%c0_231, %c0_232], %562 {strides = array<i32>} : memref<4x32xf32, #tpu.memory_space<vmem>>, vector<4x32xf32>,
    %564 = vector.broadcast %555 : vector<4x1xf32> to vector<4x32xf32>
    %565 = arith.mulf %564, %549 : vector<4x32xf32>
    %cst_233 = arith.constant 1.000000e+00 : f32
    %566 = vector.broadcast %cst_233 : f32 to vector<4x1xf32>
    %567 = arith.subf %566, %555 : vector<4x1xf32>
    %568 = vector.broadcast %567 : vector<4x1xf32> to vector<4x32xf32>
    %569 = arith.mulf %568, %529 : vector<4x32xf32>
    %570 = arith.addf %565, %569 : vector<4x32xf32>
    %c0_234 = arith.constant 0 : index
    %c0_235 = arith.constant 0 : index
    %571 = vector.load %arg14[%c0_234, %c0_235] : memref<4x32xf32, #tpu.memory_space<vmem>>, vector<4x32xf32>
    tpu.vector_store %arg14[%c0_234, %c0_235], %570 {strides = array<i32>} : memref<4x32xf32, #tpu.memory_space<vmem>>, vector<4x32xf32>,
    %572 = vector.broadcast %555 : vector<4x1xf32> to vector<4x32xf32>
    %573 = arith.mulf %572, %551 : vector<4x32xf32>
    %574 = arith.index_cast %c2_i32_219 : i32 to index
    %c0_236 = arith.constant 0 : index
    %c0_237 = arith.constant 0 : index
    %575 = vector.load %arg12[%574, %c0_236, %c0_237] : memref<8x4x32xf32, #tpu.memory_space<vmem>>, vector<1x4x32xf32>
    %576 = vector.shape_cast %575 : vector<1x4x32xf32> to vector<4x32xf32>
    %577 = vector.shape_cast %573 : vector<4x32xf32> to vector<1x4x32xf32>
    tpu.vector_store %arg12[%574, %c0_236, %c0_237], %577 {strides = array<i32>} : memref<8x4x32xf32, #tpu.memory_space<vmem>>, vector<1x4x32xf32>,
    %c3_i32_238 = arith.constant 3 : i32
    %c0_239 = arith.constant 0 : index
    %c0_240 = arith.constant 0 : index
    %578 = vector.load %arg13[%c0_239, %c0_240] : memref<4x32xf32, #tpu.memory_space<vmem>>, vector<4x32xf32>
    %c0_241 = arith.constant 0 : index
    %c0_242 = arith.constant 0 : index
    %579 = vector.load %arg14[%c0_241, %c0_242] : memref<4x32xf32, #tpu.memory_space<vmem>>, vector<4x32xf32>
    %580 = arith.index_cast %c3_i32_238 : i32 to index
    %c0_243 = arith.constant 0 : index
    %c0_244 = arith.constant 0 : index
    %581 = vector.load %arg11[%580, %c0_243, %c0_244] : memref<8x4x128xf32, #tpu.memory_space<vmem>>, vector<1x4x128xf32>
    %582 = vector.shape_cast %581 : vector<1x4x128xf32> to vector<4x128xf32>
    %cst_245 = arith.constant dense<0.000000e+00> : vector<4x128xf32>
    %583 = tpu.matmul %578, %417, %cst_245 {dimension_numbers = #tpu.dot_dimension_numbers<[1], [0], [0], [1], [0, 0, 1, 1], [], []>} : vector<4x32xf32>, vector<32x128xf32>, vector<4x128xf32> -> vector<4x128xf32>
    %584 = arith.addf %582, %583 : vector<4x128xf32>
    %cst_246 = arith.constant 5.000000e-01 : f32
    %585 = vector.broadcast %cst_246 : f32 to vector<4x128xf32>
    %586 = arith.mulf %585, %584 : vector<4x128xf32>
    %587 = math.tanh %586 : vector<4x128xf32>
    %cst_247 = arith.constant 1.000000e+00 : f32
    %588 = vector.broadcast %cst_247 : f32 to vector<4x128xf32>
    %589 = arith.addf %587, %588 : vector<4x128xf32>
    %cst_248 = arith.constant 5.000000e-01 : f32
    %590 = vector.broadcast %cst_248 : f32 to vector<4x128xf32>
    %591 = arith.mulf %590, %589 : vector<4x128xf32>
    %592 = math.tanh %584 : vector<4x128xf32>
    %593 = vector.extract_strided_slice %591 {offsets = [0, 0], sizes = [4, 32], strides = [1, 1]} : vector<4x128xf32> to vector<4x32xf32>
    %594 = vector.extract_strided_slice %591 {offsets = [0, 32], sizes = [4, 32], strides = [1, 1]} : vector<4x128xf32> to vector<4x32xf32>
    %595 = vector.extract_strided_slice %592 {offsets = [0, 64], sizes = [4, 32], strides = [1, 1]} : vector<4x128xf32> to vector<4x32xf32>
    %596 = vector.extract_strided_slice %591 {offsets = [0, 96], sizes = [4, 32], strides = [1, 1]} : vector<4x128xf32> to vector<4x32xf32>
    %597 = arith.mulf %594, %579 : vector<4x32xf32>
    %598 = arith.mulf %593, %595 : vector<4x32xf32>
    %599 = arith.addf %597, %598 : vector<4x32xf32>
    %600 = math.tanh %599 : vector<4x32xf32>
    %601 = arith.mulf %596, %600 : vector<4x32xf32>
    %602 = vector.broadcast %c3_i32_238 : i32 to vector<4x1xi32>
    %603 = arith.cmpi sgt, %0, %602 : vector<4x1xi32>
    %604 = arith.extui %603 : vector<4x1xi1> to vector<4x1xi32>
    %605 = arith.sitofp %604 : vector<4x1xi32> to vector<4x1xf32>
    %606 = vector.broadcast %605 : vector<4x1xf32> to vector<4x32xf32>
    %607 = arith.mulf %606, %601 : vector<4x32xf32>
    %cst_249 = arith.constant 1.000000e+00 : f32
    %608 = vector.broadcast %cst_249 : f32 to vector<4x1xf32>
    %609 = arith.subf %608, %605 : vector<4x1xf32>
    %610 = vector.broadcast %609 : vector<4x1xf32> to vector<4x32xf32>
    %611 = arith.mulf %610, %578 : vector<4x32xf32>
    %612 = arith.addf %607, %611 : vector<4x32xf32>
    %c0_250 = arith.constant 0 : index
    %c0_251 = arith.constant 0 : index
    %613 = vector.load %arg13[%c0_250, %c0_251] : memref<4x32xf32, #tpu.memory_space<vmem>>, vector<4x32xf32>
    tpu.vector_store %arg13[%c0_250, %c0_251], %612 {strides = array<i32>} : memref<4x32xf32, #tpu.memory_space<vmem>>, vector<4x32xf32>,
    %614 = vector.broadcast %605 : vector<4x1xf32> to vector<4x32xf32>
    %615 = arith.mulf %614, %599 : vector<4x32xf32>
    %cst_252 = arith.constant 1.000000e+00 : f32
    %616 = vector.broadcast %cst_252 : f32 to vector<4x1xf32>
    %617 = arith.subf %616, %605 : vector<4x1xf32>
    %618 = vector.broadcast %617 : vector<4x1xf32> to vector<4x32xf32>
    %619 = arith.mulf %618, %579 : vector<4x32xf32>
    %620 = arith.addf %615, %619 : vector<4x32xf32>
    %c0_253 = arith.constant 0 : index
    %c0_254 = arith.constant 0 : index
    %621 = vector.load %arg14[%c0_253, %c0_254] : memref<4x32xf32, #tpu.memory_space<vmem>>, vector<4x32xf32>
    tpu.vector_store %arg14[%c0_253, %c0_254], %620 {strides = array<i32>} : memref<4x32xf32, #tpu.memory_space<vmem>>, vector<4x32xf32>,
    %622 = vector.broadcast %605 : vector<4x1xf32> to vector<4x32xf32>
    %623 = arith.mulf %622, %601 : vector<4x32xf32>
    %624 = arith.index_cast %c3_i32_238 : i32 to index
    %c0_255 = arith.constant 0 : index
    %c0_256 = arith.constant 0 : index
    %625 = vector.load %arg12[%624, %c0_255, %c0_256] : memref<8x4x32xf32, #tpu.memory_space<vmem>>, vector<1x4x32xf32>
    %626 = vector.shape_cast %625 : vector<1x4x32xf32> to vector<4x32xf32>
    %627 = vector.shape_cast %623 : vector<4x32xf32> to vector<1x4x32xf32>
    tpu.vector_store %arg12[%624, %c0_255, %c0_256], %627 {strides = array<i32>} : memref<8x4x32xf32, #tpu.memory_space<vmem>>, vector<1x4x32xf32>,
    %c4_i32_257 = arith.constant 4 : i32
    %c0_258 = arith.constant 0 : index
    %c0_259 = arith.constant 0 : index
    %628 = vector.load %arg13[%c0_258, %c0_259] : memref<4x32xf32, #tpu.memory_space<vmem>>, vector<4x32xf32>
    %c0_260 = arith.constant 0 : index
    %c0_261 = arith.constant 0 : index
    %629 = vector.load %arg14[%c0_260, %c0_261] : memref<4x32xf32, #tpu.memory_space<vmem>>, vector<4x32xf32>
    %630 = arith.index_cast %c4_i32_257 : i32 to index
    %c0_262 = arith.constant 0 : index
    %c0_263 = arith.constant 0 : index
    %631 = vector.load %arg11[%630, %c0_262, %c0_263] : memref<8x4x128xf32, #tpu.memory_space<vmem>>, vector<1x4x128xf32>
    %632 = vector.shape_cast %631 : vector<1x4x128xf32> to vector<4x128xf32>
    %cst_264 = arith.constant dense<0.000000e+00> : vector<4x128xf32>
    %633 = tpu.matmul %628, %417, %cst_264 {dimension_numbers = #tpu.dot_dimension_numbers<[1], [0], [0], [1], [0, 0, 1, 1], [], []>} : vector<4x32xf32>, vector<32x128xf32>, vector<4x128xf32> -> vector<4x128xf32>
    %634 = arith.addf %632, %633 : vector<4x128xf32>
    %cst_265 = arith.constant 5.000000e-01 : f32
    %635 = vector.broadcast %cst_265 : f32 to vector<4x128xf32>
    %636 = arith.mulf %635, %634 : vector<4x128xf32>
    %637 = math.tanh %636 : vector<4x128xf32>
    %cst_266 = arith.constant 1.000000e+00 : f32
    %638 = vector.broadcast %cst_266 : f32 to vector<4x128xf32>
    %639 = arith.addf %637, %638 : vector<4x128xf32>
    %cst_267 = arith.constant 5.000000e-01 : f32
    %640 = vector.broadcast %cst_267 : f32 to vector<4x128xf32>
    %641 = arith.mulf %640, %639 : vector<4x128xf32>
    %642 = math.tanh %634 : vector<4x128xf32>
    %643 = vector.extract_strided_slice %641 {offsets = [0, 0], sizes = [4, 32], strides = [1, 1]} : vector<4x128xf32> to vector<4x32xf32>
    %644 = vector.extract_strided_slice %641 {offsets = [0, 32], sizes = [4, 32], strides = [1, 1]} : vector<4x128xf32> to vector<4x32xf32>
    %645 = vector.extract_strided_slice %642 {offsets = [0, 64], sizes = [4, 32], strides = [1, 1]} : vector<4x128xf32> to vector<4x32xf32>
    %646 = vector.extract_strided_slice %641 {offsets = [0, 96], sizes = [4, 32], strides = [1, 1]} : vector<4x128xf32> to vector<4x32xf32>
    %647 = arith.mulf %644, %629 : vector<4x32xf32>
    %648 = arith.mulf %643, %645 : vector<4x32xf32>
    %649 = arith.addf %647, %648 : vector<4x32xf32>
    %650 = math.tanh %649 : vector<4x32xf32>
    %651 = arith.mulf %646, %650 : vector<4x32xf32>
    %652 = vector.broadcast %c4_i32_257 : i32 to vector<4x1xi32>
    %653 = arith.cmpi sgt, %0, %652 : vector<4x1xi32>
    %654 = arith.extui %653 : vector<4x1xi1> to vector<4x1xi32>
    %655 = arith.sitofp %654 : vector<4x1xi32> to vector<4x1xf32>
    %656 = vector.broadcast %655 : vector<4x1xf32> to vector<4x32xf32>
    %657 = arith.mulf %656, %651 : vector<4x32xf32>
    %cst_268 = arith.constant 1.000000e+00 : f32
    %658 = vector.broadcast %cst_268 : f32 to vector<4x1xf32>
    %659 = arith.subf %658, %655 : vector<4x1xf32>
    %660 = vector.broadcast %659 : vector<4x1xf32> to vector<4x32xf32>
    %661 = arith.mulf %660, %628 : vector<4x32xf32>
    %662 = arith.addf %657, %661 : vector<4x32xf32>
    %c0_269 = arith.constant 0 : index
    %c0_270 = arith.constant 0 : index
    %663 = vector.load %arg13[%c0_269, %c0_270] : memref<4x32xf32, #tpu.memory_space<vmem>>, vector<4x32xf32>
    tpu.vector_store %arg13[%c0_269, %c0_270], %662 {strides = array<i32>} : memref<4x32xf32, #tpu.memory_space<vmem>>, vector<4x32xf32>,
    %664 = vector.broadcast %655 : vector<4x1xf32> to vector<4x32xf32>
    %665 = arith.mulf %664, %649 : vector<4x32xf32>
    %cst_271 = arith.constant 1.000000e+00 : f32
    %666 = vector.broadcast %cst_271 : f32 to vector<4x1xf32>
    %667 = arith.subf %666, %655 : vector<4x1xf32>
    %668 = vector.broadcast %667 : vector<4x1xf32> to vector<4x32xf32>
    %669 = arith.mulf %668, %629 : vector<4x32xf32>
    %670 = arith.addf %665, %669 : vector<4x32xf32>
    %c0_272 = arith.constant 0 : index
    %c0_273 = arith.constant 0 : index
    %671 = vector.load %arg14[%c0_272, %c0_273] : memref<4x32xf32, #tpu.memory_space<vmem>>, vector<4x32xf32>
    tpu.vector_store %arg14[%c0_272, %c0_273], %670 {strides = array<i32>} : memref<4x32xf32, #tpu.memory_space<vmem>>, vector<4x32xf32>,
    %672 = vector.broadcast %655 : vector<4x1xf32> to vector<4x32xf32>
    %673 = arith.mulf %672, %651 : vector<4x32xf32>
    %674 = arith.index_cast %c4_i32_257 : i32 to index
    %c0_274 = arith.constant 0 : index
    %c0_275 = arith.constant 0 : index
    %675 = vector.load %arg12[%674, %c0_274, %c0_275] : memref<8x4x32xf32, #tpu.memory_space<vmem>>, vector<1x4x32xf32>
    %676 = vector.shape_cast %675 : vector<1x4x32xf32> to vector<4x32xf32>
    %677 = vector.shape_cast %673 : vector<4x32xf32> to vector<1x4x32xf32>
    tpu.vector_store %arg12[%674, %c0_274, %c0_275], %677 {strides = array<i32>} : memref<8x4x32xf32, #tpu.memory_space<vmem>>, vector<1x4x32xf32>,
    %c5_i32_276 = arith.constant 5 : i32
    %c0_277 = arith.constant 0 : index
    %c0_278 = arith.constant 0 : index
    %678 = vector.load %arg13[%c0_277, %c0_278] : memref<4x32xf32, #tpu.memory_space<vmem>>, vector<4x32xf32>
    %c0_279 = arith.constant 0 : index
    %c0_280 = arith.constant 0 : index
    %679 = vector.load %arg14[%c0_279, %c0_280] : memref<4x32xf32, #tpu.memory_space<vmem>>, vector<4x32xf32>
    %680 = arith.index_cast %c5_i32_276 : i32 to index
    %c0_281 = arith.constant 0 : index
    %c0_282 = arith.constant 0 : index
    %681 = vector.load %arg11[%680, %c0_281, %c0_282] : memref<8x4x128xf32, #tpu.memory_space<vmem>>, vector<1x4x128xf32>
    %682 = vector.shape_cast %681 : vector<1x4x128xf32> to vector<4x128xf32>
    %cst_283 = arith.constant dense<0.000000e+00> : vector<4x128xf32>
    %683 = tpu.matmul %678, %417, %cst_283 {dimension_numbers = #tpu.dot_dimension_numbers<[1], [0], [0], [1], [0, 0, 1, 1], [], []>} : vector<4x32xf32>, vector<32x128xf32>, vector<4x128xf32> -> vector<4x128xf32>
    %684 = arith.addf %682, %683 : vector<4x128xf32>
    %cst_284 = arith.constant 5.000000e-01 : f32
    %685 = vector.broadcast %cst_284 : f32 to vector<4x128xf32>
    %686 = arith.mulf %685, %684 : vector<4x128xf32>
    %687 = math.tanh %686 : vector<4x128xf32>
    %cst_285 = arith.constant 1.000000e+00 : f32
    %688 = vector.broadcast %cst_285 : f32 to vector<4x128xf32>
    %689 = arith.addf %687, %688 : vector<4x128xf32>
    %cst_286 = arith.constant 5.000000e-01 : f32
    %690 = vector.broadcast %cst_286 : f32 to vector<4x128xf32>
    %691 = arith.mulf %690, %689 : vector<4x128xf32>
    %692 = math.tanh %684 : vector<4x128xf32>
    %693 = vector.extract_strided_slice %691 {offsets = [0, 0], sizes = [4, 32], strides = [1, 1]} : vector<4x128xf32> to vector<4x32xf32>
    %694 = vector.extract_strided_slice %691 {offsets = [0, 32], sizes = [4, 32], strides = [1, 1]} : vector<4x128xf32> to vector<4x32xf32>
    %695 = vector.extract_strided_slice %692 {offsets = [0, 64], sizes = [4, 32], strides = [1, 1]} : vector<4x128xf32> to vector<4x32xf32>
    %696 = vector.extract_strided_slice %691 {offsets = [0, 96], sizes = [4, 32], strides = [1, 1]} : vector<4x128xf32> to vector<4x32xf32>
    %697 = arith.mulf %694, %679 : vector<4x32xf32>
    %698 = arith.mulf %693, %695 : vector<4x32xf32>
    %699 = arith.addf %697, %698 : vector<4x32xf32>
    %700 = math.tanh %699 : vector<4x32xf32>
    %701 = arith.mulf %696, %700 : vector<4x32xf32>
    %702 = vector.broadcast %c5_i32_276 : i32 to vector<4x1xi32>
    %703 = arith.cmpi sgt, %0, %702 : vector<4x1xi32>
    %704 = arith.extui %703 : vector<4x1xi1> to vector<4x1xi32>
    %705 = arith.sitofp %704 : vector<4x1xi32> to vector<4x1xf32>
    %706 = vector.broadcast %705 : vector<4x1xf32> to vector<4x32xf32>
    %707 = arith.mulf %706, %701 : vector<4x32xf32>
    %cst_287 = arith.constant 1.000000e+00 : f32
    %708 = vector.broadcast %cst_287 : f32 to vector<4x1xf32>
    %709 = arith.subf %708, %705 : vector<4x1xf32>
    %710 = vector.broadcast %709 : vector<4x1xf32> to vector<4x32xf32>
    %711 = arith.mulf %710, %678 : vector<4x32xf32>
    %712 = arith.addf %707, %711 : vector<4x32xf32>
    %c0_288 = arith.constant 0 : index
    %c0_289 = arith.constant 0 : index
    %713 = vector.load %arg13[%c0_288, %c0_289] : memref<4x32xf32, #tpu.memory_space<vmem>>, vector<4x32xf32>
    tpu.vector_store %arg13[%c0_288, %c0_289], %712 {strides = array<i32>} : memref<4x32xf32, #tpu.memory_space<vmem>>, vector<4x32xf32>,
    %714 = vector.broadcast %705 : vector<4x1xf32> to vector<4x32xf32>
    %715 = arith.mulf %714, %699 : vector<4x32xf32>
    %cst_290 = arith.constant 1.000000e+00 : f32
    %716 = vector.broadcast %cst_290 : f32 to vector<4x1xf32>
    %717 = arith.subf %716, %705 : vector<4x1xf32>
    %718 = vector.broadcast %717 : vector<4x1xf32> to vector<4x32xf32>
    %719 = arith.mulf %718, %679 : vector<4x32xf32>
    %720 = arith.addf %715, %719 : vector<4x32xf32>
    %c0_291 = arith.constant 0 : index
    %c0_292 = arith.constant 0 : index
    %721 = vector.load %arg14[%c0_291, %c0_292] : memref<4x32xf32, #tpu.memory_space<vmem>>, vector<4x32xf32>
    tpu.vector_store %arg14[%c0_291, %c0_292], %720 {strides = array<i32>} : memref<4x32xf32, #tpu.memory_space<vmem>>, vector<4x32xf32>,
    %722 = vector.broadcast %705 : vector<4x1xf32> to vector<4x32xf32>
    %723 = arith.mulf %722, %701 : vector<4x32xf32>
    %724 = arith.index_cast %c5_i32_276 : i32 to index
    %c0_293 = arith.constant 0 : index
    %c0_294 = arith.constant 0 : index
    %725 = vector.load %arg12[%724, %c0_293, %c0_294] : memref<8x4x32xf32, #tpu.memory_space<vmem>>, vector<1x4x32xf32>
    %726 = vector.shape_cast %725 : vector<1x4x32xf32> to vector<4x32xf32>
    %727 = vector.shape_cast %723 : vector<4x32xf32> to vector<1x4x32xf32>
    tpu.vector_store %arg12[%724, %c0_293, %c0_294], %727 {strides = array<i32>} : memref<8x4x32xf32, #tpu.memory_space<vmem>>, vector<1x4x32xf32>,
    %c6_i32_295 = arith.constant 6 : i32
    %c0_296 = arith.constant 0 : index
    %c0_297 = arith.constant 0 : index
    %728 = vector.load %arg13[%c0_296, %c0_297] : memref<4x32xf32, #tpu.memory_space<vmem>>, vector<4x32xf32>
    %c0_298 = arith.constant 0 : index
    %c0_299 = arith.constant 0 : index
    %729 = vector.load %arg14[%c0_298, %c0_299] : memref<4x32xf32, #tpu.memory_space<vmem>>, vector<4x32xf32>
    %730 = arith.index_cast %c6_i32_295 : i32 to index
    %c0_300 = arith.constant 0 : index
    %c0_301 = arith.constant 0 : index
    %731 = vector.load %arg11[%730, %c0_300, %c0_301] : memref<8x4x128xf32, #tpu.memory_space<vmem>>, vector<1x4x128xf32>
    %732 = vector.shape_cast %731 : vector<1x4x128xf32> to vector<4x128xf32>
    %cst_302 = arith.constant dense<0.000000e+00> : vector<4x128xf32>
    %733 = tpu.matmul %728, %417, %cst_302 {dimension_numbers = #tpu.dot_dimension_numbers<[1], [0], [0], [1], [0, 0, 1, 1], [], []>} : vector<4x32xf32>, vector<32x128xf32>, vector<4x128xf32> -> vector<4x128xf32>
    %734 = arith.addf %732, %733 : vector<4x128xf32>
    %cst_303 = arith.constant 5.000000e-01 : f32
    %735 = vector.broadcast %cst_303 : f32 to vector<4x128xf32>
    %736 = arith.mulf %735, %734 : vector<4x128xf32>
    %737 = math.tanh %736 : vector<4x128xf32>
    %cst_304 = arith.constant 1.000000e+00 : f32
    %738 = vector.broadcast %cst_304 : f32 to vector<4x128xf32>
    %739 = arith.addf %737, %738 : vector<4x128xf32>
    %cst_305 = arith.constant 5.000000e-01 : f32
    %740 = vector.broadcast %cst_305 : f32 to vector<4x128xf32>
    %741 = arith.mulf %740, %739 : vector<4x128xf32>
    %742 = math.tanh %734 : vector<4x128xf32>
    %743 = vector.extract_strided_slice %741 {offsets = [0, 0], sizes = [4, 32], strides = [1, 1]} : vector<4x128xf32> to vector<4x32xf32>
    %744 = vector.extract_strided_slice %741 {offsets = [0, 32], sizes = [4, 32], strides = [1, 1]} : vector<4x128xf32> to vector<4x32xf32>
    %745 = vector.extract_strided_slice %742 {offsets = [0, 64], sizes = [4, 32], strides = [1, 1]} : vector<4x128xf32> to vector<4x32xf32>
    %746 = vector.extract_strided_slice %741 {offsets = [0, 96], sizes = [4, 32], strides = [1, 1]} : vector<4x128xf32> to vector<4x32xf32>
    %747 = arith.mulf %744, %729 : vector<4x32xf32>
    %748 = arith.mulf %743, %745 : vector<4x32xf32>
    %749 = arith.addf %747, %748 : vector<4x32xf32>
    %750 = math.tanh %749 : vector<4x32xf32>
    %751 = arith.mulf %746, %750 : vector<4x32xf32>
    %752 = vector.broadcast %c6_i32_295 : i32 to vector<4x1xi32>
    %753 = arith.cmpi sgt, %0, %752 : vector<4x1xi32>
    %754 = arith.extui %753 : vector<4x1xi1> to vector<4x1xi32>
    %755 = arith.sitofp %754 : vector<4x1xi32> to vector<4x1xf32>
    %756 = vector.broadcast %755 : vector<4x1xf32> to vector<4x32xf32>
    %757 = arith.mulf %756, %751 : vector<4x32xf32>
    %cst_306 = arith.constant 1.000000e+00 : f32
    %758 = vector.broadcast %cst_306 : f32 to vector<4x1xf32>
    %759 = arith.subf %758, %755 : vector<4x1xf32>
    %760 = vector.broadcast %759 : vector<4x1xf32> to vector<4x32xf32>
    %761 = arith.mulf %760, %728 : vector<4x32xf32>
    %762 = arith.addf %757, %761 : vector<4x32xf32>
    %c0_307 = arith.constant 0 : index
    %c0_308 = arith.constant 0 : index
    %763 = vector.load %arg13[%c0_307, %c0_308] : memref<4x32xf32, #tpu.memory_space<vmem>>, vector<4x32xf32>
    tpu.vector_store %arg13[%c0_307, %c0_308], %762 {strides = array<i32>} : memref<4x32xf32, #tpu.memory_space<vmem>>, vector<4x32xf32>,
    %764 = vector.broadcast %755 : vector<4x1xf32> to vector<4x32xf32>
    %765 = arith.mulf %764, %749 : vector<4x32xf32>
    %cst_309 = arith.constant 1.000000e+00 : f32
    %766 = vector.broadcast %cst_309 : f32 to vector<4x1xf32>
    %767 = arith.subf %766, %755 : vector<4x1xf32>
    %768 = vector.broadcast %767 : vector<4x1xf32> to vector<4x32xf32>
    %769 = arith.mulf %768, %729 : vector<4x32xf32>
    %770 = arith.addf %765, %769 : vector<4x32xf32>
    %c0_310 = arith.constant 0 : index
    %c0_311 = arith.constant 0 : index
    %771 = vector.load %arg14[%c0_310, %c0_311] : memref<4x32xf32, #tpu.memory_space<vmem>>, vector<4x32xf32>
    tpu.vector_store %arg14[%c0_310, %c0_311], %770 {strides = array<i32>} : memref<4x32xf32, #tpu.memory_space<vmem>>, vector<4x32xf32>,
    %772 = vector.broadcast %755 : vector<4x1xf32> to vector<4x32xf32>
    %773 = arith.mulf %772, %751 : vector<4x32xf32>
    %774 = arith.index_cast %c6_i32_295 : i32 to index
    %c0_312 = arith.constant 0 : index
    %c0_313 = arith.constant 0 : index
    %775 = vector.load %arg12[%774, %c0_312, %c0_313] : memref<8x4x32xf32, #tpu.memory_space<vmem>>, vector<1x4x32xf32>
    %776 = vector.shape_cast %775 : vector<1x4x32xf32> to vector<4x32xf32>
    %777 = vector.shape_cast %773 : vector<4x32xf32> to vector<1x4x32xf32>
    tpu.vector_store %arg12[%774, %c0_312, %c0_313], %777 {strides = array<i32>} : memref<8x4x32xf32, #tpu.memory_space<vmem>>, vector<1x4x32xf32>,
    %c7_i32_314 = arith.constant 7 : i32
    %c0_315 = arith.constant 0 : index
    %c0_316 = arith.constant 0 : index
    %778 = vector.load %arg13[%c0_315, %c0_316] : memref<4x32xf32, #tpu.memory_space<vmem>>, vector<4x32xf32>
    %c0_317 = arith.constant 0 : index
    %c0_318 = arith.constant 0 : index
    %779 = vector.load %arg14[%c0_317, %c0_318] : memref<4x32xf32, #tpu.memory_space<vmem>>, vector<4x32xf32>
    %780 = arith.index_cast %c7_i32_314 : i32 to index
    %c0_319 = arith.constant 0 : index
    %c0_320 = arith.constant 0 : index
    %781 = vector.load %arg11[%780, %c0_319, %c0_320] : memref<8x4x128xf32, #tpu.memory_space<vmem>>, vector<1x4x128xf32>
    %782 = vector.shape_cast %781 : vector<1x4x128xf32> to vector<4x128xf32>
    %cst_321 = arith.constant dense<0.000000e+00> : vector<4x128xf32>
    %783 = tpu.matmul %778, %417, %cst_321 {dimension_numbers = #tpu.dot_dimension_numbers<[1], [0], [0], [1], [0, 0, 1, 1], [], []>} : vector<4x32xf32>, vector<32x128xf32>, vector<4x128xf32> -> vector<4x128xf32>
    %784 = arith.addf %782, %783 : vector<4x128xf32>
    %cst_322 = arith.constant 5.000000e-01 : f32
    %785 = vector.broadcast %cst_322 : f32 to vector<4x128xf32>
    %786 = arith.mulf %785, %784 : vector<4x128xf32>
    %787 = math.tanh %786 : vector<4x128xf32>
    %cst_323 = arith.constant 1.000000e+00 : f32
    %788 = vector.broadcast %cst_323 : f32 to vector<4x128xf32>
    %789 = arith.addf %787, %788 : vector<4x128xf32>
    %cst_324 = arith.constant 5.000000e-01 : f32
    %790 = vector.broadcast %cst_324 : f32 to vector<4x128xf32>
    %791 = arith.mulf %790, %789 : vector<4x128xf32>
    %792 = math.tanh %784 : vector<4x128xf32>
    %793 = vector.extract_strided_slice %791 {offsets = [0, 0], sizes = [4, 32], strides = [1, 1]} : vector<4x128xf32> to vector<4x32xf32>
    %794 = vector.extract_strided_slice %791 {offsets = [0, 32], sizes = [4, 32], strides = [1, 1]} : vector<4x128xf32> to vector<4x32xf32>
    %795 = vector.extract_strided_slice %792 {offsets = [0, 64], sizes = [4, 32], strides = [1, 1]} : vector<4x128xf32> to vector<4x32xf32>
    %796 = vector.extract_strided_slice %791 {offsets = [0, 96], sizes = [4, 32], strides = [1, 1]} : vector<4x128xf32> to vector<4x32xf32>
    %797 = arith.mulf %794, %779 : vector<4x32xf32>
    %798 = arith.mulf %793, %795 : vector<4x32xf32>
    %799 = arith.addf %797, %798 : vector<4x32xf32>
    %800 = math.tanh %799 : vector<4x32xf32>
    %801 = arith.mulf %796, %800 : vector<4x32xf32>
    %802 = vector.broadcast %c7_i32_314 : i32 to vector<4x1xi32>
    %803 = arith.cmpi sgt, %0, %802 : vector<4x1xi32>
    %804 = arith.extui %803 : vector<4x1xi1> to vector<4x1xi32>
    %805 = arith.sitofp %804 : vector<4x1xi32> to vector<4x1xf32>
    %806 = vector.broadcast %805 : vector<4x1xf32> to vector<4x32xf32>
    %807 = arith.mulf %806, %801 : vector<4x32xf32>
    %cst_325 = arith.constant 1.000000e+00 : f32
    %808 = vector.broadcast %cst_325 : f32 to vector<4x1xf32>
    %809 = arith.subf %808, %805 : vector<4x1xf32>
    %810 = vector.broadcast %809 : vector<4x1xf32> to vector<4x32xf32>
    %811 = arith.mulf %810, %778 : vector<4x32xf32>
    %812 = arith.addf %807, %811 : vector<4x32xf32>
    %c0_326 = arith.constant 0 : index
    %c0_327 = arith.constant 0 : index
    %813 = vector.load %arg13[%c0_326, %c0_327] : memref<4x32xf32, #tpu.memory_space<vmem>>, vector<4x32xf32>
    tpu.vector_store %arg13[%c0_326, %c0_327], %812 {strides = array<i32>} : memref<4x32xf32, #tpu.memory_space<vmem>>, vector<4x32xf32>,
    %814 = vector.broadcast %805 : vector<4x1xf32> to vector<4x32xf32>
    %815 = arith.mulf %814, %799 : vector<4x32xf32>
    %cst_328 = arith.constant 1.000000e+00 : f32
    %816 = vector.broadcast %cst_328 : f32 to vector<4x1xf32>
    %817 = arith.subf %816, %805 : vector<4x1xf32>
    %818 = vector.broadcast %817 : vector<4x1xf32> to vector<4x32xf32>
    %819 = arith.mulf %818, %779 : vector<4x32xf32>
    %820 = arith.addf %815, %819 : vector<4x32xf32>
    %c0_329 = arith.constant 0 : index
    %c0_330 = arith.constant 0 : index
    %821 = vector.load %arg14[%c0_329, %c0_330] : memref<4x32xf32, #tpu.memory_space<vmem>>, vector<4x32xf32>
    tpu.vector_store %arg14[%c0_329, %c0_330], %820 {strides = array<i32>} : memref<4x32xf32, #tpu.memory_space<vmem>>, vector<4x32xf32>,
    %822 = vector.broadcast %805 : vector<4x1xf32> to vector<4x32xf32>
    %823 = arith.mulf %822, %801 : vector<4x32xf32>
    %824 = arith.index_cast %c7_i32_314 : i32 to index
    %c0_331 = arith.constant 0 : index
    %c0_332 = arith.constant 0 : index
    %825 = vector.load %arg12[%824, %c0_331, %c0_332] : memref<8x4x32xf32, #tpu.memory_space<vmem>>, vector<1x4x32xf32>
    %826 = vector.shape_cast %825 : vector<1x4x32xf32> to vector<4x32xf32>
    %827 = vector.shape_cast %823 : vector<4x32xf32> to vector<1x4x32xf32>
    tpu.vector_store %arg12[%824, %c0_331, %c0_332], %827 {strides = array<i32>} : memref<8x4x32xf32, #tpu.memory_space<vmem>>, vector<1x4x32xf32>,
    %c8_i32_333 = arith.constant 8 : i32
    %c0_334 = arith.constant 0 : index
    %c0_335 = arith.constant 0 : index
    %c0_336 = arith.constant 0 : index
    %828 = vector.load %arg12[%c0_334, %c0_335, %c0_336] : memref<8x4x32xf32, #tpu.memory_space<vmem>>, vector<8x4x32xf32>
    %829 = vector.shape_cast %828 : vector<8x4x32xf32> to vector<32x32xf32>
    %c0_337 = arith.constant 0 : index
    %c0_338 = arith.constant 0 : index
    %830 = vector.load %arg8[%c0_337, %c0_338] : memref<32x1xf32, #tpu.memory_space<vmem>>, vector<32x1xf32>
    %cst_339 = arith.constant dense<0.000000e+00> : vector<32x1xf32>
    %831 = tpu.matmul %829, %830, %cst_339 {dimension_numbers = #tpu.dot_dimension_numbers<[1], [0], [0], [1], [0, 0, 1, 1], [], []>} : vector<32x32xf32>, vector<32x1xf32>, vector<32x1xf32> -> vector<32x1xf32>
    %c0_340 = arith.constant 0 : index
    %c0_341 = arith.constant 0 : index
    %832 = vector.load %arg9[%c0_340, %c0_341] : memref<1x1xf32, #tpu.memory_space<vmem>>, vector<1x1xf32>
    %833 = vector.broadcast %832 : vector<1x1xf32> to vector<32x1xf32>
    %834 = arith.addf %831, %833 : vector<32x1xf32>
    %c0_342 = arith.constant 0 : index
    %c0_343 = arith.constant 0 : index
    %835 = vector.load %arg10[%c0_342, %c0_343] : memref<32x1xf32, #tpu.memory_space<vmem>>, vector<32x1xf32>
    tpu.vector_store %arg10[%c0_342, %c0_343], %834 {strides = array<i32>} : memref<32x1xf32, #tpu.memory_space<vmem>>, vector<32x1xf32>,
    return
  }
}

</mosaic_0001>

<bundles_post_ra>
// kernel: tpu_custom_call.1
= control target key start
LH: loop header
LB: loop body
LE: loop exit
PB: predicated region body
PF: predicated region fallthrough
CT: control target
= control target key end

     0   :  { %s3977_s0 = inlined_call_operand.vmem [shape: f32[32,16], index: 0, kind: input, shape index: {}]   ;;  %s3978_s1 = inlined_call_operand.vmem [shape: s32[4,1], index: 1, kind: input, shape index: {}]   ;;  %s3979_s2 = inlined_call_operand.hbm [shape: f32[16,128], index: 2, kind: input, shape index: {}]   ;;  %s3980_s3 = inlined_call_operand.vmem [shape: f32[32,128], index: 3, kind: input, shape index: {}]   ;;  %s3981_s4 = inlined_call_operand.hbm [shape: f32[1,128], index: 4, kind: input, shape index: {}]   ;;  %s3982_s5 = inlined_call_operand.vmem [shape: f32[32,128], index: 5, kind: input, shape index: {}]   ;;  %s3983_s6 = inlined_call_operand.vmem [shape: f32[32,128], index: 6, kind: input, shape index: {}]   ;;  %s3984_s7 = inlined_call_operand.vmem [shape: f32[1,128], index: 7, kind: input, shape index: {}]   ;;  %s3985_s8 = inlined_call_operand.vmem [shape: f32[32,1], index: 8, kind: input, shape index: {}]   ;;  %s3986_s9 = inlined_call_operand.<no memory space> [shape: f32[1,1], index: 9, kind: input, shape index: {}]   ;;  %s3987_s10 = inlined_call_operand.vmem [shape: f32[32,1], index: 10, kind: output, shape index: {}]  }
   0x1   :  { %v15_v0 = vstv %s3986_s9 }
   0x2   :  { %16 = vst [vmem:[#allocation6] sm:$0x1] %v15_v0 }
   0x3   :  { %17 = vsyncpa [#allocation8], 0 }
   0x4   :  { %18 = vsyncpa [#allocation10], 0  ;;  %s3241_s15 = smov [#allocation7]  }
   0x5   :  { %s28_s16 = sshll.u32 %s3241_s15, 4  ;;  %s29_s16 = int_to_ptr.vmem [resolvable:$true] %s28_s16 }
   0x6   :  { %s3205_s17 = scalar_lea.vmem %s29_s16, 256  ;;  %p3210_p1 = scmp.lt.s32.totalorder %s29_s16, %s29_s16 }
   0x7   :  { %p3206_p0 = scmp.ne.s32.totalorder %s29_s16, %s3205_s17  ;;  %p3211_p2 = scmp.lt.s32.totalorder %s3205_s17, %s3205_s17 }
   0x9   :  { %p3212_p3 = por %p3211_p2, %p3210_p1 }
   0xb   :  { %p3213_p4 = pnand %p3212_p3, %p3206_p0 }
   0xd   :  { %3216 = shalt.err (!%p3213_p4)
}
   0xe   :  { %s3242_s18 = smov 128   ;;  %s3243_s19 = smov 8  }
   0xf   :  { %34 = dma.hbm_to_vmem [thread:$0]  %s3979_s2, 256, %s29_s16, [#allocation8], %s3242_s18, %s3242_s18, %s3243_s19  }
  0x10   :  { %s3244_s9 = smov [#allocation9]  }
  0x11   :  { %s43_s22 = sshll.u32 %s3244_s9, 4  ;;  %s44_s22 = int_to_ptr.vmem [resolvable:$true] %s43_s22 }
  0x12   :  { %s3225_s23 = scalar_lea.vmem %s44_s22, 16  ;;  %s3229_s24 = scalar_lea.vmem %s44_s22, 32 }
  0x13   :  { %p3226_p5 = scmp.ne.s32.totalorder %s44_s22, %s3225_s23  ;;  %p3230_p6 = scmp.lt.s32.totalorder %s44_s22, %s44_s22 }
  0x14   :  { %p3231_p7 = scmp.lt.s32.totalorder %s3229_s24, %s3225_s23 }
  0x16   :  { %p3232_p8 = por %p3231_p7, %p3230_p6 }
  0x18   :  { %p3233_p9 = pnand %p3232_p8, %p3226_p5 }
  0x1a   :  { %3236 = shalt.err (!%p3233_p9)
}
  0x1b   :  { %46 = dma.hbm_to_vmem [thread:$0]  %s3981_s4, 16, %s44_s22, [#allocation10]  }
  0x1c   :  { %3237 = dma.done.wait [#allocation8], 256  }
  0x1d   :  { %3238 = vsyncadd [#allocation8], 4294967040 }
  0x1e   :  { %3239 = dma.done.wait [#allocation10], 16  }
  0x1f   :  { %3240 = vsyncadd [#allocation10], 4294967280  ;;  %vm199_vm0 = vcmask 257024   ;;  %v3245_v1 = vmov 0.0   ;;  %vm3246_vm1 = vmmov 0   ;;  %vm81_vm2 = vcmask 130048  }
  0x20   :  { %200 = vst.msk [vmem:[#allocation4] sm:$0xf] %vm199_vm0, %v3245_v1  ;;  %201 = vst.msk [vmem:[#allocation5] sm:$0xf] %vm199_vm0, %v3245_v1  ;;  %2888 = vmatprep.subr.mxu0 %v3245_v1  ;;  %2896 = vmatprep.mubr.msk.f32.mxu0 %vm3246_vm1, %v3245_v1  ;;  %v69_v2 = vld [vmem:[#allocation7 + $0x8] sm:$0xff]  ;;  %v68_v3 = vld [vmem:[#allocation7] sm:$0xff] }
  0x21   :  { %v64_v4 = vld [vmem:[%s3977_s0] sm:$0xff]  ;;  %2867 = vmatprep.subr.mxu1 %v69_v2  ;;  %v3329_v5 = vld [vmem:[%s3980_s3 + $0x18] sm:$0xff]  ;;  %v65_v6 = vld [vmem:[%s3977_s0 + $0x8] sm:$0xff]  ;;  %vm205_vm3 = vcmask 261120   ;;  %v3247_v13 = vmov 0   ;;  %s3248_s21 = smov 64  }
  0x22   :  { %2871 = vmatprep.mubr.msk.f32.mxu1 %vm81_vm2, %v64_v4  ;;  %2868 = vmatpush3.msra.mxu1 %v69_v2  ;;  %v66_v7 = vld [vmem:[%s3977_s0 + $0x10] sm:$0xff]  ;;  %v67_v9 = vld [vmem:[%s3977_s0 + $0x18] sm:$0xff]  ;;  %v3356_v10 = vld [vmem:[%s3980_s3 + $0x8] sm:$0xff]  ;;  %s3249_s9 = smov 32   ;;  %vm2715_vm12 = vcmask 7168  }
  0x23   :  { %2889 = vmatpush3.msra.mxu0 %v3329_v5  ;;  %2869 = vmatprep.subr.mxu1 %v68_v3  ;;  %v3341_v8 = vld [vmem:[%s3980_s3 + $0x10] sm:$0xff]  ;;  %v3366_v11 = vld [vmem:[%s3980_s3] sm:$0xff]  ;;  %v2726_v14 = vld [vmem:[#allocation9] ss:$0 sm:$0xff] }
  0x24   :  { %2890 = vmatprep.subr.mxu0 %v3245_v1  ;;  %2870 = vmatpush3.msra.mxu1 %v68_v3  ;;  %v3394_v32 = vld [vmem:[%s3978_s1] sm:$0xf]  ;;  %s3250_s1 = smov 96  }
  0x25   :  { %2891 = vmatpush3.msra.mxu0 %v3341_v8  ;;  %2872 = vmatmul.mubr.msk.f32.vlgmr.msra.gmra.mxu1 %vm81_vm2, %v65_v6  ;;  %vm306_vm4 = vcmp.gt.s32.totalorder %v3394_v32, 0  ;;  %vm453_vm5 = vcmp.gt.s32.totalorder %v3394_v32, 1  ;;  %vm601_vm6 = vcmp.gt.s32.totalorder %v3394_v32, 2  ;;  %vm749_vm7 = vcmp.gt.s32.totalorder %v3394_v32, 3 }
  0x26   :  { %2877 = vmatprep.subr.mxu1 %v3245_v1  ;;  %2874 = vmatprep.mubr.msk.f32.mxu1 %vm81_vm2, %v66_v7  ;;  %v2732_v34 = vsel %vm306_vm4, 1.0, %v3245_v1  ;;  %v2734_v62 = vsel %vm453_vm5, 1.0, %v3245_v1  ;;  %vm897_vm8 = vcmp.gt.s32.totalorder %v3394_v32, 4  ;;  %vm1045_vm9 = vcmp.gt.s32.totalorder %v3394_v32, 5 }
  0x27   :  { %2878 = vmatpush3.msra.mxu1 %v3329_v5  ;;  %2892 = vmatprep.subr.mxu0 %v3245_v1  ;;  %v3371_v12 = vld [vmem:[#allocation4] sm:$0xf]  ;;  %v203_v33 = vld [vmem:[#allocation5] sm:$0xf]  ;;  %v315_v41 = vsub.f32 1.0, %v2732_v34  ;;  %v462_v0 = vsub.f32 1.0, %v2734_v62 }
  0x28   :  { %2879 = vmatprep.subr.mxu1 %v3245_v1  ;;  %2893 = vmatpush3.msra.mxu0 %v3356_v10  ;;  %vm1193_vm10 = vcmp.gt.s32.totalorder %v3394_v32, 6  ;;  %vm1341_vm11 = vcmp.gt.s32.totalorder %v3394_v32, 7 }
  0x29   :  { %2880 = vmatpush3.msra.mxu1 %v3341_v8  ;;  %2894 = vmatprep.subr.mxu0 %v3245_v1 }
  0x2a   :  { %2875 = vmatmul.mubr.msk.f32.gmra.mxu1 %vm81_vm2, %v67_v9  ;;  %2881 = vmatprep.subr.mxu1 %v3245_v1 }
  0x2b   :  { %2882 = vmatpush3.msra.mxu1 %v3356_v10  ;;  %2885 = vmatprep.mubr.msk.f32.mxu1 %vm3246_vm1, %v3245_v1 }
  0x2c   :  { %2883 = vmatprep.subr.mxu1 %v3245_v1  ;;  %2895 = vmatpush3.msra.mxu0 %v3366_v11 }
  0x2d   :  { %2884 = vmatpush3.msra.mxu1 %v3366_v11  ;;  %2910 = vmatprep.subr.mxu0 %v3245_v1 }
  0x2e   :  { %2886 = vmatmul.mubr.msk.f32.vlgmr.msra.gmra.mxu1 %vm205_vm3, %v3371_v12  ;;  %2899 = vmatprep.subr.mxu1 %v3245_v1 }
  0x2f   :  { %2900 = vmatpush3.msra.mxu1 %v3329_v5  ;;  %2907 = vmatprep.mubr.msk.f32.mxu1 %vm3246_vm1, %v3245_v1 }
  0x30   :  { %2901 = vmatprep.subr.mxu1 %v3245_v1  ;;  %3092 = vset.pattern.permute.xlu0 %v3247_v13 }
  0x31   :  { %2902 = vmatpush3.msra.mxu1 %v3341_v8  ;;  %3091 = vset.pattern.permute.xlu1 %v3247_v13 }
  0x32   :  { %2903 = vmatprep.subr.mxu1 %v3245_v1 }
  0x33   :  { %2904 = vmatpush3.msra.mxu1 %v3356_v10 }
  0x34   :  { %2905 = vmatprep.subr.mxu1 %v3245_v1 }
  0x35   :  { %2906 = vmatpush3.msra.mxu1 %v3366_v11 }
  0x36   :  { %2921 = vmatprep.subr.mxu1 %v3245_v1 }
  0xe5   :  { %v2873_v15 = vpop.f32.mrf.mxu1 }
  0xe6   :  { %v166_v16 = vadd.f32 %v2873_v15, %v2726_v14 }
  0xe7   :  { %v160_v17 = vpop.f32.mrf.mxu1 }
  0xe8   :  { %v184_v18 = vcombine.high %v166_v16, %v166_v16  ;;  %193 = vst [vmem:[#allocation2 + $0x8] sm:$0xf] %v166_v16  ;;  %v161_v19 = vadd.f32 %v2726_v14, %v160_v17 }
  0xea   :  { %v2876_v20 = vpop.f32.mrf.mxu1  ;;  %194 = vst [vmem:[#allocation2 + $0xc] sm:$0xf] %v184_v18  ;;  %v183_v21 = vcombine.high %v161_v19, %v161_v19  ;;  %191 = vst [vmem:[#allocation2] sm:$0xf] %v161_v19 }
  0xeb   :  { %v176_v22 = vadd.f32 %v2876_v20, %v2726_v14 }
  0xec   :  { %v170_v23 = vpop.f32.mrf.mxu1  ;;  %192 = vst [vmem:[#allocation2 + $0x4] sm:$0xf] %v183_v21 }
  0xed   :  { %v186_v24 = vcombine.high %v176_v22, %v176_v22  ;;  %197 = vst [vmem:[#allocation2 + $0x18] sm:$0xf] %v176_v22  ;;  %v171_v25 = vadd.f32 %v2726_v14, %v170_v23 }
  0xee   :  { %v275_v26 = vpop.f32.mrf.mxu1 }
  0xef   :  { %198 = vst [vmem:[#allocation2 + $0x1c] sm:$0xf] %v186_v24  ;;  %v185_v27 = vcombine.high %v171_v25, %v171_v25  ;;  %195 = vst [vmem:[#allocation2 + $0x10] sm:$0xf] %v171_v25 }
  0xf0   :  { %v2887_v28 = vpop.f32.mrf.mxu1 }
  0xf1   :  { %196 = vst [vmem:[#allocation2 + $0x14] sm:$0xf] %v185_v27  ;;  %v204_v29 = vld [vmem:[#allocation2] sm:$0xf] }
  0xf2   :  { %v279_v30 = vadd.f32 %v275_v26, %v204_v29 }
  0xf3   :  { %v352_v2 = vld [vmem:[#allocation2 + $0x4] sm:$0xf] }
  0xf4   :  { %3101 = vtanh.f32 %v279_v30  ;;  %v280_v35 = vmul.f32 0.5, %v279_v30 }
  0xf6   :  { %3103 = vtanh.f32 %v280_v35 }
 0x101   :  { %v3102_v31 = vpop.eup %3101 }
 0x102   :  { %291 = vrot.lane.b32.xlu0 %v3102_v31, %s3248_s21 }
 0x103   :  { %v3104_v36 = vpop.eup %3103 }
 0x104   :  { %v282_v37 = vadd.f32 1.0, %v3104_v36 }
 0x106   :  { %286 = vrot.lane.b32.xlu0 %v203_v33, %s3249_s9  ;;  %v283_v38 = vmul.f32 0.5, %v282_v37 }
 0x10a   :  { %311 = vperm.xlu0 %3092, %v2732_v34  }
 0x174   :  { %v292_v39 = vpop.permute.xlu0 %291 }
 0x175   :  { %v294_v40 = vmul.f32 %v292_v39, %v283_v38 }
 0x177   :  { %296 = vrot.lane.b32.xlu1 %v294_v40, %s3249_s9 }
 0x178   :  { %v287_v42 = vpop.permute.xlu0 %286 }
 0x179   :  { %v289_v43 = vmul.f32 %v287_v42, %v283_v38 }
 0x17b   :  { %318 = vperm.xlu1 %3091, %v315_v41   ;;  %v500_v41 = vld [vmem:[#allocation2 + $0x8] sm:$0xf] }
 0x185   :  { %v3409_v52 = vpop.permute.xlu0 %311 }
 0x1e9   :  { %v297_v44 = vpop.permute.xlu1 %296 }
 0x1ea   :  { %v299_v45 = vadd.f32 %v297_v44, %v289_v43 }
 0x1ec   :  { %3105 = vtanh.f32 %v299_v45  ;;  %v332_v56 = vmul.f32 %v3409_v52, %v299_v45 }
 0x1f6   :  { %v3401_v46 = vpop.permute.xlu1 %318 }
 0x1f7   :  { %v321_v48 = vmul.f32 %v3401_v46, %v3371_v12  ;;  %v333_v49 = vmul.f32 %v3401_v46, %v203_v33 }
 0x1f9   :  { %v3106_v47 = vpop.eup %3105 }
 0x1fa   :  { %302 = vrot.lane.b32.xlu1 %v3106_v47, %s3248_s21 }
 0x1fe   :  { %323 = vrot.lane.b32.xlu1 %v321_v48, %s3250_s1 }
 0x202   :  { %335 = vrot.lane.b32.xlu1 %v333_v49, %s3249_s9 }
 0x26c   :  { %v303_v50 = vpop.permute.xlu1 %302 }
 0x26d   :  { %v305_v51 = vmul.f32 %v303_v50, %v283_v38  ;;  %v2736_v38 = vsel %vm601_vm6, 1.0, %v3245_v1 }
 0x26e   :  { %v610_v40 = vsub.f32 1.0, %v2736_v38 }
 0x26f   :  { %v3412_v53 = vmul.f32 %v3409_v52, %v305_v51 }
 0x270   :  { %v324_v54 = vpop.permute.xlu1 %323 }
 0x271   :  { %v326_v55 = vadd.f32 %v324_v54, %v3412_v53 }
 0x273   :  { %328 = vrot.lane.b32.xlu0 %v326_v55, %s3249_s9 }
 0x274   :  { %v336_v57 = vpop.permute.xlu1 %335 }
 0x275   :  { %v338_v58 = vadd.f32 %v336_v57, %v332_v56 }
 0x277   :  { %340 = vrot.lane.b32.xlu0 %v338_v58, %s3250_s1 }
 0x2e5   :  { %v329_v59 = vpop.permute.xlu0 %328 }
 0x2e6   :  { %331 = vst.msk [vmem:[#allocation4] sm:$0xf] %vm199_vm0, %v329_v59 }
 0x2e9   :  { %v341_v60 = vpop.permute.xlu0 %340 }
 0x2ea   :  { %343 = vst.msk [vmem:[#allocation5] sm:$0xf] %vm199_vm0, %v341_v60 }
 0x2ed   :  { %v349_v61 = vld [vmem:[#allocation4] sm:$0xf] }
 0x2ee   :  { %2897 = vmatmul.mubr.msk.f32.vlgmr.msra.gmra.mxu0 %vm205_vm3, %v349_v61 }
 0x2ef   :  { %2911 = vmatpush3.msra.mxu0 %v3329_v5  ;;  %2918 = vmatprep.mubr.msk.f32.mxu0 %vm3246_vm1, %v3245_v1 }
 0x2f0   :  { %2912 = vmatprep.subr.mxu0 %v3245_v1 }
 0x2f1   :  { %v350_v63 = vld [vmem:[#allocation5] sm:$0xf]  ;;  %2913 = vmatpush3.msra.mxu0 %v3341_v8 }
 0x2f2   :  { %433 = vrot.lane.b32.xlu0 %v350_v63, %s3249_s9  ;;  %2914 = vmatprep.subr.mxu0 %v3245_v1 }
 0x2f3   :  { %2915 = vmatpush3.msra.mxu0 %v3356_v10 }
 0x2f4   :  { %2916 = vmatprep.subr.mxu0 %v3245_v1 }
 0x2f5   :  { %2917 = vmatpush3.msra.mxu0 %v3366_v11 }
 0x2f6   :  { %465 = vperm.xlu0 %3092, %v462_v0   ;;  %2932 = vmatprep.subr.mxu0 %v3245_v1 }
 0x364   :  { %v434_v17 = vpop.permute.xlu0 %433 }
 0x371   :  { %v3436_v18 = vpop.permute.xlu0 %465 }
 0x372   :  { %v468_v19 = vmul.f32 %v3436_v18, %v349_v61  ;;  %v480_v20 = vmul.f32 %v3436_v18, %v350_v63 }
 0x3ae   :  { %v422_v3 = vpop.f32.mrf.mxu0 }
 0x3af   :  { %v426_v4 = vadd.f32 %v422_v3, %v352_v2 }
 0x3b0   :  { %v2898_v6 = vpop.f32.mrf.mxu0 }
 0x3b1   :  { %3107 = vtanh.f32 %v426_v4  ;;  %v427_v9 = vmul.f32 0.5, %v426_v4 }
 0x3b3   :  { %3109 = vtanh.f32 %v427_v9 }
 0x3be   :  { %v3108_v7 = vpop.eup %3107 }
 0x3bf   :  { %438 = vrot.lane.b32.xlu1 %v3108_v7, %s3248_s21 }
 0x3c0   :  { %v3110_v12 = vpop.eup %3109 }
 0x3c1   :  { %v429_v13 = vadd.f32 1.0, %v3110_v12 }
 0x3c3   :  { %v430_v14 = vmul.f32 0.5, %v429_v13 }
 0x3c5   :  { %v436_v21 = vmul.f32 %v434_v17, %v430_v14 }
 0x431   :  { %v439_v15 = vpop.permute.xlu1 %438 }
 0x432   :  { %v441_v16 = vmul.f32 %v439_v15, %v430_v14 }
 0x434   :  { %443 = vrot.lane.b32.xlu1 %v441_v16, %s3249_s9  ;;  %v2738_v16 = vsel %vm749_vm7, 1.0, %v3245_v1 }
 0x438   :  { %458 = vperm.xlu1 %3091, %v2734_v62  }
 0x43c   :  { %470 = vrot.lane.b32.xlu1 %v468_v19, %s3250_s1  ;;  %v758_v19 = vsub.f32 1.0, %v2738_v16 }
 0x440   :  { %482 = vrot.lane.b32.xlu1 %v480_v20, %s3249_s9  ;;  %v648_v20 = vld [vmem:[#allocation2 + $0xc] sm:$0xf] }
 0x4a6   :  { %v444_v22 = vpop.permute.xlu1 %443 }
 0x4a7   :  { %v446_v23 = vadd.f32 %v444_v22, %v436_v21 }
 0x4a9   :  { %3111 = vtanh.f32 %v446_v23 }
 0x4b3   :  { %v3443_v25 = vpop.permute.xlu1 %458 }
 0x4b4   :  { %v479_v33 = vmul.f32 %v3443_v25, %v446_v23 }
 0x4b6   :  { %v3112_v24 = vpop.eup %3111 }
 0x4b7   :  { %449 = vrot.lane.b32.xlu0 %v3112_v24, %s3248_s21  ;;  %v471_v26 = vpop.permute.xlu1 %470 }
 0x4bb   :  { %v483_v31 = vpop.permute.xlu1 %482 }
 0x4bc   :  { %v485_v34 = vadd.f32 %v483_v31, %v479_v33 }
 0x529   :  { %v450_v27 = vpop.permute.xlu0 %449 }
 0x52a   :  { %v452_v28 = vmul.f32 %v450_v27, %v430_v14 }
 0x52c   :  { %v3446_v29 = vmul.f32 %v3443_v25, %v452_v28 }
 0x52e   :  { %v473_v30 = vadd.f32 %v471_v26, %v3446_v29 }
 0x530   :  { %475 = vrot.lane.b32.xlu0 %v473_v30, %s3249_s9 }
 0x534   :  { %487 = vrot.lane.b32.xlu0 %v485_v34, %s3250_s1 }
 0x5a2   :  { %v476_v35 = vpop.permute.xlu0 %475 }
 0x5a3   :  { %478 = vst.msk [vmem:[#allocation4] sm:$0xf] %vm199_vm0, %v476_v35 }
 0x5a6   :  { %v488_v36 = vpop.permute.xlu0 %487 }
 0x5a7   :  { %490 = vst.msk [vmem:[#allocation5] sm:$0xf] %vm199_vm0, %v488_v36 }
 0x5aa   :  { %v497_v37 = vld [vmem:[#allocation4] sm:$0xf] }
 0x5ab   :  { %2908 = vmatmul.mubr.msk.f32.vlgmr.msra.gmra.mxu1 %vm205_vm3, %v497_v37 }
 0x5ac   :  { %2922 = vmatpush3.msra.mxu1 %v3329_v5  ;;  %2929 = vmatprep.mubr.msk.f32.mxu1 %vm3246_vm1, %v3245_v1 }
 0x5ad   :  { %2923 = vmatprep.subr.mxu1 %v3245_v1 }
 0x5ae   :  { %v498_v39 = vld [vmem:[#allocation5] sm:$0xf]  ;;  %2924 = vmatpush3.msra.mxu1 %v3341_v8 }
 0x5af   :  { %581 = vrot.lane.b32.xlu0 %v498_v39, %s3249_s9  ;;  %2925 = vmatprep.subr.mxu1 %v3245_v1 }
 0x5b0   :  { %2926 = vmatpush3.msra.mxu1 %v3356_v10 }
 0x5b1   :  { %2927 = vmatprep.subr.mxu1 %v3245_v1 }
 0x5b2   :  { %2928 = vmatpush3.msra.mxu1 %v3366_v11 }
 0x5b3   :  { %613 = vperm.xlu0 %3092, %v610_v40   ;;  %2943 = vmatprep.subr.mxu1 %v3245_v1 }
 0x621   :  { %v582_v55 = vpop.permute.xlu0 %581 }
 0x62e   :  { %v3470_v56 = vpop.permute.xlu0 %613 }
 0x62f   :  { %v616_v57 = vmul.f32 %v3470_v56, %v497_v37  ;;  %v628_v58 = vmul.f32 %v3470_v56, %v498_v39 }
 0x66b   :  { %v570_v42 = vpop.f32.mrf.mxu1 }
 0x66c   :  { %v574_v43 = vadd.f32 %v570_v42, %v500_v41 }
 0x66d   :  { %v2909_v44 = vpop.f32.mrf.mxu1 }
 0x66e   :  { %3113 = vtanh.f32 %v574_v43  ;;  %v575_v47 = vmul.f32 0.5, %v574_v43 }
 0x670   :  { %3115 = vtanh.f32 %v575_v47 }
 0x67b   :  { %v3114_v45 = vpop.eup %3113 }
 0x67c   :  { %586 = vrot.lane.b32.xlu1 %v3114_v45, %s3248_s21 }
 0x67d   :  { %v3116_v48 = vpop.eup %3115 }
 0x67e   :  { %v577_v49 = vadd.f32 1.0, %v3116_v48 }
 0x680   :  { %v578_v50 = vmul.f32 0.5, %v577_v49 }
 0x682   :  { %v584_v59 = vmul.f32 %v582_v55, %v578_v50 }
 0x6ee   :  { %v587_v51 = vpop.permute.xlu1 %586 }
 0x6ef   :  { %v589_v54 = vmul.f32 %v587_v51, %v578_v50 }
 0x6f1   :  { %591 = vrot.lane.b32.xlu1 %v589_v54, %s3249_s9 }
 0x6f5   :  { %606 = vperm.xlu1 %3091, %v2736_v38  }
 0x6f9   :  { %618 = vrot.lane.b32.xlu1 %v616_v57, %s3250_s1 }
 0x6fd   :  { %630 = vrot.lane.b32.xlu1 %v628_v58, %s3249_s9  ;;  %v2740_v58 = vsel %vm897_vm8, 1.0, %v3245_v1 }
 0x763   :  { %v592_v60 = vpop.permute.xlu1 %591 }
 0x764   :  { %v594_v61 = vadd.f32 %v592_v60, %v584_v59  ;;  %v906_v60 = vsub.f32 1.0, %v2740_v58 }
 0x766   :  { %3117 = vtanh.f32 %v594_v61 }
 0x770   :  { %v3477_v63 = vpop.permute.xlu1 %606 }
 0x771   :  { %v627_v9 = vmul.f32 %v3477_v63, %v594_v61  ;;  %v796_v61 = vld [vmem:[#allocation2 + $0x10] sm:$0xf] }
 0x773   :  { %v3118_v62 = vpop.eup %3117 }
 0x774   :  { %597 = vrot.lane.b32.xlu0 %v3118_v62, %s3248_s21  ;;  %v619_v0 = vpop.permute.xlu1 %618 }
 0x778   :  { %v631_v7 = vpop.permute.xlu1 %630 }
 0x779   :  { %v633_v12 = vadd.f32 %v631_v7, %v627_v9 }
 0x7e6   :  { %v598_v2 = vpop.permute.xlu0 %597 }
 0x7e7   :  { %v600_v3 = vmul.f32 %v598_v2, %v578_v50 }
 0x7e9   :  { %v3480_v4 = vmul.f32 %v3477_v63, %v600_v3 }
 0x7eb   :  { %v621_v6 = vadd.f32 %v619_v0, %v3480_v4 }
 0x7ed   :  { %623 = vrot.lane.b32.xlu0 %v621_v6, %s3249_s9 }
 0x7f1   :  { %635 = vrot.lane.b32.xlu0 %v633_v12, %s3250_s1 }
 0x85f   :  { %v624_v13 = vpop.permute.xlu0 %623 }
 0x860   :  { %626 = vst.msk [vmem:[#allocation4] sm:$0xf] %vm199_vm0, %v624_v13 }
 0x863   :  { %v636_v14 = vpop.permute.xlu0 %635 }
 0x864   :  { %638 = vst.msk [vmem:[#allocation5] sm:$0xf] %vm199_vm0, %v636_v14 }
 0x867   :  { %v645_v15 = vld [vmem:[#allocation4] sm:$0xf] }
 0x868   :  { %2919 = vmatmul.mubr.msk.f32.vlgmr.msra.gmra.mxu0 %vm205_vm3, %v645_v15 }
 0x869   :  { %2933 = vmatpush3.msra.mxu0 %v3329_v5  ;;  %2940 = vmatprep.mubr.msk.f32.mxu0 %vm3246_vm1, %v3245_v1 }
 0x86a   :  { %2934 = vmatprep.subr.mxu0 %v3245_v1 }
 0x86b   :  { %v646_v17 = vld [vmem:[#allocation5] sm:$0xf]  ;;  %2935 = vmatpush3.msra.mxu0 %v3341_v8 }
 0x86c   :  { %729 = vrot.lane.b32.xlu0 %v646_v17, %s3249_s9  ;;  %2936 = vmatprep.subr.mxu0 %v3245_v1 }
 0x86d   :  { %2937 = vmatpush3.msra.mxu0 %v3356_v10 }
 0x86e   :  { %2938 = vmatprep.subr.mxu0 %v3245_v1 }
 0x86f   :  { %2939 = vmatpush3.msra.mxu0 %v3366_v11 }
 0x870   :  { %761 = vperm.xlu0 %3092, %v758_v19   ;;  %2954 = vmatprep.subr.mxu0 %v3245_v1 }
 0x8de   :  { %v730_v34 = vpop.permute.xlu0 %729 }
 0x8eb   :  { %v3504_v35 = vpop.permute.xlu0 %761 }
 0x8ec   :  { %v764_v36 = vmul.f32 %v3504_v35, %v645_v15  ;;  %v776_v37 = vmul.f32 %v3504_v35, %v646_v17 }
 0x928   :  { %v718_v21 = vpop.f32.mrf.mxu0 }
 0x929   :  { %v722_v22 = vadd.f32 %v718_v21, %v648_v20 }
 0x92a   :  { %v2920_v23 = vpop.f32.mrf.mxu0 }
 0x92b   :  { %3119 = vtanh.f32 %v722_v22  ;;  %v723_v26 = vmul.f32 0.5, %v722_v22 }
 0x92d   :  { %3121 = vtanh.f32 %v723_v26 }
 0x938   :  { %v3120_v24 = vpop.eup %3119 }
 0x939   :  { %734 = vrot.lane.b32.xlu1 %v3120_v24, %s3248_s21 }
 0x93a   :  { %v3122_v27 = vpop.eup %3121 }
 0x93b   :  { %v725_v28 = vadd.f32 1.0, %v3122_v27 }
 0x93d   :  { %v726_v30 = vmul.f32 0.5, %v725_v28 }
 0x93f   :  { %v732_v38 = vmul.f32 %v730_v34, %v726_v30 }
 0x9ab   :  { %v735_v31 = vpop.permute.xlu1 %734 }
 0x9ac   :  { %v737_v33 = vmul.f32 %v735_v31, %v726_v30 }
 0x9ae   :  { %739 = vrot.lane.b32.xlu1 %v737_v33, %s3249_s9 }
 0x9b2   :  { %754 = vperm.xlu1 %3091, %v2738_v16  }
 0x9b6   :  { %766 = vrot.lane.b32.xlu1 %v764_v36, %s3250_s1 }
 0x9ba   :  { %778 = vrot.lane.b32.xlu1 %v776_v37, %s3249_s9 }
 0xa20   :  { %v740_v39 = vpop.permute.xlu1 %739 }
 0xa21   :  { %v742_v40 = vadd.f32 %v740_v39, %v732_v38 }
 0xa23   :  { %3123 = vtanh.f32 %v742_v40 }
 0xa2d   :  { %v3511_v42 = vpop.permute.xlu1 %754 }
 0xa2e   :  { %v775_v50 = vmul.f32 %v3511_v42, %v742_v40  ;;  %v2742_v40 = vsel %vm1045_vm9, 1.0, %v3245_v1 }
 0xa30   :  { %v3124_v41 = vpop.eup %3123 }
 0xa31   :  { %745 = vrot.lane.b32.xlu0 %v3124_v41, %s3248_s21  ;;  %v767_v43 = vpop.permute.xlu1 %766 }
 0xa35   :  { %v779_v49 = vpop.permute.xlu1 %778 }
 0xa36   :  { %v781_v51 = vadd.f32 %v779_v49, %v775_v50 }
 0xaa3   :  { %v746_v44 = vpop.permute.xlu0 %745 }
 0xaa4   :  { %v748_v45 = vmul.f32 %v746_v44, %v726_v30 }
 0xaa6   :  { %v3514_v47 = vmul.f32 %v3511_v42, %v748_v45 }
 0xaa8   :  { %v769_v48 = vadd.f32 %v767_v43, %v3514_v47  ;;  %v1054_v43 = vsub.f32 1.0, %v2742_v40 }
 0xaaa   :  { %771 = vrot.lane.b32.xlu0 %v769_v48, %s3249_s9 }
 0xaae   :  { %783 = vrot.lane.b32.xlu0 %v781_v51, %s3250_s1 }
 0xb1c   :  { %v772_v54 = vpop.permute.xlu0 %771 }
 0xb1d   :  { %774 = vst.msk [vmem:[#allocation4] sm:$0xf] %vm199_vm0, %v772_v54 }
 0xb20   :  { %v784_v55 = vpop.permute.xlu0 %783 }
 0xb21   :  { %786 = vst.msk [vmem:[#allocation5] sm:$0xf] %vm199_vm0, %v784_v55 }
 0xb24   :  { %v793_v57 = vld [vmem:[#allocation4] sm:$0xf] }
 0xb25   :  { %2930 = vmatmul.mubr.msk.f32.vlgmr.msra.gmra.mxu1 %vm205_vm3, %v793_v57 }
 0xb26   :  { %2944 = vmatpush3.msra.mxu1 %v3329_v5  ;;  %2951 = vmatprep.mubr.msk.f32.mxu1 %vm3246_vm1, %v3245_v1 }
 0xb27   :  { %2945 = vmatprep.subr.mxu1 %v3245_v1 }
 0xb28   :  { %v794_v59 = vld [vmem:[#allocation5] sm:$0xf]  ;;  %2946 = vmatpush3.msra.mxu1 %v3341_v8 }
 0xb29   :  { %877 = vrot.lane.b32.xlu0 %v794_v59, %s3249_s9  ;;  %2947 = vmatprep.subr.mxu1 %v3245_v1 }
 0xb2a   :  { %2948 = vmatpush3.msra.mxu1 %v3356_v10 }
 0xb2b   :  { %2949 = vmatprep.subr.mxu1 %v3245_v1 }
 0xb2c   :  { %2950 = vmatpush3.msra.mxu1 %v3366_v11 }
 0xb2d   :  { %909 = vperm.xlu0 %3092, %v906_v60  }
 0xb9b   :  { %v878_v15 = vpop.permute.xlu0 %877 }
 0xba8   :  { %v3537_v16 = vpop.permute.xlu0 %909 }
 0xba9   :  { %v912_v17 = vmul.f32 %v3537_v16, %v793_v57  ;;  %v924_v19 = vmul.f32 %v3537_v16, %v794_v59 }
 0xbe5   :  { %v866_v62 = vpop.f32.mrf.mxu1 }
 0xbe6   :  { %v870_v0 = vadd.f32 %v866_v62, %v796_v61 }
 0xbe7   :  { %v2931_v2 = vpop.f32.mrf.mxu1 }
 0xbe8   :  { %3125 = vtanh.f32 %v870_v0  ;;  %v871_v6 = vmul.f32 0.5, %v870_v0 }
 0xbea   :  { %3127 = vtanh.f32 %v871_v6 }
 0xbf5   :  { %v3126_v3 = vpop.eup %3125 }
 0xbf6   :  { %882 = vrot.lane.b32.xlu1 %v3126_v3, %s3248_s21 }
 0xbf7   :  { %v3128_v7 = vpop.eup %3127 }
 0xbf8   :  { %v873_v9 = vadd.f32 1.0, %v3128_v7 }
 0xbfa   :  { %v874_v12 = vmul.f32 0.5, %v873_v9 }
 0xbfc   :  { %v880_v20 = vmul.f32 %v878_v15, %v874_v12 }
 0xc68   :  { %v883_v13 = vpop.permute.xlu1 %882 }
 0xc69   :  { %v885_v14 = vmul.f32 %v883_v13, %v874_v12 }
 0xc6b   :  { %887 = vrot.lane.b32.xlu1 %v885_v14, %s3249_s9 }
 0xc6f   :  { %902 = vperm.xlu1 %3091, %v2740_v58  }
 0xc73   :  { %914 = vrot.lane.b32.xlu1 %v912_v17, %s3250_s1 }
 0xc77   :  { %926 = vrot.lane.b32.xlu1 %v924_v19, %s3249_s9 }
 0xcdd   :  { %v888_v21 = vpop.permute.xlu1 %887 }
 0xcde   :  { %v890_v22 = vadd.f32 %v888_v21, %v880_v20  ;;  %v2744_v21 = vsel %vm1193_vm10, 1.0, %v3245_v1 }
 0xce0   :  { %3129 = vtanh.f32 %v890_v22 }
 0xcea   :  { %v3544_v24 = vpop.permute.xlu1 %902 }
 0xceb   :  { %v923_v34 = vmul.f32 %v3544_v24, %v890_v22 }
 0xced   :  { %v3130_v23 = vpop.eup %3129 }
 0xcee   :  { %893 = vrot.lane.b32.xlu0 %v3130_v23, %s3248_s21  ;;  %v915_v26 = vpop.permute.xlu1 %914  ;;  %v1202_v23 = vsub.f32 1.0, %v2744_v21 }
 0xcf2   :  { %v927_v33 = vpop.permute.xlu1 %926 }
 0xcf3   :  { %v929_v36 = vadd.f32 %v927_v33, %v923_v34 }
 0xd60   :  { %v894_v27 = vpop.permute.xlu0 %893 }
 0xd61   :  { %v896_v28 = vmul.f32 %v894_v27, %v874_v12 }
 0xd63   :  { %v3547_v30 = vmul.f32 %v3544_v24, %v896_v28 }
 0xd65   :  { %v917_v31 = vadd.f32 %v915_v26, %v3547_v30  ;;  %v1092_v26 = vld [vmem:[#allocation2 + $0x18] sm:$0xf] }
 0xd67   :  { %919 = vrot.lane.b32.xlu0 %v917_v31, %s3249_s9 }
 0xd6b   :  { %931 = vrot.lane.b32.xlu0 %v929_v36, %s3250_s1 }
 0xdd9   :  { %v920_v37 = vpop.permute.xlu0 %919 }
 0xdda   :  { %922 = vst.msk [vmem:[#allocation4] sm:$0xf] %vm199_vm0, %v920_v37 }
 0xddd   :  { %v932_v38 = vpop.permute.xlu0 %931 }
 0xdde   :  { %934 = vst.msk [vmem:[#allocation5] sm:$0xf] %vm199_vm0, %v932_v38 }
 0xde1   :  { %v941_v39 = vld [vmem:[#allocation4] sm:$0xf] }
 0xde2   :  { %2941 = vmatmul.mubr.msk.f32.vlgmr.msra.gmra.mxu0 %vm205_vm3, %v941_v39 }
 0xde3   :  { %2955 = vmatpush3.msra.mxu0 %v3329_v5  ;;  %2962 = vmatprep.mubr.msk.f32.mxu0 %vm3246_vm1, %v3245_v1  ;;  %v944_v5 = vld [vmem:[#allocation2 + $0x14] sm:$0xf] }
 0xde4   :  { %2956 = vmatprep.subr.mxu0 %v3245_v1 }
 0xde5   :  { %v942_v41 = vld [vmem:[#allocation5] sm:$0xf]  ;;  %2957 = vmatpush3.msra.mxu0 %v3341_v8 }
 0xde6   :  { %1025 = vrot.lane.b32.xlu0 %v942_v41, %s3249_s9  ;;  %2958 = vmatprep.subr.mxu0 %v3245_v1 }
 0xde7   :  { %2959 = vmatpush3.msra.mxu0 %v3356_v10 }
 0xde8   :  { %2960 = vmatprep.subr.mxu0 %v3245_v1 }
 0xde9   :  { %2961 = vmatpush3.msra.mxu0 %v3366_v11 }
 0xdea   :  { %1057 = vperm.xlu0 %3092, %v1054_v43   ;;  %2979 = vmatprep.subr.mxu0 %v3245_v1 }
 0xe58   :  { %v1026_v57 = vpop.permute.xlu0 %1025 }
 0xe65   :  { %v3571_v11 = vpop.permute.xlu0 %1057 }
 0xe66   :  { %v1060_v58 = vmul.f32 %v3571_v11, %v941_v39  ;;  %v1072_v59 = vmul.f32 %v3571_v11, %v942_v41 }
 0xea2   :  { %v1014_v44 = vpop.f32.mrf.mxu0 }
 0xea3   :  { %v1018_v45 = vadd.f32 %v1014_v44, %v944_v5 }
 0xea4   :  { %v2942_v48 = vpop.f32.mrf.mxu0 }
 0xea5   :  { %3131 = vtanh.f32 %v1018_v45  ;;  %v1019_v49 = vmul.f32 0.5, %v1018_v45 }
 0xea7   :  { %3133 = vtanh.f32 %v1019_v49 }
 0xeb2   :  { %v3132_v8 = vpop.eup %3131 }
 0xeb3   :  { %1030 = vrot.lane.b32.xlu1 %v3132_v8, %s3248_s21 }
 0xeb4   :  { %v3134_v50 = vpop.eup %3133 }
 0xeb5   :  { %v1021_v51 = vadd.f32 1.0, %v3134_v50 }
 0xeb7   :  { %v1022_v10 = vmul.f32 0.5, %v1021_v51 }
 0xeb9   :  { %v1028_v60 = vmul.f32 %v1026_v57, %v1022_v10 }
 0xf25   :  { %v1031_v54 = vpop.permute.xlu1 %1030 }
 0xf26   :  { %v1033_v55 = vmul.f32 %v1031_v54, %v1022_v10 }
 0xf28   :  { %1035 = vrot.lane.b32.xlu1 %v1033_v55, %s3249_s9 }
 0xf2c   :  { %1050 = vperm.xlu1 %3091, %v2742_v40  }
 0xf30   :  { %1062 = vrot.lane.b32.xlu1 %v1060_v58, %s3250_s1 }
 0xf34   :  { %1074 = vrot.lane.b32.xlu1 %v1072_v59, %s3249_s9 }
 0xf9a   :  { %v1036_v61 = vpop.permute.xlu1 %1035 }
 0xf9b   :  { %v1038_v62 = vadd.f32 %v1036_v61, %v1028_v60 }
 0xf9d   :  { %3135 = vtanh.f32 %v1038_v62 }
 0xfa7   :  { %v3578_v2 = vpop.permute.xlu1 %1050 }
 0xfa8   :  { %v1071_v14 = vmul.f32 %v3578_v2, %v1038_v62 }
 0xfaa   :  { %v3136_v0 = vpop.eup %3135 }
 0xfab   :  { %1041 = vrot.lane.b32.xlu0 %v3136_v0, %s3248_s21  ;;  %v1063_v3 = vpop.permute.xlu1 %1062 }
 0xfaf   :  { %v1075_v13 = vpop.permute.xlu1 %1074 }
 0xfb0   :  { %v1077_v15 = vadd.f32 %v1075_v13, %v1071_v14 }
0x101d   :  { %v1042_v6 = vpop.permute.xlu0 %1041 }
0x101e   :  { %v1044_v7 = vmul.f32 %v1042_v6, %v1022_v10 }
0x1020   :  { %v3581_v9 = vmul.f32 %v3578_v2, %v1044_v7 }
0x1022   :  { %v1065_v12 = vadd.f32 %v1063_v3, %v3581_v9  ;;  %v2746_v3 = vsel %vm1341_vm11, 1.0, %v3245_v1 }
0x1023   :  { %v1350_v7 = vsub.f32 1.0, %v2746_v3 }
0x1024   :  { %1067 = vrot.lane.b32.xlu0 %v1065_v12, %s3249_s9  ;;  %v1240_v12 = vld [vmem:[#allocation2 + $0x1c] sm:$0xf] }
0x1028   :  { %1079 = vrot.lane.b32.xlu0 %v1077_v15, %s3250_s1 }
0x1096   :  { %v1068_v17 = vpop.permute.xlu0 %1067 }
0x1097   :  { %1070 = vst.msk [vmem:[#allocation4] sm:$0xf] %vm199_vm0, %v1068_v17 }
0x109a   :  { %v1080_v19 = vpop.permute.xlu0 %1079 }
0x109b   :  { %1082 = vst.msk [vmem:[#allocation5] sm:$0xf] %vm199_vm0, %v1080_v19 }
0x109e   :  { %v1089_v20 = vld [vmem:[#allocation4] sm:$0xf] }
0x109f   :  { %2952 = vmatmul.mubr.msk.f32.vlgmr.msra.gmra.mxu1 %vm205_vm3, %v1089_v20 }
0x10a2   :  { %v1090_v22 = vld [vmem:[#allocation5] sm:$0xf] }
0x10a3   :  { %1173 = vrot.lane.b32.xlu0 %v1090_v22, %s3249_s9 }
0x10a7   :  { %1205 = vperm.xlu0 %3092, %v1202_v23  }
0x1115   :  { %v1174_v41 = vpop.permute.xlu0 %1173 }
0x1122   :  { %v3595_v43 = vpop.permute.xlu0 %1205 }
0x1123   :  { %v1208_v5 = vmul.f32 %v3595_v43, %v1089_v20  ;;  %v1220_v44 = vmul.f32 %v3595_v43, %v1090_v22 }
0x115f   :  { %v1162_v27 = vpop.f32.mrf.mxu1 }
0x1160   :  { %v1166_v28 = vadd.f32 %v1162_v27, %v1092_v26 }
0x1161   :  { %v2953_v31 = vpop.f32.mrf.mxu1 }
0x1162   :  { %3137 = vtanh.f32 %v1166_v28  ;;  %v1167_v34 = vmul.f32 0.5, %v1166_v28 }
0x1164   :  { %3139 = vtanh.f32 %v1167_v34 }
0x116f   :  { %v3138_v33 = vpop.eup %3137 }
0x1170   :  { %1178 = vrot.lane.b32.xlu1 %v3138_v33, %s3248_s21 }
0x1171   :  { %v3140_v36 = vpop.eup %3139 }
0x1172   :  { %v1169_v37 = vadd.f32 1.0, %v3140_v36 }
0x1174   :  { %v1170_v38 = vmul.f32 0.5, %v1169_v37  ;;  %v1396_v37 = vld [vmem:[%s3982_s5 + $0x18] sm:$0xff] }
0x1175   :  { %2965 = vmatprep.subr.mxu1 %v1396_v37 }
0x1176   :  { %v1176_v45 = vmul.f32 %v1174_v41, %v1170_v38  ;;  %2966 = vmatpush3.msra.mxu1 %v1396_v37  ;;  %v1393_v41 = vld [vmem:[%s3982_s5] sm:$0xff] }
0x11e2   :  { %v1179_v39 = vpop.permute.xlu1 %1178 }
0x11e3   :  { %v1181_v40 = vmul.f32 %v1179_v39, %v1170_v38 }
0x11e5   :  { %1183 = vrot.lane.b32.xlu1 %v1181_v40, %s3249_s9 }
0x11e9   :  { %1198 = vperm.xlu1 %3091, %v2744_v21  }
0x11ed   :  { %1210 = vrot.lane.b32.xlu1 %v1208_v5, %s3250_s1 }
0x11f1   :  { %1222 = vrot.lane.b32.xlu1 %v1220_v44, %s3249_s9 }
0x1257   :  { %v1184_v48 = vpop.permute.xlu1 %1183 }
0x1258   :  { %v1186_v8 = vadd.f32 %v1184_v48, %v1176_v45  ;;  %v3656_v45 = vld [vmem:[%s3983_s6 + $0x18] sm:$0xff]  ;;  %v3675_v48 = vld [vmem:[%s3983_s6] sm:$0xff] }
0x125a   :  { %3141 = vtanh.f32 %v1186_v8 }
0x1264   :  { %v3602_v50 = vpop.permute.xlu1 %1198 }
0x1265   :  { %v1219_v59 = vmul.f32 %v3602_v50, %v1186_v8 }
0x1267   :  { %v3142_v49 = vpop.eup %3141 }
0x1268   :  { %1189 = vrot.lane.b32.xlu0 %v3142_v49, %s3248_s21  ;;  %v1211_v51 = vpop.permute.xlu1 %1210 }
0x126c   :  { %v1223_v58 = vpop.permute.xlu1 %1222 }
0x126d   :  { %v1225_v60 = vadd.f32 %v1223_v58, %v1219_v59 }
0x12da   :  { %v1190_v10 = vpop.permute.xlu0 %1189 }
0x12db   :  { %v1192_v54 = vmul.f32 %v1190_v10, %v1170_v38 }
0x12dd   :  { %v3605_v55 = vmul.f32 %v3602_v50, %v1192_v54 }
0x12df   :  { %v1213_v57 = vadd.f32 %v1211_v51, %v3605_v55 }
0x12e1   :  { %1215 = vrot.lane.b32.xlu0 %v1213_v57, %s3249_s9 }
0x12e5   :  { %1227 = vrot.lane.b32.xlu0 %v1225_v60, %s3250_s1 }
0x1353   :  { %v1216_v61 = vpop.permute.xlu0 %1215 }
0x1354   :  { %1218 = vst.msk [vmem:[#allocation4] sm:$0xf] %vm199_vm0, %v1216_v61 }
0x1357   :  { %v1228_v62 = vpop.permute.xlu0 %1227 }
0x1358   :  { %1230 = vst.msk [vmem:[#allocation5] sm:$0xf] %vm199_vm0, %v1228_v62 }
0x135b   :  { %v1237_v0 = vld [vmem:[#allocation4] sm:$0xf] }
0x135c   :  { %2963 = vmatmul.mubr.msk.f32.vlgmr.msra.gmra.mxu0 %vm205_vm3, %v1237_v0 }
0x135d   :  { %2987 = vmatprep.mubr.msk.f32.mxu0 %vm3246_vm1, %v3245_v1  ;;  %2980 = vmatpush3.msra.mxu0 %v3656_v45 }
0x135e   :  { %2981 = vmatprep.subr.mxu0 %v3245_v1 }
0x135f   :  { %v1238_v6 = vld [vmem:[#allocation5] sm:$0xf] }
0x1360   :  { %1321 = vrot.lane.b32.xlu0 %v1238_v6, %s3249_s9 }
0x1364   :  { %1353 = vperm.xlu0 %3092, %v1350_v7  }
0x13d2   :  { %v1322_v26 = vpop.permute.xlu0 %1321 }
0x13df   :  { %v3621_v27 = vpop.permute.xlu0 %1353 }
0x13e0   :  { %v1356_v28 = vmul.f32 %v3621_v27, %v1237_v0  ;;  %v1368_v31 = vmul.f32 %v3621_v27, %v1238_v6 }
0x141c   :  { %v1310_v13 = vpop.f32.mrf.mxu0 }
0x141d   :  { %v1314_v14 = vadd.f32 %v1310_v13, %v1240_v12  ;;  %v3721_v12 = vld [vmem:[%s3984_s7] ss:$0 sm:$0xff] }
0x141e   :  { %v2964_v15 = vpop.f32.mrf.mxu0 }
0x141f   :  { %3143 = vtanh.f32 %v1314_v14  ;;  %v1315_v32 = vmul.f32 0.5, %v1314_v14 }
0x1421   :  { %3145 = vtanh.f32 %v1315_v32 }
0x142c   :  { %v3144_v17 = vpop.eup %3143 }
0x142d   :  { %1326 = vrot.lane.b32.xlu1 %v3144_v17, %s3248_s21 }
0x142e   :  { %v3146_v19 = vpop.eup %3145 }
0x142f   :  { %v1317_v20 = vadd.f32 1.0, %v3146_v19 }
0x1431   :  { %v1318_v21 = vmul.f32 0.5, %v1317_v20 }
0x1433   :  { %v1324_v33 = vmul.f32 %v1322_v26, %v1318_v21 }
0x149f   :  { %v1327_v22 = vpop.permute.xlu1 %1326 }
0x14a0   :  { %v1329_v23 = vmul.f32 %v1327_v22, %v1318_v21 }
0x14a2   :  { %1331 = vrot.lane.b32.xlu1 %v1329_v23, %s3249_s9 }
0x14a6   :  { %1346 = vperm.xlu1 %3091, %v2746_v3  }
0x14aa   :  { %1358 = vrot.lane.b32.xlu1 %v1356_v28, %s3250_s1 }
0x14ae   :  { %492 = vrot.lane.b32.xlu1 %v3446_v29, %s3249_s9  ;;  %v1395_v29 = vld [vmem:[%s3982_s5 + $0x10] sm:$0xff] }
0x14af   :  { %2967 = vmatprep.subr.mxu1 %v1395_v29 }
0x14b0   :  { %2968 = vmatpush3.msra.mxu1 %v1395_v29 }
0x14b2   :  { %788 = vrot.lane.b32.xlu1 %v3514_v47, %s3249_s9  ;;  %v1394_v47 = vld [vmem:[%s3982_s5 + $0x8] sm:$0xff] }
0x14b3   :  { %2969 = vmatprep.subr.mxu1 %v1394_v47 }
0x14b4   :  { %2970 = vmatpush3.msra.mxu1 %v1394_v47 }
0x14b5   :  { %2971 = vmatprep.subr.mxu1 %v1393_v41 }
0x14b6   :  { %1370 = vrot.lane.b32.xlu1 %v1368_v31, %s3249_s9  ;;  %2972 = vmatpush3.msra.mxu1 %v1393_v41 }
0x14b7   :  { %2990 = vmatprep.subr.mxu1 %v3245_v1 }
0x1514   :  { %v1332_v34 = vpop.permute.xlu1 %1331 }
0x1515   :  { %v1334_v36 = vadd.f32 %v1332_v34, %v1324_v33 }
0x1517   :  { %3147 = vtanh.f32 %v1334_v36 }
0x1521   :  { %v3634_v38 = vpop.permute.xlu1 %1346 }
0x1522   :  { %v1367_v58 = vmul.f32 %v3634_v38, %v1334_v36 }
0x1524   :  { %v3148_v39 = vpop.eup %3147 }
0x1525   :  { %1337 = vrot.lane.b32.xlu0 %v3148_v39, %s3248_s21  ;;  %v1359_v40 = vpop.permute.xlu1 %1358 }
0x1529   :  { %345 = vrot.lane.b32.xlu0 %v3412_v53, %s3249_s9  ;;  %v493_v5 = vpop.permute.xlu1 %492  ;;  %v3663_v53 = vld [vmem:[%s3983_s6 + $0x10] sm:$0xff] }
0x152a   :  { %496 = vst.msk [vmem:[#allocation3 + $0x4] sm:$0xf] %vm199_vm0, %v493_v5  ;;  %2982 = vmatpush3.msra.mxu0 %v3663_v53 }
0x152b   :  { %2983 = vmatprep.subr.mxu0 %v3245_v1 }
0x152d   :  { %640 = vrot.lane.b32.xlu0 %v3480_v4, %s3249_s9  ;;  %v789_v44 = vpop.permute.xlu1 %788  ;;  %v3670_v4 = vld [vmem:[%s3983_s6 + $0x8] sm:$0xff] }
0x152e   :  { %792 = vst.msk [vmem:[#allocation3 + $0xc] sm:$0xf] %vm199_vm0, %v789_v44  ;;  %2984 = vmatpush3.msra.mxu0 %v3670_v4 }
0x152f   :  { %2985 = vmatprep.subr.mxu0 %v3245_v1 }
0x1530   :  { %2986 = vmatpush3.msra.mxu0 %v3675_v48 }
0x1531   :  { %3001 = vmatprep.subr.mxu0 %v3245_v1  ;;  %v1371_v57 = vpop.permute.xlu1 %1370 }
0x1532   :  { %v1373_v60 = vadd.f32 %v1371_v57, %v1367_v58 }
0x1597   :  { %v1338_v8 = vpop.permute.xlu0 %1337 }
0x1598   :  { %v1340_v49 = vmul.f32 %v1338_v8, %v1318_v21 }
0x159a   :  { %v3681_v51 = vmul.f32 %v3634_v38, %v1340_v49 }
0x159b   :  { %v346_v10 = vpop.permute.xlu0 %345 }
0x159c   :  { %348 = vst.msk [vmem:[#allocation3] sm:$0xf] %vm199_vm0, %v346_v10  ;;  %v1361_v54 = vadd.f32 %v1359_v40, %v3681_v51 }
0x159e   :  { %1363 = vrot.lane.b32.xlu0 %v1361_v54, %s3249_s9 }
0x159f   :  { %v641_v59 = vpop.permute.xlu0 %640 }
0x15a0   :  { %644 = vst.msk [vmem:[#allocation3 + $0x8] sm:$0xf] %vm199_vm0, %v641_v59 }
0x15a2   :  { %1375 = vrot.lane.b32.xlu0 %v1373_v60, %s3250_s1 }
0x15a3   :  { %v3093_v61 = vld [vmem:[#allocation3] sm:$0xff]  }
0x15a4   :  { %2973 = vmatprep.mubr.msk.f32.mxu1 %vm205_vm3, %v3093_v61 }
0x15a7   :  { %v3094_v62 = vld [vmem:[#allocation3 + $0x8] sm:$0xff]  }
0x15a8   :  { %2974 = vmatmul.mubr.msk.f32.vlgmr.msra.gmra.mxu1 %vm205_vm3, %v3094_v62 }
0x15a9   :  { %2991 = vmatpush3.msra.mxu1 %v3656_v45 }
0x15aa   :  { %2992 = vmatprep.subr.mxu1 %v3245_v1 }
0x15ab   :  { %2993 = vmatpush3.msra.mxu1 %v3663_v53 }
0x15ac   :  { %2994 = vmatprep.subr.mxu1 %v3245_v1 }
0x15ad   :  { %2995 = vmatpush3.msra.mxu1 %v3670_v4 }
0x15ae   :  { %2996 = vmatprep.subr.mxu1 %v3245_v1 }
0x15af   :  { %2997 = vmatpush3.msra.mxu1 %v3675_v48 }
0x15b0   :  { %3012 = vmatprep.subr.mxu1 %v3245_v1 }
0x1610   :  { %v1364_v0 = vpop.permute.xlu0 %1363 }
0x1611   :  { %1366 = vst.msk [vmem:[#allocation4] sm:$0xf] %vm199_vm0, %v1364_v0 }
0x1612   :  { %1533 = vst.msk [vmem:[#allocation4] sm:$0xf] %vm199_vm0, %v3245_v1 }
0x1614   :  { %v1376_v3 = vpop.permute.xlu0 %1375 }
0x1615   :  { %1378 = vst.msk [vmem:[#allocation5] sm:$0xf] %vm199_vm0, %v1376_v3 }
0x1616   :  { %1534 = vst.msk [vmem:[#allocation5] sm:$0xf] %vm199_vm0, %v3245_v1 }
0x1619   :  { %v1535_v6 = vld [vmem:[#allocation4] sm:$0xf] }
0x161a   :  { %2988 = vmatmul.mubr.msk.f32.vlgmr.msra.gmra.mxu0 %vm205_vm3, %v1535_v6  ;;  %v1639_v29 = vmul.f32 %v1535_v6, %v3401_v46 }
0x161b   :  { %3002 = vmatpush3.msra.mxu0 %v3656_v45  ;;  %3009 = vmatprep.mubr.msk.f32.mxu0 %vm3246_vm1, %v3245_v1 }
0x161c   :  { %3003 = vmatprep.subr.mxu0 %v3245_v1 }
0x161d   :  { %v1536_v7 = vld [vmem:[#allocation5] sm:$0xf]  ;;  %3004 = vmatpush3.msra.mxu0 %v3663_v53 }
0x161e   :  { %1618 = vrot.lane.b32.xlu0 %v1536_v7, %s3249_s9  ;;  %3005 = vmatprep.subr.mxu0 %v3245_v1  ;;  %v1651_v47 = vmul.f32 %v1536_v7, %v3401_v46 }
0x161f   :  { %3006 = vmatpush3.msra.mxu0 %v3670_v4 }
0x1620   :  { %3007 = vmatprep.subr.mxu0 %v3245_v1 }
0x1621   :  { %3008 = vmatpush3.msra.mxu0 %v3675_v48 }
0x1622   :  { %3023 = vmatprep.subr.mxu0 %v3245_v1 }
0x1668   :  { %v2975_v13 = vpop.f32.mrf.mxu1 }
0x1669   :  { %v1500_v14 = vadd.f32 %v2975_v13, %v3721_v12 }
0x166a   :  { %v1494_v15 = vpop.f32.mrf.mxu1 }
0x166b   :  { %v1518_v17 = vcombine.high %v1500_v14, %v1500_v14  ;;  %1527 = vst [vmem:[#allocation2 + $0x8] sm:$0xf] %v1500_v14  ;;  %v1495_v32 = vadd.f32 %v3721_v12, %v1494_v15 }
0x166d   :  { %1528 = vst [vmem:[#allocation2 + $0xc] sm:$0xf] %v1518_v17  ;;  %v1517_v19 = vcombine.high %v1495_v32, %v1495_v32  ;;  %1525 = vst [vmem:[#allocation2] sm:$0xf] %v1495_v32 }
0x166f   :  { %1526 = vst [vmem:[#allocation2 + $0x4] sm:$0xf] %v1517_v19 }
0x1674   :  { %v1537_v20 = vld [vmem:[#allocation2] sm:$0xf] }
0x1676   :  { %v1669_v32 = vld [vmem:[#allocation2 + $0x4] sm:$0xf] }
0x1690   :  { %v1619_v39 = vpop.permute.xlu0 %1618 }
0x16da   :  { %v1607_v21 = vpop.f32.mrf.mxu0 }
0x16db   :  { %v1611_v22 = vadd.f32 %v1607_v21, %v1537_v20 }
0x16dc   :  { %v2989_v23 = vpop.f32.mrf.mxu0 }
0x16dd   :  { %3149 = vtanh.f32 %v1611_v22  ;;  %v1612_v28 = vmul.f32 0.5, %v1611_v22 }
0x16df   :  { %3151 = vtanh.f32 %v1612_v28 }
0x16ea   :  { %v3150_v26 = vpop.eup %3149 }
0x16eb   :  { %1623 = vrot.lane.b32.xlu1 %v3150_v26, %s3248_s21 }
0x16ec   :  { %v3152_v31 = vpop.eup %3151 }
0x16ed   :  { %v1614_v33 = vadd.f32 1.0, %v3152_v31 }
0x16ef   :  { %v1615_v34 = vmul.f32 0.5, %v1614_v33 }
0x16f1   :  { %v1621_v40 = vmul.f32 %v1619_v39, %v1615_v34 }
0x175d   :  { %v1624_v36 = vpop.permute.xlu1 %1623 }
0x175e   :  { %v1626_v37 = vmul.f32 %v1624_v36, %v1615_v34 }
0x1760   :  { %1628 = vrot.lane.b32.xlu1 %v1626_v37, %s3249_s9 }
0x1764   :  { %1641 = vrot.lane.b32.xlu1 %v1639_v29, %s3250_s1 }
0x1768   :  { %1084 = vrot.lane.b32.xlu1 %v3581_v9, %s3249_s9 }
0x176c   :  { %1380 = vrot.lane.b32.xlu1 %v3681_v51, %s3249_s9 }
0x1770   :  { %1653 = vrot.lane.b32.xlu1 %v1651_v47, %s3249_s9 }
0x17d2   :  { %v1629_v41 = vpop.permute.xlu1 %1628 }
0x17d3   :  { %v1631_v5 = vadd.f32 %v1629_v41, %v1621_v40 }
0x17d5   :  { %3153 = vtanh.f32 %v1631_v5  ;;  %v1650_v59 = vmul.f32 %v1631_v5, %v3409_v52 }
0x17d6   :  { %v1642_v44 = vpop.permute.xlu1 %1641 }
0x17da   :  { %v1085_v8 = vpop.permute.xlu1 %1084 }
0x17db   :  { %1088 = vst.msk [vmem:[#allocation3 + $0x14] sm:$0xf] %vm199_vm0, %v1085_v8 }
0x17de   :  { %v1381_v49 = vpop.permute.xlu1 %1380 }
0x17df   :  { %1384 = vst.msk [vmem:[#allocation3 + $0x1c] sm:$0xf] %vm199_vm0, %v1381_v49 }
0x17e2   :  { %v3154_v9 = vpop.eup %3153  ;;  %v1654_v58 = vpop.permute.xlu1 %1653 }
0x17e3   :  { %1634 = vrot.lane.b32.xlu0 %v3154_v9, %s3248_s21 }
0x17e7   :  { %936 = vrot.lane.b32.xlu0 %v3547_v30, %s3249_s9  ;;  %v1656_v30 = vadd.f32 %v1654_v58, %v1650_v59  ;;  %v1801_v58 = vld [vmem:[#allocation2 + $0x8] sm:$0xf] }
0x17eb   :  { %1232 = vrot.lane.b32.xlu0 %v3605_v55, %s3249_s9 }
0x1855   :  { %v1635_v46 = vpop.permute.xlu0 %1634 }
0x1856   :  { %v1637_v51 = vmul.f32 %v1635_v46, %v1615_v34 }
0x1858   :  { %v3743_v10 = vmul.f32 %v1637_v51, %v3409_v52 }
0x1859   :  { %v937_v54 = vpop.permute.xlu0 %936 }
0x185a   :  { %940 = vst.msk [vmem:[#allocation3 + $0x10] sm:$0xf] %vm199_vm0, %v937_v54  ;;  %v1644_v57 = vadd.f32 %v1642_v44, %v3743_v10 }
0x185c   :  { %1646 = vrot.lane.b32.xlu0 %v1644_v57, %s3249_s9 }
0x185d   :  { %v1233_v60 = vpop.permute.xlu0 %1232 }
0x185e   :  { %1236 = vst.msk [vmem:[#allocation3 + $0x18] sm:$0xf] %vm199_vm0, %v1233_v60 }
0x1860   :  { %1658 = vrot.lane.b32.xlu0 %v1656_v30, %s3250_s1 }
0x1861   :  { %v3095_v55 = vld [vmem:[#allocation3 + $0x10] sm:$0xff]  }
0x1862   :  { %2976 = vmatprep.mubr.msk.f32.mxu1 %vm205_vm3, %v3095_v55 }
0x1865   :  { %v3096_v61 = vld [vmem:[#allocation3 + $0x18] sm:$0xff]  }
0x1866   :  { %2977 = vmatmul.mubr.msk.f32.gmra.mxu1 %vm205_vm3, %v3096_v61 }
0x1867   :  { %2998 = vmatprep.mubr.msk.f32.mxu1 %vm3246_vm1, %v3245_v1 }
0x18ce   :  { %v1647_v62 = vpop.permute.xlu0 %1646 }
0x18cf   :  { %1649 = vst.msk [vmem:[#allocation4] sm:$0xf] %vm199_vm0, %v1647_v62 }
0x18d2   :  { %v1659_v52 = vpop.permute.xlu0 %1658 }
0x18d3   :  { %1661 = vst.msk [vmem:[#allocation5] sm:$0xf] %vm199_vm0, %v1659_v52 }
0x18d6   :  { %v1667_v0 = vld [vmem:[#allocation4] sm:$0xf] }
0x18d7   :  { %2999 = vmatmul.mubr.msk.f32.vlgmr.msra.gmra.mxu1 %vm205_vm3, %v1667_v0 }
0x18d8   :  { %3013 = vmatpush3.msra.mxu1 %v3656_v45  ;;  %3020 = vmatprep.mubr.msk.f32.mxu1 %vm3246_vm1, %v3245_v1 }
0x18d9   :  { %3014 = vmatprep.subr.mxu1 %v3245_v1 }
0x18da   :  { %v1668_v3 = vld [vmem:[#allocation5] sm:$0xf]  ;;  %3015 = vmatpush3.msra.mxu1 %v3663_v53 }
0x18db   :  { %1750 = vrot.lane.b32.xlu0 %v1668_v3, %s3249_s9  ;;  %3016 = vmatprep.subr.mxu1 %v3245_v1  ;;  %v1783_v36 = vmul.f32 %v1668_v3, %v3436_v18 }
0x18dc   :  { %3017 = vmatpush3.msra.mxu1 %v3670_v4 }
0x18dd   :  { %3018 = vmatprep.subr.mxu1 %v3245_v1 }
0x18de   :  { %3019 = vmatpush3.msra.mxu1 %v3675_v48 }
0x18df   :  { %3034 = vmatprep.subr.mxu1 %v3245_v1 }
0x1926   :  { %v2978_v6 = vpop.f32.mrf.mxu1 }
0x1927   :  { %v1510_v7 = vadd.f32 %v2978_v6, %v3721_v12 }
0x1928   :  { %v1504_v13 = vpop.f32.mrf.mxu1 }
0x1929   :  { %v1520_v14 = vcombine.high %v1510_v7, %v1510_v7  ;;  %1531 = vst [vmem:[#allocation2 + $0x18] sm:$0xf] %v1510_v7  ;;  %v1505_v15 = vadd.f32 %v3721_v12, %v1504_v13  ;;  %v1771_v12 = vmul.f32 %v1667_v0, %v3436_v18 }
0x192b   :  { %1532 = vst [vmem:[#allocation2 + $0x1c] sm:$0xf] %v1520_v14  ;;  %v1519_v17 = vcombine.high %v1505_v15, %v1505_v15  ;;  %1529 = vst [vmem:[#allocation2 + $0x10] sm:$0xf] %v1505_v15 }
0x192d   :  { %1530 = vst [vmem:[#allocation2 + $0x14] sm:$0xf] %v1519_v17 }
0x194d   :  { %v1751_v37 = vpop.permute.xlu0 %1750 }
0x1997   :  { %v1739_v19 = vpop.f32.mrf.mxu1 }
0x1998   :  { %v1743_v20 = vadd.f32 %v1739_v19, %v1669_v32 }
0x1999   :  { %v3000_v21 = vpop.f32.mrf.mxu1 }
0x199a   :  { %3155 = vtanh.f32 %v1743_v20  ;;  %v1744_v23 = vmul.f32 0.5, %v1743_v20 }
0x199c   :  { %3157 = vtanh.f32 %v1744_v23 }
0x19a7   :  { %v3156_v22 = vpop.eup %3155 }
0x19a8   :  { %1755 = vrot.lane.b32.xlu1 %v3156_v22, %s3248_s21 }
0x19a9   :  { %v3158_v26 = vpop.eup %3157 }
0x19aa   :  { %v1746_v28 = vadd.f32 1.0, %v3158_v26 }
0x19ac   :  { %v1747_v31 = vmul.f32 0.5, %v1746_v28 }
0x19ae   :  { %v1753_v29 = vmul.f32 %v1751_v37, %v1747_v31 }
0x1a1a   :  { %v1756_v33 = vpop.permute.xlu1 %1755 }
0x1a1b   :  { %v1758_v34 = vmul.f32 %v1756_v33, %v1747_v31 }
0x1a1d   :  { %1760 = vrot.lane.b32.xlu1 %v1758_v34, %s3249_s9 }
0x1a21   :  { %1773 = vrot.lane.b32.xlu1 %v1771_v12, %s3250_s1 }
0x1a25   :  { %1785 = vrot.lane.b32.xlu1 %v1783_v36, %s3249_s9  ;;  %v1933_v36 = vld [vmem:[#allocation2 + $0xc] sm:$0xf] }
0x1a8f   :  { %v1761_v47 = vpop.permute.xlu1 %1760 }
0x1a90   :  { %v1763_v39 = vadd.f32 %v1761_v47, %v1753_v29 }
0x1a92   :  { %3159 = vtanh.f32 %v1763_v39  ;;  %v1782_v18 = vmul.f32 %v1763_v39, %v3443_v25 }
0x1a93   :  { %v1774_v41 = vpop.permute.xlu1 %1773 }
0x1a97   :  { %v1786_v9 = vpop.permute.xlu1 %1785 }
0x1a98   :  { %v1788_v46 = vadd.f32 %v1786_v9, %v1782_v18 }
0x1a9f   :  { %v3160_v40 = vpop.eup %3159 }
0x1aa0   :  { %1766 = vrot.lane.b32.xlu0 %v3160_v40, %s3248_s21 }
0x1b12   :  { %v1767_v5 = vpop.permute.xlu0 %1766 }
0x1b13   :  { %v1769_v44 = vmul.f32 %v1767_v5, %v1747_v31 }
0x1b15   :  { %v3779_v8 = vmul.f32 %v1769_v44, %v3443_v25 }
0x1b17   :  { %v1776_v49 = vadd.f32 %v1774_v41, %v3779_v8 }
0x1b19   :  { %1778 = vrot.lane.b32.xlu0 %v1776_v49, %s3249_s9 }
0x1b1d   :  { %1790 = vrot.lane.b32.xlu0 %v1788_v46, %s3250_s1 }
0x1b8b   :  { %v1779_v51 = vpop.permute.xlu0 %1778 }
0x1b8c   :  { %1781 = vst.msk [vmem:[#allocation4] sm:$0xf] %vm199_vm0, %v1779_v51 }
0x1b8f   :  { %v1791_v54 = vpop.permute.xlu0 %1790 }
0x1b90   :  { %1793 = vst.msk [vmem:[#allocation5] sm:$0xf] %vm199_vm0, %v1791_v54 }
0x1b93   :  { %v1799_v57 = vld [vmem:[#allocation4] sm:$0xf] }
0x1b94   :  { %3010 = vmatmul.mubr.msk.f32.vlgmr.msra.gmra.mxu0 %vm205_vm3, %v1799_v57  ;;  %v1903_v7 = vmul.f32 %v1799_v57, %v3470_v56 }
0x1b95   :  { %3024 = vmatpush3.msra.mxu0 %v3656_v45  ;;  %3031 = vmatprep.mubr.msk.f32.mxu0 %vm3246_vm1, %v3245_v1 }
0x1b96   :  { %3025 = vmatprep.subr.mxu0 %v3245_v1 }
0x1b97   :  { %v1800_v25 = vld [vmem:[#allocation5] sm:$0xf]  ;;  %3026 = vmatpush3.msra.mxu0 %v3663_v53 }
0x1b98   :  { %1882 = vrot.lane.b32.xlu0 %v1800_v25, %s3249_s9  ;;  %3027 = vmatprep.subr.mxu0 %v3245_v1  ;;  %v1915_v13 = vmul.f32 %v1800_v25, %v3470_v56 }
0x1b99   :  { %3028 = vmatpush3.msra.mxu0 %v3670_v4 }
0x1b9a   :  { %3029 = vmatprep.subr.mxu0 %v3245_v1 }
0x1b9b   :  { %3030 = vmatpush3.msra.mxu0 %v3675_v48 }
0x1b9c   :  { %3045 = vmatprep.subr.mxu0 %v3245_v1 }
0x1c0a   :  { %v1883_v14 = vpop.permute.xlu0 %1882 }
0x1c54   :  { %v1871_v59 = vpop.f32.mrf.mxu0 }
0x1c55   :  { %v1875_v60 = vadd.f32 %v1871_v59, %v1801_v58 }
0x1c56   :  { %v3011_v30 = vpop.f32.mrf.mxu0 }
0x1c57   :  { %3161 = vtanh.f32 %v1875_v60  ;;  %v1876_v61 = vmul.f32 0.5, %v1875_v60 }
0x1c59   :  { %3163 = vtanh.f32 %v1876_v61 }
0x1c64   :  { %v3162_v55 = vpop.eup %3161 }
0x1c65   :  { %1887 = vrot.lane.b32.xlu1 %v3162_v55, %s3248_s21 }
0x1c66   :  { %v3164_v62 = vpop.eup %3163 }
0x1c67   :  { %v1878_v52 = vadd.f32 1.0, %v3164_v62 }
0x1c69   :  { %v1879_v0 = vmul.f32 0.5, %v1878_v52 }
0x1c6b   :  { %v1885_v15 = vmul.f32 %v1883_v14, %v1879_v0 }
0x1cd7   :  { %v1888_v3 = vpop.permute.xlu1 %1887 }
0x1cd8   :  { %v1890_v6 = vmul.f32 %v1888_v3, %v1879_v0 }
0x1cda   :  { %1892 = vrot.lane.b32.xlu1 %v1890_v6, %s3249_s9 }
0x1cde   :  { %1905 = vrot.lane.b32.xlu1 %v1903_v7, %s3250_s1  ;;  %v2065_v7 = vld [vmem:[#allocation2 + $0x10] sm:$0xf] }
0x1ce2   :  { %1917 = vrot.lane.b32.xlu1 %v1915_v13, %s3249_s9 }
0x1d4c   :  { %v1893_v17 = vpop.permute.xlu1 %1892 }
0x1d4d   :  { %v1895_v32 = vadd.f32 %v1893_v17, %v1885_v15 }
0x1d4f   :  { %3165 = vtanh.f32 %v1895_v32  ;;  %v1914_v56 = vmul.f32 %v1895_v32, %v3477_v63 }
0x1d50   :  { %v1906_v20 = vpop.permute.xlu1 %1905 }
0x1d54   :  { %v1918_v28 = vpop.permute.xlu1 %1917 }
0x1d55   :  { %v1920_v31 = vadd.f32 %v1918_v28, %v1914_v56 }
0x1d5c   :  { %v3166_v19 = vpop.eup %3165 }
0x1d5d   :  { %1898 = vrot.lane.b32.xlu0 %v3166_v19, %s3248_s21 }
0x1dcf   :  { %v1899_v21 = vpop.permute.xlu0 %1898 }
0x1dd0   :  { %v1901_v22 = vmul.f32 %v1899_v21, %v1879_v0 }
0x1dd2   :  { %v3807_v23 = vmul.f32 %v1901_v22, %v3477_v63 }
0x1dd4   :  { %v1908_v26 = vadd.f32 %v1906_v20, %v3807_v23 }
0x1dd6   :  { %1910 = vrot.lane.b32.xlu0 %v1908_v26, %s3249_s9 }
0x1dda   :  { %1922 = vrot.lane.b32.xlu0 %v1920_v31, %s3250_s1 }
0x1e48   :  { %v1911_v33 = vpop.permute.xlu0 %1910 }
0x1e49   :  { %1913 = vst.msk [vmem:[#allocation4] sm:$0xf] %vm199_vm0, %v1911_v33 }
0x1e4c   :  { %v1923_v34 = vpop.permute.xlu0 %1922 }
0x1e4d   :  { %1925 = vst.msk [vmem:[#allocation5] sm:$0xf] %vm199_vm0, %v1923_v34 }
0x1e50   :  { %v1931_v12 = vld [vmem:[#allocation4] sm:$0xf] }
0x1e51   :  { %3021 = vmatmul.mubr.msk.f32.vlgmr.msra.gmra.mxu1 %vm205_vm3, %v1931_v12  ;;  %v2035_v18 = vmul.f32 %v1931_v12, %v3504_v35 }
0x1e52   :  { %3035 = vmatpush3.msra.mxu1 %v3656_v45  ;;  %3042 = vmatprep.mubr.msk.f32.mxu1 %vm3246_vm1, %v3245_v1 }
0x1e53   :  { %3036 = vmatprep.subr.mxu1 %v3245_v1 }
0x1e54   :  { %v1932_v63 = vld [vmem:[#allocation5] sm:$0xf]  ;;  %3037 = vmatpush3.msra.mxu1 %v3663_v53 }
0x1e55   :  { %2014 = vrot.lane.b32.xlu0 %v1932_v63, %s3249_s9  ;;  %3038 = vmatprep.subr.mxu1 %v3245_v1  ;;  %v2047_v46 = vmul.f32 %v1932_v63, %v3504_v35 }
0x1e56   :  { %3039 = vmatpush3.msra.mxu1 %v3670_v4 }
0x1e57   :  { %3040 = vmatprep.subr.mxu1 %v3245_v1 }
0x1e58   :  { %3041 = vmatpush3.msra.mxu1 %v3675_v48 }
0x1e59   :  { %3056 = vmatprep.subr.mxu1 %v3245_v1 }
0x1ec7   :  { %v2015_v51 = vpop.permute.xlu0 %2014 }
0x1f11   :  { %v2003_v37 = vpop.f32.mrf.mxu1 }
0x1f12   :  { %v2007_v29 = vadd.f32 %v2003_v37, %v1933_v36 }
0x1f13   :  { %v3022_v47 = vpop.f32.mrf.mxu1 }
0x1f14   :  { %3167 = vtanh.f32 %v2007_v29  ;;  %v2008_v40 = vmul.f32 0.5, %v2007_v29 }
0x1f16   :  { %3169 = vtanh.f32 %v2008_v40 }
0x1f21   :  { %v3168_v39 = vpop.eup %3167 }
0x1f22   :  { %2019 = vrot.lane.b32.xlu1 %v3168_v39, %s3248_s21 }
0x1f23   :  { %v3170_v41 = vpop.eup %3169 }
0x1f24   :  { %v2010_v5 = vadd.f32 1.0, %v3170_v41 }
0x1f26   :  { %v2011_v44 = vmul.f32 0.5, %v2010_v5 }
0x1f28   :  { %v2017_v54 = vmul.f32 %v2015_v51, %v2011_v44 }
0x1f94   :  { %v2020_v49 = vpop.permute.xlu1 %2019 }
0x1f95   :  { %v2022_v9 = vmul.f32 %v2020_v49, %v2011_v44 }
0x1f97   :  { %2024 = vrot.lane.b32.xlu1 %v2022_v9, %s3249_s9  ;;  %v2197_v9 = vld [vmem:[#allocation2 + $0x14] sm:$0xf] }
0x1f9b   :  { %2037 = vrot.lane.b32.xlu1 %v2035_v18, %s3250_s1 }
0x1f9f   :  { %2049 = vrot.lane.b32.xlu1 %v2047_v46, %s3249_s9 }
0x2009   :  { %v2025_v57 = vpop.permute.xlu1 %2024 }
0x200a   :  { %v2027_v25 = vadd.f32 %v2025_v57, %v2017_v54 }
0x200c   :  { %3171 = vtanh.f32 %v2027_v25  ;;  %v2046_v35 = vmul.f32 %v2027_v25, %v3511_v42 }
0x200d   :  { %v2038_v59 = vpop.permute.xlu1 %2037 }
0x2011   :  { %v2050_v62 = vpop.permute.xlu1 %2049 }
0x2012   :  { %v2052_v52 = vadd.f32 %v2050_v62, %v2046_v35 }
0x2019   :  { %v3172_v58 = vpop.eup %3171 }
0x201a   :  { %2030 = vrot.lane.b32.xlu0 %v3172_v58, %s3248_s21 }
0x208c   :  { %v2031_v60 = vpop.permute.xlu0 %2030 }
0x208d   :  { %v2033_v30 = vmul.f32 %v2031_v60, %v2011_v44 }
0x208f   :  { %v3835_v55 = vmul.f32 %v2033_v30, %v3511_v42 }
0x2091   :  { %v2040_v61 = vadd.f32 %v2038_v59, %v3835_v55 }
0x2093   :  { %2042 = vrot.lane.b32.xlu0 %v2040_v61, %s3249_s9 }
0x2097   :  { %2054 = vrot.lane.b32.xlu0 %v2052_v52, %s3250_s1 }
0x2105   :  { %v2043_v0 = vpop.permute.xlu0 %2042 }
0x2106   :  { %2045 = vst.msk [vmem:[#allocation4] sm:$0xf] %vm199_vm0, %v2043_v0 }
0x2109   :  { %v2055_v3 = vpop.permute.xlu0 %2054 }
0x210a   :  { %2057 = vst.msk [vmem:[#allocation5] sm:$0xf] %vm199_vm0, %v2055_v3 }
0x210d   :  { %v2063_v6 = vld [vmem:[#allocation4] sm:$0xf] }
0x210e   :  { %3032 = vmatmul.mubr.msk.f32.vlgmr.msra.gmra.mxu0 %vm205_vm3, %v2063_v6  ;;  %v2167_v28 = vmul.f32 %v2063_v6, %v3537_v16 }
0x210f   :  { %3046 = vmatpush3.msra.mxu0 %v3656_v45  ;;  %3053 = vmatprep.mubr.msk.f32.mxu0 %vm3246_vm1, %v3245_v1 }
0x2110   :  { %3047 = vmatprep.subr.mxu0 %v3245_v1 }
0x2111   :  { %v2064_v42 = vld [vmem:[#allocation5] sm:$0xf]  ;;  %3048 = vmatpush3.msra.mxu0 %v3663_v53 }
0x2112   :  { %2146 = vrot.lane.b32.xlu0 %v2064_v42, %s3249_s9  ;;  %3049 = vmatprep.subr.mxu0 %v3245_v1  ;;  %v2179_v56 = vmul.f32 %v2064_v42, %v3537_v16 }
0x2113   :  { %3050 = vmatpush3.msra.mxu0 %v3670_v4 }
0x2114   :  { %3051 = vmatprep.subr.mxu0 %v3245_v1 }
0x2115   :  { %3052 = vmatpush3.msra.mxu0 %v3675_v48 }
0x2184   :  { %v2147_v31 = vpop.permute.xlu0 %2146 }
0x21ce   :  { %v2135_v13 = vpop.f32.mrf.mxu0 }
0x21cf   :  { %v2139_v14 = vadd.f32 %v2135_v13, %v2065_v7 }
0x21d0   :  { %v3033_v15 = vpop.f32.mrf.mxu0 }
0x21d1   :  { %3173 = vtanh.f32 %v2139_v14  ;;  %v2140_v32 = vmul.f32 0.5, %v2139_v14 }
0x21d3   :  { %3175 = vtanh.f32 %v2140_v32  ;;  %v2329_v32 = vld [vmem:[#allocation2 + $0x18] sm:$0xf] }
0x21de   :  { %v3174_v17 = vpop.eup %3173 }
0x21df   :  { %2151 = vrot.lane.b32.xlu1 %v3174_v17, %s3248_s21 }
0x21e0   :  { %v3176_v19 = vpop.eup %3175 }
0x21e1   :  { %v2142_v20 = vadd.f32 1.0, %v3176_v19 }
0x21e3   :  { %v2143_v21 = vmul.f32 0.5, %v2142_v20 }
0x21e5   :  { %v2149_v33 = vmul.f32 %v2147_v31, %v2143_v21 }
0x2251   :  { %v2152_v22 = vpop.permute.xlu1 %2151 }
0x2252   :  { %v2154_v26 = vmul.f32 %v2152_v22, %v2143_v21 }
0x2254   :  { %2156 = vrot.lane.b32.xlu1 %v2154_v26, %s3249_s9 }
0x2258   :  { %2169 = vrot.lane.b32.xlu1 %v2167_v28, %s3250_s1 }
0x225c   :  { %2181 = vrot.lane.b32.xlu1 %v2179_v56, %s3249_s9 }
0x22c6   :  { %v2157_v34 = vpop.permute.xlu1 %2156 }
0x22c7   :  { %v2159_v12 = vadd.f32 %v2157_v34, %v2149_v33 }
0x22c9   :  { %3177 = vtanh.f32 %v2159_v12  ;;  %v2178_v16 = vmul.f32 %v2159_v12, %v3544_v24 }
0x22ca   :  { %v2170_v36 = vpop.permute.xlu1 %2169 }
0x22ce   :  { %v2182_v40 = vpop.permute.xlu1 %2181 }
0x22cf   :  { %v2184_v41 = vadd.f32 %v2182_v40, %v2178_v16 }
0x22d6   :  { %v3178_v63 = vpop.eup %3177 }
0x22d7   :  { %2162 = vrot.lane.b32.xlu0 %v3178_v63, %s3248_s21 }
0x2349   :  { %v2163_v37 = vpop.permute.xlu0 %2162 }
0x234a   :  { %v2165_v29 = vmul.f32 %v2163_v37, %v2143_v21 }
0x234c   :  { %v3862_v47 = vmul.f32 %v2165_v29, %v3544_v24 }
0x234e   :  { %v2172_v39 = vadd.f32 %v2170_v36, %v3862_v47 }
0x2350   :  { %2174 = vrot.lane.b32.xlu0 %v2172_v39, %s3249_s9 }
0x2354   :  { %2186 = vrot.lane.b32.xlu0 %v2184_v41, %s3250_s1 }
0x23c2   :  { %v2175_v5 = vpop.permute.xlu0 %2174 }
0x23c3   :  { %2177 = vst.msk [vmem:[#allocation4] sm:$0xf] %vm199_vm0, %v2175_v5 }
0x23c6   :  { %v2187_v44 = vpop.permute.xlu0 %2186 }
0x23c7   :  { %2189 = vst.msk [vmem:[#allocation5] sm:$0xf] %vm199_vm0, %v2187_v44 }
0x23ca   :  { %v2195_v49 = vld [vmem:[#allocation4] sm:$0xf] }
0x23cb   :  { %3043 = vmatmul.mubr.msk.f32.vlgmr.msra.gmra.mxu1 %vm205_vm3, %v2195_v49 }
0x23cc   :  { %3057 = vmatpush3.msra.mxu1 %v3656_v45  ;;  %3064 = vmatprep.mubr.msk.f32.mxu1 %vm3246_vm1, %v3245_v1 }
0x23cd   :  { %3058 = vmatprep.subr.mxu1 %v3245_v1 }
0x23ce   :  { %v2196_v24 = vld [vmem:[#allocation5] sm:$0xf]  ;;  %3059 = vmatpush3.msra.mxu1 %v3663_v53 }
0x23cf   :  { %2278 = vrot.lane.b32.xlu0 %v2196_v24, %s3249_s9  ;;  %3060 = vmatprep.subr.mxu1 %v3245_v1 }
0x23d0   :  { %3061 = vmatpush3.msra.mxu1 %v3670_v4  ;;  %v2311_v4 = vmul.f32 %v2196_v24, %v3571_v11 }
0x23d1   :  { %3062 = vmatprep.subr.mxu1 %v3245_v1  ;;  %v2299_v1 = vmul.f32 %v2195_v49, %v3571_v11 }
0x23d2   :  { %3063 = vmatpush3.msra.mxu1 %v3675_v48 }
0x2441   :  { %v2279_v48 = vpop.permute.xlu0 %2278 }
0x248b   :  { %v2267_v45 = vpop.f32.mrf.mxu1 }
0x248c   :  { %v2271_v18 = vadd.f32 %v2267_v45, %v2197_v9 }
0x248d   :  { %v3044_v46 = vpop.f32.mrf.mxu1 }
0x248e   :  { %3179 = vtanh.f32 %v2271_v18  ;;  %v2272_v54 = vmul.f32 0.5, %v2271_v18 }
0x2490   :  { %3181 = vtanh.f32 %v2272_v54 }
0x249b   :  { %v3180_v51 = vpop.eup %3179 }
0x249c   :  { %2283 = vrot.lane.b32.xlu1 %v3180_v51, %s3248_s21  ;;  %v2461_v51 = vld [vmem:[#allocation2 + $0x1c] sm:$0xf] }
0x249d   :  { %v3182_v53 = vpop.eup %3181 }
0x249e   :  { %v2274_v57 = vadd.f32 1.0, %v3182_v53 }
0x24a0   :  { %v2275_v25 = vmul.f32 0.5, %v2274_v57 }
0x24a2   :  { %v2281_v60 = vmul.f32 %v2279_v48, %v2275_v25 }
0x250e   :  { %v2284_v58 = vpop.permute.xlu1 %2283 }
0x250f   :  { %v2286_v59 = vmul.f32 %v2284_v58, %v2275_v25 }
0x2511   :  { %2288 = vrot.lane.b32.xlu1 %v2286_v59, %s3249_s9 }
0x2515   :  { %2301 = vrot.lane.b32.xlu1 %v2299_v1, %s3250_s1 }
0x2519   :  { %2313 = vrot.lane.b32.xlu1 %v2311_v4, %s3249_s9 }
0x2583   :  { %v2289_v30 = vpop.permute.xlu1 %2288 }
0x2584   :  { %v2291_v61 = vadd.f32 %v2289_v30, %v2281_v60 }
0x2586   :  { %3183 = vtanh.f32 %v2291_v61  ;;  %v2310_v11 = vmul.f32 %v2291_v61, %v3578_v2 }
0x2587   :  { %v2302_v35 = vpop.permute.xlu1 %2301 }
0x258b   :  { %v2314_v42 = vpop.permute.xlu1 %2313 }
0x258c   :  { %v2316_v7 = vadd.f32 %v2314_v42, %v2310_v11  ;;  %v2600_v11 = vld [vmem:[%s3985_s8 + $0x8] sm:$0xff] }
0x2593   :  { %v3184_v62 = vpop.eup %3183 }
0x2594   :  { %2294 = vrot.lane.b32.xlu0 %v3184_v62, %s3248_s21 }
0x2606   :  { %v2295_v52 = vpop.permute.xlu0 %2294 }
0x2607   :  { %v2297_v0 = vmul.f32 %v2295_v52, %v2275_v25 }
0x2609   :  { %v3889_v3 = vmul.f32 %v2297_v0, %v3578_v2  ;;  %v2601_v0 = vld [vmem:[%s3985_s8 + $0x10] sm:$0xff] }
0x260b   :  { %v2304_v6 = vadd.f32 %v2302_v35, %v3889_v3 }
0x260d   :  { %2306 = vrot.lane.b32.xlu0 %v2304_v6, %s3249_s9 }
0x2611   :  { %2318 = vrot.lane.b32.xlu0 %v2316_v7, %s3250_s1  ;;  %v2599_v7 = vld [vmem:[%s3985_s8] sm:$0xff] }
0x267f   :  { %v2307_v13 = vpop.permute.xlu0 %2306 }
0x2680   :  { %2309 = vst.msk [vmem:[#allocation4] sm:$0xf] %vm199_vm0, %v2307_v13 }
0x2683   :  { %v2319_v14 = vpop.permute.xlu0 %2318 }
0x2684   :  { %2321 = vst.msk [vmem:[#allocation5] sm:$0xf] %vm199_vm0, %v2319_v14 }
0x2687   :  { %v2327_v15 = vld [vmem:[#allocation4] sm:$0xf] }
0x2688   :  { %3054 = vmatmul.mubr.msk.f32.vlgmr.msra.gmra.mxu0 %vm205_vm3, %v2327_v15  ;;  %v2431_v34 = vmul.f32 %v2327_v15, %v3595_v43 }
0x268b   :  { %v2328_v17 = vld [vmem:[#allocation5] sm:$0xf] }
0x268c   :  { %2410 = vrot.lane.b32.xlu0 %v2328_v17, %s3249_s9  ;;  %v2443_v12 = vmul.f32 %v2328_v17, %v3595_v43 }
0x26fe   :  { %v2411_v63 = vpop.permute.xlu0 %2410 }
0x2748   :  { %v2399_v19 = vpop.f32.mrf.mxu0 }
0x2749   :  { %v2403_v2 = vadd.f32 %v2399_v19, %v2329_v32 }
0x274a   :  { %v3055_v20 = vpop.f32.mrf.mxu0 }
0x274b   :  { %3185 = vtanh.f32 %v2403_v2  ;;  %v2404_v22 = vmul.f32 0.5, %v2403_v2 }
0x274d   :  { %3187 = vtanh.f32 %v2404_v22 }
0x2758   :  { %v3186_v21 = vpop.eup %3185 }
0x2759   :  { %2415 = vrot.lane.b32.xlu1 %v3186_v21, %s3248_s21 }
0x275a   :  { %v3188_v26 = vpop.eup %3187 }
0x275b   :  { %v2406_v28 = vadd.f32 1.0, %v3188_v26 }
0x275d   :  { %v2407_v56 = vmul.f32 0.5, %v2406_v28 }
0x275f   :  { %v2413_v36 = vmul.f32 %v2411_v63, %v2407_v56 }
0x27cb   :  { %v2416_v31 = vpop.permute.xlu1 %2415 }
0x27cc   :  { %v2418_v33 = vmul.f32 %v2416_v31, %v2407_v56 }
0x27ce   :  { %2420 = vrot.lane.b32.xlu1 %v2418_v33, %s3249_s9  ;;  %v2760_v33 = vld [vmem:[#allocation6] ss:$0 sm:$0xff] }
0x27d2   :  { %2433 = vrot.lane.b32.xlu1 %v2431_v34, %s3250_s1 }
0x27d6   :  { %2445 = vrot.lane.b32.xlu1 %v2443_v12, %s3249_s9 }
0x2840   :  { %v2421_v37 = vpop.permute.xlu1 %2420 }
0x2841   :  { %v2423_v29 = vadd.f32 %v2421_v37, %v2413_v36 }
0x2843   :  { %3189 = vtanh.f32 %v2423_v29  ;;  %v2442_v24 = vmul.f32 %v2423_v29, %v3602_v50 }
0x2844   :  { %v2434_v40 = vpop.permute.xlu1 %2433 }
0x2848   :  { %v2446_v49 = vpop.permute.xlu1 %2445 }
0x2849   :  { %v2448_v43 = vadd.f32 %v2446_v49, %v2442_v24 }
0x2850   :  { %v3190_v39 = vpop.eup %3189 }
0x2851   :  { %2426 = vrot.lane.b32.xlu0 %v3190_v39, %s3248_s21 }
0x28c3   :  { %v2427_v16 = vpop.permute.xlu0 %2426 }
0x28c4   :  { %v2429_v41 = vmul.f32 %v2427_v16, %v2407_v56 }
0x28c6   :  { %v2430_v5 = vmul.f32 %v2429_v41, %v3602_v50 }
0x28c8   :  { %v2436_v44 = vadd.f32 %v2434_v40, %v2430_v5 }
0x28ca   :  { %2438 = vrot.lane.b32.xlu0 %v2436_v44, %s3249_s9 }
0x28ce   :  { %2450 = vrot.lane.b32.xlu0 %v2448_v43, %s3250_s1 }
0x293c   :  { %v2439_v9 = vpop.permute.xlu0 %2438 }
0x293d   :  { %2441 = vst.msk [vmem:[#allocation4] sm:$0xf] %vm199_vm0, %v2439_v9 }
0x2940   :  { %v2451_v45 = vpop.permute.xlu0 %2450 }
0x2941   :  { %2453 = vst.msk [vmem:[#allocation5] sm:$0xf] %vm199_vm0, %v2451_v45 }
0x2944   :  { %v2459_v18 = vld [vmem:[#allocation4] sm:$0xf] }
0x2945   :  { %3065 = vmatmul.mubr.msk.f32.vlgmr.msra.gmra.mxu1 %vm205_vm3, %v2459_v18  ;;  %v2563_v60 = vmul.f32 %v2459_v18, %v3621_v27 }
0x2948   :  { %v2460_v46 = vld [vmem:[#allocation5] sm:$0xf] }
0x2949   :  { %2542 = vrot.lane.b32.xlu0 %v2460_v46, %s3249_s9  ;;  %v2575_v2 = vmul.f32 %v2460_v46, %v3621_v27 }
0x29bb   :  { %v2543_v30 = vpop.permute.xlu0 %2542 }
0x2a05   :  { %v2531_v54 = vpop.f32.mrf.mxu1 }
0x2a06   :  { %v2535_v50 = vadd.f32 %v2531_v54, %v2461_v51 }
0x2a07   :  { %v3066_v53 = vpop.f32.mrf.mxu1 }
0x2a08   :  { %3191 = vtanh.f32 %v2535_v50  ;;  %v2536_v25 = vmul.f32 0.5, %v2535_v50 }
0x2a0a   :  { %3193 = vtanh.f32 %v2536_v25 }
0x2a15   :  { %v3192_v57 = vpop.eup %3191 }
0x2a16   :  { %2547 = vrot.lane.b32.xlu1 %v3192_v57, %s3248_s21 }
0x2a17   :  { %v3194_v58 = vpop.eup %3193 }
0x2a18   :  { %v2538_v59 = vadd.f32 1.0, %v3194_v58 }
0x2a1a   :  { %v2539_v1 = vmul.f32 0.5, %v2538_v59 }
0x2a1c   :  { %v2545_v61 = vmul.f32 %v2543_v30, %v2539_v1 }
0x2a88   :  { %v2548_v4 = vpop.permute.xlu1 %2547 }
0x2a89   :  { %v2550_v48 = vmul.f32 %v2548_v4, %v2539_v1 }
0x2a8b   :  { %2552 = vrot.lane.b32.xlu1 %v2550_v48, %s3249_s9 }
0x2a8f   :  { %1663 = vrot.lane.b32.xlu1 %v3743_v10, %s3249_s9 }
0x2a93   :  { %1927 = vrot.lane.b32.xlu1 %v3807_v23, %s3249_s9 }
0x2a97   :  { %2191 = vrot.lane.b32.xlu1 %v3862_v47, %s3249_s9  ;;  %v2602_v47 = vld [vmem:[%s3985_s8 + $0x18] sm:$0xff] }
0x2a98   :  { %3067 = vmatprep.subr.mxu0 %v2602_v47 }
0x2a99   :  { %3068 = vmatpush3.msra.mxu0 %v2602_v47 }
0x2a9a   :  { %3069 = vmatprep.subr.mxu0 %v2601_v0 }
0x2a9b   :  { %2455 = vrot.lane.b32.xlu1 %v2430_v5, %s3249_s9  ;;  %3070 = vmatpush3.msra.mxu0 %v2601_v0 }
0x2a9c   :  { %3071 = vmatprep.subr.mxu0 %v2600_v11 }
0x2a9d   :  { %3072 = vmatpush3.msra.mxu0 %v2600_v11 }
0x2a9e   :  { %3073 = vmatprep.subr.mxu0 %v2599_v7 }
0x2a9f   :  { %2565 = vrot.lane.b32.xlu1 %v2563_v60, %s3250_s1  ;;  %3074 = vmatpush3.msra.mxu0 %v2599_v7 }
0x2afd   :  { %v2553_v62 = vpop.permute.xlu1 %2552 }
0x2afe   :  { %v2555_v35 = vadd.f32 %v2553_v62, %v2545_v61 }
0x2b00   :  { %3195 = vtanh.f32 %v2555_v35  ;;  %v2574_v26 = vmul.f32 %v2555_v35, %v3634_v38 }
0x2b01   :  { %v1664_v52 = vpop.permute.xlu1 %1663 }
0x2b02   :  { %1666 = vst.msk [vmem:[#allocation3] sm:$0xf] %vm199_vm0, %v1664_v52 }
0x2b05   :  { %v1928_v10 = vpop.permute.xlu1 %1927 }
0x2b06   :  { %1930 = vst.msk [vmem:[#allocation3 + $0x8] sm:$0xf] %vm199_vm0, %v1928_v10 }
0x2b09   :  { %v2192_v23 = vpop.permute.xlu1 %2191 }
0x2b0a   :  { %2194 = vst.msk [vmem:[#allocation3 + $0x10] sm:$0xf] %vm199_vm0, %v2192_v23 }
0x2b0d   :  { %v3196_v6 = vpop.eup %3195  ;;  %v2456_v42 = vpop.permute.xlu1 %2455 }
0x2b0e   :  { %2458 = vst.msk [vmem:[#allocation3 + $0x18] sm:$0xf] %vm199_vm0, %v2456_v42  ;;  %2558 = vrot.lane.b32.xlu0 %v3196_v6, %s3248_s21 }
0x2b11   :  { %v2566_v17 = vpop.permute.xlu1 %2565 }
0x2b12   :  { %1795 = vrot.lane.b32.xlu0 %v3779_v8, %s3249_s9 }
0x2b16   :  { %2059 = vrot.lane.b32.xlu0 %v3835_v55, %s3249_s9 }
0x2b1a   :  { %2323 = vrot.lane.b32.xlu0 %v3889_v3, %s3249_s9 }
0x2b80   :  { %v2559_v13 = vpop.permute.xlu0 %2558 }
0x2b81   :  { %v2561_v14 = vmul.f32 %v2559_v13, %v2539_v1 }
0x2b83   :  { %v2562_v15 = vmul.f32 %v2561_v14, %v3634_v38 }
0x2b84   :  { %v1796_v32 = vpop.permute.xlu0 %1795 }
0x2b85   :  { %v2568_v19 = vadd.f32 %v2566_v17, %v2562_v15  ;;  %1798 = vst.msk [vmem:[#allocation3 + $0x4] sm:$0xf] %vm199_vm0, %v1796_v32  ;;  %2587 = vrot.lane.b32.xlu0 %v2562_v15, %s3249_s9 }
0x2b87   :  { %2570 = vrot.lane.b32.xlu1 %v2568_v19, %s3249_s9 }
0x2b88   :  { %v2060_v8 = vpop.permute.xlu0 %2059 }
0x2b89   :  { %2062 = vst.msk [vmem:[#allocation3 + $0xc] sm:$0xf] %vm199_vm0, %v2060_v8  ;;  %2577 = vrot.lane.b32.xlu0 %v2575_v2, %s3249_s9 }
0x2b8c   :  { %v2324_v55 = vpop.permute.xlu0 %2323  ;;  %v3097_v3 = vld [vmem:[#allocation3] sm:$0xff]  }
0x2b8d   :  { %2326 = vst.msk [vmem:[#allocation3 + $0x14] sm:$0xf] %vm199_vm0, %v2324_v55  ;;  %3075 = vmatprep.mubr.msk.f32.mxu0 %vm205_vm3, %v3097_v3 }
0x2b90   :  { %v3098_v20 = vld [vmem:[#allocation3 + $0x8] sm:$0xff]  }
0x2b91   :  { %3076 = vmatmul.mubr.msk.f32.vlgmr.msra.gmra.mxu0 %vm205_vm3, %v3098_v20 }
0x2b94   :  { %v3099_v21 = vld [vmem:[#allocation3 + $0x10] sm:$0xff]  }
0x2b95   :  { %3078 = vmatprep.mubr.msk.f32.mxu0 %vm205_vm3, %v3099_v21 }
0x2bf7   :  { %v2588_v27 = vpop.permute.xlu0 %2587 }
0x2bf8   :  { %2590 = vst.msk [vmem:[#allocation3 + $0x1c] sm:$0xf] %vm199_vm0, %v2588_v27 }
0x2bf9   :  { %v2571_v22 = vpop.permute.xlu1 %2570 }
0x2bfa   :  { %2573 = vst.msk [vmem:[#allocation4] sm:$0xf] %vm199_vm0, %v2571_v22 }
0x2bfb   :  { %v2578_v28 = vpop.permute.xlu0 %2577 }
0x2bfc   :  { %v2580_v56 = vadd.f32 %v2578_v28, %v2574_v26 }
0x2bfe   :  { %2582 = vrot.lane.b32.xlu0 %v2580_v56, %s3250_s1 }
0x2bff   :  { %v3100_v31 = vld [vmem:[#allocation3 + $0x18] sm:$0xff]  }
0x2c00   :  { %3079 = vmatmul.mubr.msk.f32.gmra.mxu0 %vm205_vm3, %v3100_v31 }
0x2c51   :  { %v3077_v34 = vpop.f32.mrf.mxu0 }
0x2c52   :  { %v2702_v12 = vadd.f32 %v3077_v34, %v2760_v33 }
0x2c53   :  { %v2696_v63 = vpop.f32.mrf.mxu0 }
0x2c54   :  { %2717 = vst.msk [vmem:[%s3987_s10 + $0x8] sm:$0xff] %vm2715_vm12, %v2702_v12  ;;  %v2697_v36 = vadd.f32 %v2760_v33, %v2696_v63 }
0x2c56   :  { %2716 = vst.msk [vmem:[%s3987_s10] sm:$0xff] %vm2715_vm12, %v2697_v36 }
0x2c70   :  { %v2583_v38 = vpop.permute.xlu0 %2582 }
0x2c71   :  { %2585 = vst.msk [vmem:[#allocation5] sm:$0xf] %vm199_vm0, %v2583_v38 }
0x2cc0   :  { %v3080_v37 = vpop.f32.mrf.mxu0 }
0x2cc1   :  { %v2712_v29 = vadd.f32 %v3080_v37, %v2760_v33 }
0x2cc2   :  { %v2706_v39 = vpop.f32.mrf.mxu0 }
0x2cc3   :  { %2719 = vst.msk [vmem:[%s3987_s10 + $0x18] sm:$0xff] %vm2715_vm12, %v2712_v29  ;;  %v2707_v40 = vadd.f32 %v2760_v33, %v2706_v39 }
0x2cc5   :  { %2718 = vst.msk [vmem:[%s3987_s10 + $0x10] sm:$0xff] %vm2715_vm12, %v2707_v40 }
0x2cc6   :  { %2724 = vsyncpa [#allocation8], 1 }
0x2cc7   :  { %2725 = vsyncpa [#allocation10], 1 }

</bundles_post_ra>
